<compile_context>
chip_gen: v7x
topology: tpu7x:2x2x1
jax: 0.10.0
libtpu: 0.0.40
codegen_flags: <defaults>
</compile_context>

<pallas_src>
import jax
import jax.numpy as jnp
from jax.experimental import pallas as pl
from jax.experimental.pallas import tpu as pltpu

EPS = 1e-5  # nn.InstanceNorm2d default


# ------------------------------- Pallas kernel -------------------------------
def _fill_reflect_pad(pad_ref, t):
    """Write ReflectionPad2d(1) of t [H, W, C] into pad_ref [H+2, W+2, C]."""
    H, W = t.shape[0], t.shape[1]
    pad_ref[1:H + 1, 1:W + 1, :] = t                       # interior
    pad_ref[0:1, 1:W + 1, :] = t[1:2]                      # top row  (reflect row 1)
    pad_ref[H + 1:H + 2, 1:W + 1, :] = t[H - 2:H - 1]      # bottom row (reflect H-2)
    pad_ref[:, 0:1, :] = pad_ref[:, 2:3, :]                # left col  (incl. corners)
    pad_ref[:, W + 1:W + 2, :] = pad_ref[:, W - 1:W, :]    # right col (incl. corners)


def _conv3x3(pad_ref, w_ref, b_ref, H, W, C):
    """3x3 conv over the reflect-padded image in pad_ref.

    w_ref: [9, C_in, C_out] bf16 with tap index k = dy*3 + dx
           (i.e. w_ref[k, i, o] == torch_weight[o, i, dy, dx]).
    Returns f32 [H*W, C_out].
    """
    acc = None
    for k in range(9):                       # static unrolled taps
        dy, dx = k // 3, k % 3
        win = pad_ref[dy:dy + H, dx:dx + W, :].reshape(H * W, C)
        term = jnp.dot(win.astype(jnp.bfloat16), w_ref[k],
                       preferred_element_type=jnp.float32)
        acc = term if acc is None else acc + term
    return acc + b_ref[...].astype(jnp.float32)


def _instance_norm(t):
    """InstanceNorm2d(affine=False) over the spatial rows of t [H*W, C] (one sample)."""
    mu = jnp.mean(t, axis=0, keepdims=True)
    var = jnp.mean(jnp.square(t - mu), axis=0, keepdims=True)
    return (t - mu) * jax.lax.rsqrt(var + EPS)


def _resnet_block_kernel(x_ref, w1_ref, b1_ref, w2_ref, b2_ref, o_ref, pad_ref):
    # x_ref / o_ref: [1, H, W, C] (one batch element per grid step)
    H, W, C = x_ref.shape[1], x_ref.shape[2], x_ref.shape[3]

    # conv1 -> InstanceNorm -> ReLU
    _fill_reflect_pad(pad_ref, x_ref[0])
    h = _instance_norm(_conv3x3(pad_ref, w1_ref, b1_ref, H, W, C))
    h = jnp.maximum(h, 0.0)

    # conv2 -> InstanceNorm
    _fill_reflect_pad(pad_ref, h.reshape(H, W, C))
    y = _instance_norm(_conv3x3(pad_ref, w2_ref, b2_ref, H, W, C))

    # fused residual add, write back in NHWC (lane-dense C)
    o_ref[0] = x_ref[0] + y.reshape(H, W, C)


# --------------------------------- wrapper -----------------------------------
def resnet_block(x_nchw, params):
    """x: [B, C, H, W] float32 (PyTorch NCHW) -> [B, C, H, W]."""
    B, C, H, W = x_nchw.shape
    x = jnp.transpose(x_nchw, (0, 2, 3, 1))                # NHWC: C -> lanes

    w1 = params["w1"].astype(jnp.bfloat16)                 # [9, C, C]
    w2 = params["w2"].astype(jnp.bfloat16)
    b1 = params["b1"].reshape(1, C).astype(jnp.float32)
    b2 = params["b2"].reshape(1, C).astype(jnp.float32)

    out = pl.pallas_call(
        _resnet_block_kernel,
        out_shape=jax.ShapeDtypeStruct((B, H, W, C), jnp.float32),
        grid=(B,),
        in_specs=[
            pl.BlockSpec((1, H, W, C), lambda b: (b, 0, 0, 0)),
            pl.BlockSpec((9, C, C), lambda b: (0, 0, 0)),
            pl.BlockSpec((1, C), lambda b: (0, 0)),
            pl.BlockSpec((9, C, C), lambda b: (0, 0, 0)),
            pl.BlockSpec((1, C), lambda b: (0, 0)),
        ],
        out_specs=pl.BlockSpec((1, H, W, C), lambda b: (b, 0, 0, 0)),
        scratch_shapes=[pltpu.VMEM((H + 2, W + 2, C), jnp.float32)],
        compiler_params=pltpu.CompilerParams(
            dimension_semantics=("parallel",)),
    )(x, w1, b1, w2, b2)

    return jnp.transpose(out, (0, 3, 1, 2))                # back to NCHW


# ---------------------------- pure-JAX reference -----------------------------
def _reference(x_nchw, params):
    x = jnp.transpose(x_nchw, (0, 2, 3, 1))                # NHWC

    def conv(t, w9, b):
        C = t.shape[-1]
        w = w9.reshape(3, 3, C, C)                         # [kh, kw, Cin, Cout]
        tp = jnp.pad(t, ((0, 0), (1, 1), (1, 1), (0, 0)), mode="reflect")
        y = jax.lax.conv_general_dilated(
            tp, w, (1, 1), "VALID",
            dimension_numbers=("NHWC", "HWIO", "NHWC"))
        return y + b

    def inorm(t):
        mu = jnp.mean(t, axis=(1, 2), keepdims=True)
        var = jnp.mean(jnp.square(t - mu), axis=(1, 2), keepdims=True)
        return (t - mu) * jax.lax.rsqrt(var + EPS)

    h = jax.nn.relu(inorm(conv(x, params["w1"], params["b1"])))
    y = inorm(conv(h, params["w2"], params["b2"]))
    return jnp.transpose(x + y, (0, 3, 1, 2))


# ---------------------------------- driver -----------------------------------
if __name__ == "__main__":
    key = jax.random.PRNGKey(0)
    k_x, k_w1, k_b1, k_w2, k_b2 = jax.random.split(key, 5)

    B, DIM, H, W = 2, 128, 16, 16                          # small, lane-dense shapes
    x = jax.random.normal(k_x, (B, DIM, H, W), jnp.float32)

    # Deterministic synthetic weights (Conv2d(dim, dim, 3, bias=True) x2),
    # stored as [9, C_in, C_out] with tap k = dy*3 + dx.
    params = {
        "w1": 0.05 * jax.random.normal(k_w1, (9, DIM, DIM), jnp.float32),
        "b1": 0.01 * jax.random.normal(k_b1, (DIM,), jnp.float32),
        "w2": 0.05 * jax.random.normal(k_w2, (9, DIM, DIM), jnp.float32),
        "b2": 0.01 * jax.random.normal(k_b2, (DIM,), jnp.float32),
    }

    fwd = jax.jit(lambda inp: resnet_block(inp, params))
    out = jax.block_until_ready(fwd(x))

    assert out.shape == (B, DIM, H, W), out.shape
    assert out.dtype == jnp.float32
    assert bool(jnp.all(jnp.isfinite(out)))

    # Correctness vs pure-JAX f32 reference (loose tolerance: kernel matmuls are
    # bf16-operand / f32-accumulate).
    ref = jax.block_until_ready(jax.jit(lambda inp: _reference(inp, params))(x))
    assert bool(jnp.allclose(out, ref, rtol=1e-1, atol=2.5e-1)), (
        float(jnp.max(jnp.abs(out - ref))))

    print("KERNEL_OK")
</pallas_src>

<mosaic_0001>
module attributes {stable_mosaic.version = 11 : i64} {
  func.func @_resnet_block_kernel(%arg0: i32, %arg1: memref<1x16x16x128xf32, #tpu.memory_space<vmem>>, %arg2: memref<9x128x128xbf16, #tpu.memory_space<vmem>>, %arg3: memref<1x128xf32, #tpu.memory_space<vmem>>, %arg4: memref<9x128x128xbf16, #tpu.memory_space<vmem>>, %arg5: memref<1x128xf32, #tpu.memory_space<vmem>>, %arg6: memref<1x16x16x128xf32, #tpu.memory_space<vmem>>, %arg7: memref<18x18x128xf32, #tpu.memory_space<vmem>>) attributes {dimension_semantics = [#tpu.dimension_semantics<parallel>], iteration_bounds = array<i64: 2>, scalar_prefetch = 0 : i64, scratch_operands = 1 : i64, tpu.core_type = #tpu.core_type<tc>, window_params = [{transform_indices = @transform_0, window_bounds = array<i64: 1, 16, 16, 128>}, {pipeline_mode = #tpu.pipeline_mode<synchronous>, transform_indices = @transform_1, window_bounds = array<i64: 9, 128, 128>}, {pipeline_mode = #tpu.pipeline_mode<synchronous>, transform_indices = @transform_2, window_bounds = array<i64: 1, 128>}, {pipeline_mode = #tpu.pipeline_mode<synchronous>, transform_indices = @transform_3, window_bounds = array<i64: 9, 128, 128>}, {pipeline_mode = #tpu.pipeline_mode<synchronous>, transform_indices = @transform_4, window_bounds = array<i64: 1, 128>}, {transform_indices = @transform_5, window_bounds = array<i64: 1, 16, 16, 128>}]} {
    %c0 = arith.constant 0 : index
    %c0_0 = arith.constant 0 : index
    %c0_1 = arith.constant 0 : index
    %c0_2 = arith.constant 0 : index
    %0 = vector.load %arg1[%c0, %c0_0, %c0_1, %c0_2] : memref<1x16x16x128xf32, #tpu.memory_space<vmem>>, vector<1x16x16x128xf32>
    %1 = vector.shape_cast %0 : vector<1x16x16x128xf32> to vector<16x16x128xf32>
    %c1 = arith.constant 1 : index
    %c1_3 = arith.constant 1 : index
    %c0_4 = arith.constant 0 : index
    %2 = vector.load %arg7[%c1, %c1_3, %c0_4] : memref<18x18x128xf32, #tpu.memory_space<vmem>>, vector<16x16x128xf32>
    tpu.vector_store %arg7[%c1, %c1_3, %c0_4], %1 {strides = array<i32>} : memref<18x18x128xf32, #tpu.memory_space<vmem>>, vector<16x16x128xf32>,
    %3 = vector.extract_strided_slice %1 {offsets = [1, 0, 0], sizes = [1, 16, 128], strides = [1, 1, 1]} : vector<16x16x128xf32> to vector<1x16x128xf32>
    %c0_5 = arith.constant 0 : index
    %c1_6 = arith.constant 1 : index
    %c0_7 = arith.constant 0 : index
    %4 = vector.load %arg7[%c0_5, %c1_6, %c0_7] : memref<18x18x128xf32, #tpu.memory_space<vmem>>, vector<1x16x128xf32>
    tpu.vector_store %arg7[%c0_5, %c1_6, %c0_7], %3 {strides = array<i32>} : memref<18x18x128xf32, #tpu.memory_space<vmem>>, vector<1x16x128xf32>,
    %5 = vector.extract_strided_slice %1 {offsets = [14, 0, 0], sizes = [1, 16, 128], strides = [1, 1, 1]} : vector<16x16x128xf32> to vector<1x16x128xf32>
    %c17 = arith.constant 17 : index
    %c1_8 = arith.constant 1 : index
    %c0_9 = arith.constant 0 : index
    %6 = vector.load %arg7[%c17, %c1_8, %c0_9] : memref<18x18x128xf32, #tpu.memory_space<vmem>>, vector<1x16x128xf32>
    tpu.vector_store %arg7[%c17, %c1_8, %c0_9], %5 {strides = array<i32>} : memref<18x18x128xf32, #tpu.memory_space<vmem>>, vector<1x16x128xf32>,
    %c0_10 = arith.constant 0 : index
    %c2 = arith.constant 2 : index
    %c0_11 = arith.constant 0 : index
    %7 = vector.load %arg7[%c0_10, %c2, %c0_11] : memref<18x18x128xf32, #tpu.memory_space<vmem>>, vector<18x1x128xf32>
    %c0_12 = arith.constant 0 : index
    %c0_13 = arith.constant 0 : index
    %c0_14 = arith.constant 0 : index
    %8 = vector.load %arg7[%c0_12, %c0_13, %c0_14] : memref<18x18x128xf32, #tpu.memory_space<vmem>>, vector<18x1x128xf32>
    tpu.vector_store %arg7[%c0_12, %c0_13, %c0_14], %7 {strides = array<i32>} : memref<18x18x128xf32, #tpu.memory_space<vmem>>, vector<18x1x128xf32>,
    %c0_15 = arith.constant 0 : index
    %c15 = arith.constant 15 : index
    %c0_16 = arith.constant 0 : index
    %9 = vector.load %arg7[%c0_15, %c15, %c0_16] : memref<18x18x128xf32, #tpu.memory_space<vmem>>, vector<18x1x128xf32>
    %c0_17 = arith.constant 0 : index
    %c17_18 = arith.constant 17 : index
    %c0_19 = arith.constant 0 : index
    %10 = vector.load %arg7[%c0_17, %c17_18, %c0_19] : memref<18x18x128xf32, #tpu.memory_space<vmem>>, vector<18x1x128xf32>
    tpu.vector_store %arg7[%c0_17, %c17_18, %c0_19], %9 {strides = array<i32>} : memref<18x18x128xf32, #tpu.memory_space<vmem>>, vector<18x1x128xf32>,
    %c0_20 = arith.constant 0 : index
    %c0_21 = arith.constant 0 : index
    %c0_22 = arith.constant 0 : index
    %11 = vector.load %arg7[%c0_20, %c0_21, %c0_22] : memref<18x18x128xf32, #tpu.memory_space<vmem>>, vector<16x16x128xf32>
    %12 = vector.shape_cast %11 : vector<16x16x128xf32> to vector<256x128xf32>
    %13 = arith.truncf %12 : vector<256x128xf32> to vector<256x128xbf16>
    %c0_23 = arith.constant 0 : index
    %c0_24 = arith.constant 0 : index
    %c0_25 = arith.constant 0 : index
    %14 = vector.load %arg2[%c0_23, %c0_24, %c0_25] : memref<9x128x128xbf16, #tpu.memory_space<vmem>>, vector<1x128x128xbf16>
    %15 = vector.shape_cast %14 : vector<1x128x128xbf16> to vector<128x128xbf16>
    %cst = arith.constant dense<0.000000e+00> : vector<256x128xf32>
    %16 = tpu.matmul %13, %15, %cst {dimension_numbers = #tpu.dot_dimension_numbers<[1], [0], [0], [1], [0, 0, 1, 1], [], []>} : vector<256x128xbf16>, vector<128x128xbf16>, vector<256x128xf32> -> vector<256x128xf32>
    %c0_26 = arith.constant 0 : index
    %c1_27 = arith.constant 1 : index
    %c0_28 = arith.constant 0 : index
    %17 = vector.load %arg7[%c0_26, %c1_27, %c0_28] : memref<18x18x128xf32, #tpu.memory_space<vmem>>, vector<16x16x128xf32>
    %18 = vector.shape_cast %17 : vector<16x16x128xf32> to vector<256x128xf32>
    %19 = arith.truncf %18 : vector<256x128xf32> to vector<256x128xbf16>
    %c1_29 = arith.constant 1 : index
    %c0_30 = arith.constant 0 : index
    %c0_31 = arith.constant 0 : index
    %20 = vector.load %arg2[%c1_29, %c0_30, %c0_31] : memref<9x128x128xbf16, #tpu.memory_space<vmem>>, vector<1x128x128xbf16>
    %21 = vector.shape_cast %20 : vector<1x128x128xbf16> to vector<128x128xbf16>
    %cst_32 = arith.constant dense<0.000000e+00> : vector<256x128xf32>
    %22 = tpu.matmul %19, %21, %cst_32 {dimension_numbers = #tpu.dot_dimension_numbers<[1], [0], [0], [1], [0, 0, 1, 1], [], []>} : vector<256x128xbf16>, vector<128x128xbf16>, vector<256x128xf32> -> vector<256x128xf32>
    %23 = arith.addf %16, %22 : vector<256x128xf32>
    %c0_33 = arith.constant 0 : index
    %c2_34 = arith.constant 2 : index
    %c0_35 = arith.constant 0 : index
    %24 = vector.load %arg7[%c0_33, %c2_34, %c0_35] : memref<18x18x128xf32, #tpu.memory_space<vmem>>, vector<16x16x128xf32>
    %25 = vector.shape_cast %24 : vector<16x16x128xf32> to vector<256x128xf32>
    %26 = arith.truncf %25 : vector<256x128xf32> to vector<256x128xbf16>
    %c2_36 = arith.constant 2 : index
    %c0_37 = arith.constant 0 : index
    %c0_38 = arith.constant 0 : index
    %27 = vector.load %arg2[%c2_36, %c0_37, %c0_38] : memref<9x128x128xbf16, #tpu.memory_space<vmem>>, vector<1x128x128xbf16>
    %28 = vector.shape_cast %27 : vector<1x128x128xbf16> to vector<128x128xbf16>
    %cst_39 = arith.constant dense<0.000000e+00> : vector<256x128xf32>
    %29 = tpu.matmul %26, %28, %cst_39 {dimension_numbers = #tpu.dot_dimension_numbers<[1], [0], [0], [1], [0, 0, 1, 1], [], []>} : vector<256x128xbf16>, vector<128x128xbf16>, vector<256x128xf32> -> vector<256x128xf32>
    %30 = arith.addf %23, %29 : vector<256x128xf32>
    %c1_40 = arith.constant 1 : index
    %c0_41 = arith.constant 0 : index
    %c0_42 = arith.constant 0 : index
    %31 = vector.load %arg7[%c1_40, %c0_41, %c0_42] : memref<18x18x128xf32, #tpu.memory_space<vmem>>, vector<16x16x128xf32>
    %32 = vector.shape_cast %31 : vector<16x16x128xf32> to vector<256x128xf32>
    %33 = arith.truncf %32 : vector<256x128xf32> to vector<256x128xbf16>
    %c3 = arith.constant 3 : index
    %c0_43 = arith.constant 0 : index
    %c0_44 = arith.constant 0 : index
    %34 = vector.load %arg2[%c3, %c0_43, %c0_44] : memref<9x128x128xbf16, #tpu.memory_space<vmem>>, vector<1x128x128xbf16>
    %35 = vector.shape_cast %34 : vector<1x128x128xbf16> to vector<128x128xbf16>
    %cst_45 = arith.constant dense<0.000000e+00> : vector<256x128xf32>
    %36 = tpu.matmul %33, %35, %cst_45 {dimension_numbers = #tpu.dot_dimension_numbers<[1], [0], [0], [1], [0, 0, 1, 1], [], []>} : vector<256x128xbf16>, vector<128x128xbf16>, vector<256x128xf32> -> vector<256x128xf32>
    %37 = arith.addf %30, %36 : vector<256x128xf32>
    %c1_46 = arith.constant 1 : index
    %c1_47 = arith.constant 1 : index
    %c0_48 = arith.constant 0 : index
    %38 = vector.load %arg7[%c1_46, %c1_47, %c0_48] : memref<18x18x128xf32, #tpu.memory_space<vmem>>, vector<16x16x128xf32>
    %39 = vector.shape_cast %38 : vector<16x16x128xf32> to vector<256x128xf32>
    %40 = arith.truncf %39 : vector<256x128xf32> to vector<256x128xbf16>
    %c4 = arith.constant 4 : index
    %c0_49 = arith.constant 0 : index
    %c0_50 = arith.constant 0 : index
    %41 = vector.load %arg2[%c4, %c0_49, %c0_50] : memref<9x128x128xbf16, #tpu.memory_space<vmem>>, vector<1x128x128xbf16>
    %42 = vector.shape_cast %41 : vector<1x128x128xbf16> to vector<128x128xbf16>
    %cst_51 = arith.constant dense<0.000000e+00> : vector<256x128xf32>
    %43 = tpu.matmul %40, %42, %cst_51 {dimension_numbers = #tpu.dot_dimension_numbers<[1], [0], [0], [1], [0, 0, 1, 1], [], []>} : vector<256x128xbf16>, vector<128x128xbf16>, vector<256x128xf32> -> vector<256x128xf32>
    %44 = arith.addf %37, %43 : vector<256x128xf32>
    %c1_52 = arith.constant 1 : index
    %c2_53 = arith.constant 2 : index
    %c0_54 = arith.constant 0 : index
    %45 = vector.load %arg7[%c1_52, %c2_53, %c0_54] : memref<18x18x128xf32, #tpu.memory_space<vmem>>, vector<16x16x128xf32>
    %46 = vector.shape_cast %45 : vector<16x16x128xf32> to vector<256x128xf32>
    %47 = arith.truncf %46 : vector<256x128xf32> to vector<256x128xbf16>
    %c5 = arith.constant 5 : index
    %c0_55 = arith.constant 0 : index
    %c0_56 = arith.constant 0 : index
    %48 = vector.load %arg2[%c5, %c0_55, %c0_56] : memref<9x128x128xbf16, #tpu.memory_space<vmem>>, vector<1x128x128xbf16>
    %49 = vector.shape_cast %48 : vector<1x128x128xbf16> to vector<128x128xbf16>
    %cst_57 = arith.constant dense<0.000000e+00> : vector<256x128xf32>
    %50 = tpu.matmul %47, %49, %cst_57 {dimension_numbers = #tpu.dot_dimension_numbers<[1], [0], [0], [1], [0, 0, 1, 1], [], []>} : vector<256x128xbf16>, vector<128x128xbf16>, vector<256x128xf32> -> vector<256x128xf32>
    %51 = arith.addf %44, %50 : vector<256x128xf32>
    %c2_58 = arith.constant 2 : index
    %c0_59 = arith.constant 0 : index
    %c0_60 = arith.constant 0 : index
    %52 = vector.load %arg7[%c2_58, %c0_59, %c0_60] : memref<18x18x128xf32, #tpu.memory_space<vmem>>, vector<16x16x128xf32>
    %53 = vector.shape_cast %52 : vector<16x16x128xf32> to vector<256x128xf32>
    %54 = arith.truncf %53 : vector<256x128xf32> to vector<256x128xbf16>
    %c6 = arith.constant 6 : index
    %c0_61 = arith.constant 0 : index
    %c0_62 = arith.constant 0 : index
    %55 = vector.load %arg2[%c6, %c0_61, %c0_62] : memref<9x128x128xbf16, #tpu.memory_space<vmem>>, vector<1x128x128xbf16>
    %56 = vector.shape_cast %55 : vector<1x128x128xbf16> to vector<128x128xbf16>
    %cst_63 = arith.constant dense<0.000000e+00> : vector<256x128xf32>
    %57 = tpu.matmul %54, %56, %cst_63 {dimension_numbers = #tpu.dot_dimension_numbers<[1], [0], [0], [1], [0, 0, 1, 1], [], []>} : vector<256x128xbf16>, vector<128x128xbf16>, vector<256x128xf32> -> vector<256x128xf32>
    %58 = arith.addf %51, %57 : vector<256x128xf32>
    %c2_64 = arith.constant 2 : index
    %c1_65 = arith.constant 1 : index
    %c0_66 = arith.constant 0 : index
    %59 = vector.load %arg7[%c2_64, %c1_65, %c0_66] : memref<18x18x128xf32, #tpu.memory_space<vmem>>, vector<16x16x128xf32>
    %60 = vector.shape_cast %59 : vector<16x16x128xf32> to vector<256x128xf32>
    %61 = arith.truncf %60 : vector<256x128xf32> to vector<256x128xbf16>
    %c7 = arith.constant 7 : index
    %c0_67 = arith.constant 0 : index
    %c0_68 = arith.constant 0 : index
    %62 = vector.load %arg2[%c7, %c0_67, %c0_68] : memref<9x128x128xbf16, #tpu.memory_space<vmem>>, vector<1x128x128xbf16>
    %63 = vector.shape_cast %62 : vector<1x128x128xbf16> to vector<128x128xbf16>
    %cst_69 = arith.constant dense<0.000000e+00> : vector<256x128xf32>
    %64 = tpu.matmul %61, %63, %cst_69 {dimension_numbers = #tpu.dot_dimension_numbers<[1], [0], [0], [1], [0, 0, 1, 1], [], []>} : vector<256x128xbf16>, vector<128x128xbf16>, vector<256x128xf32> -> vector<256x128xf32>
    %65 = arith.addf %58, %64 : vector<256x128xf32>
    %c2_70 = arith.constant 2 : index
    %c2_71 = arith.constant 2 : index
    %c0_72 = arith.constant 0 : index
    %66 = vector.load %arg7[%c2_70, %c2_71, %c0_72] : memref<18x18x128xf32, #tpu.memory_space<vmem>>, vector<16x16x128xf32>
    %67 = vector.shape_cast %66 : vector<16x16x128xf32> to vector<256x128xf32>
    %68 = arith.truncf %67 : vector<256x128xf32> to vector<256x128xbf16>
    %c8 = arith.constant 8 : index
    %c0_73 = arith.constant 0 : index
    %c0_74 = arith.constant 0 : index
    %69 = vector.load %arg2[%c8, %c0_73, %c0_74] : memref<9x128x128xbf16, #tpu.memory_space<vmem>>, vector<1x128x128xbf16>
    %70 = vector.shape_cast %69 : vector<1x128x128xbf16> to vector<128x128xbf16>
    %cst_75 = arith.constant dense<0.000000e+00> : vector<256x128xf32>
    %71 = tpu.matmul %68, %70, %cst_75 {dimension_numbers = #tpu.dot_dimension_numbers<[1], [0], [0], [1], [0, 0, 1, 1], [], []>} : vector<256x128xbf16>, vector<128x128xbf16>, vector<256x128xf32> -> vector<256x128xf32>
    %72 = arith.addf %65, %71 : vector<256x128xf32>
    %c0_76 = arith.constant 0 : index
    %c0_77 = arith.constant 0 : index
    %73 = vector.load %arg3[%c0_76, %c0_77] : memref<1x128xf32, #tpu.memory_space<vmem>>, vector<1x128xf32>
    %74 = vector.broadcast %73 : vector<1x128xf32> to vector<256x128xf32>
    %75 = arith.addf %72, %74 : vector<256x128xf32>
    %cst_78 = arith.constant dense<0.000000e+00> : vector<128xf32>
    %76 = vector.multi_reduction <add>, %75, %cst_78 [0] : vector<256x128xf32> to vector<128xf32>
    %77 = vector.shape_cast %76 : vector<128xf32> to vector<1x128xf32>
    %cst_79 = arith.constant 2.560000e+02 : f32
    %78 = vector.broadcast %cst_79 : f32 to vector<1x128xf32>
    %79 = arith.divf %77, %78 : vector<1x128xf32>
    %80 = vector.broadcast %79 : vector<1x128xf32> to vector<256x128xf32>
    %81 = arith.subf %75, %80 : vector<256x128xf32>
    %82 = arith.mulf %81, %81 : vector<256x128xf32>
    %cst_80 = arith.constant dense<0.000000e+00> : vector<128xf32>
    %83 = vector.multi_reduction <add>, %82, %cst_80 [0] : vector<256x128xf32> to vector<128xf32>
    %84 = vector.shape_cast %83 : vector<128xf32> to vector<1x128xf32>
    %cst_81 = arith.constant 2.560000e+02 : f32
    %85 = vector.broadcast %cst_81 : f32 to vector<1x128xf32>
    %86 = arith.divf %84, %85 : vector<1x128xf32>
    %87 = vector.broadcast %79 : vector<1x128xf32> to vector<256x128xf32>
    %88 = arith.subf %75, %87 : vector<256x128xf32>
    %cst_82 = arith.constant 9.99999974E-6 : f32
    %89 = vector.broadcast %cst_82 : f32 to vector<1x128xf32>
    %90 = arith.addf %86, %89 : vector<1x128xf32>
    %91 = math.rsqrt %90 : vector<1x128xf32>
    %92 = vector.broadcast %91 : vector<1x128xf32> to vector<256x128xf32>
    %93 = arith.mulf %88, %92 : vector<256x128xf32>
    %cst_83 = arith.constant 0.000000e+00 : f32
    %94 = vector.broadcast %cst_83 : f32 to vector<256x128xf32>
    %95 = arith.maximumf %93, %94 : vector<256x128xf32>
    %96 = vector.shape_cast %95 : vector<256x128xf32> to vector<16x16x128xf32>
    %c1_84 = arith.constant 1 : index
    %c1_85 = arith.constant 1 : index
    %c0_86 = arith.constant 0 : index
    %97 = vector.load %arg7[%c1_84, %c1_85, %c0_86] : memref<18x18x128xf32, #tpu.memory_space<vmem>>, vector<16x16x128xf32>
    tpu.vector_store %arg7[%c1_84, %c1_85, %c0_86], %96 {strides = array<i32>} : memref<18x18x128xf32, #tpu.memory_space<vmem>>, vector<16x16x128xf32>,
    %98 = vector.extract_strided_slice %96 {offsets = [1, 0, 0], sizes = [1, 16, 128], strides = [1, 1, 1]} : vector<16x16x128xf32> to vector<1x16x128xf32>
    %c0_87 = arith.constant 0 : index
    %c1_88 = arith.constant 1 : index
    %c0_89 = arith.constant 0 : index
    %99 = vector.load %arg7[%c0_87, %c1_88, %c0_89] : memref<18x18x128xf32, #tpu.memory_space<vmem>>, vector<1x16x128xf32>
    tpu.vector_store %arg7[%c0_87, %c1_88, %c0_89], %98 {strides = array<i32>} : memref<18x18x128xf32, #tpu.memory_space<vmem>>, vector<1x16x128xf32>,
    %100 = vector.extract_strided_slice %96 {offsets = [14, 0, 0], sizes = [1, 16, 128], strides = [1, 1, 1]} : vector<16x16x128xf32> to vector<1x16x128xf32>
    %c17_90 = arith.constant 17 : index
    %c1_91 = arith.constant 1 : index
    %c0_92 = arith.constant 0 : index
    %101 = vector.load %arg7[%c17_90, %c1_91, %c0_92] : memref<18x18x128xf32, #tpu.memory_space<vmem>>, vector<1x16x128xf32>
    tpu.vector_store %arg7[%c17_90, %c1_91, %c0_92], %100 {strides = array<i32>} : memref<18x18x128xf32, #tpu.memory_space<vmem>>, vector<1x16x128xf32>,
    %c0_93 = arith.constant 0 : index
    %c2_94 = arith.constant 2 : index
    %c0_95 = arith.constant 0 : index
    %102 = vector.load %arg7[%c0_93, %c2_94, %c0_95] : memref<18x18x128xf32, #tpu.memory_space<vmem>>, vector<18x1x128xf32>
    %c0_96 = arith.constant 0 : index
    %c0_97 = arith.constant 0 : index
    %c0_98 = arith.constant 0 : index
    %103 = vector.load %arg7[%c0_96, %c0_97, %c0_98] : memref<18x18x128xf32, #tpu.memory_space<vmem>>, vector<18x1x128xf32>
    tpu.vector_store %arg7[%c0_96, %c0_97, %c0_98], %102 {strides = array<i32>} : memref<18x18x128xf32, #tpu.memory_space<vmem>>, vector<18x1x128xf32>,
    %c0_99 = arith.constant 0 : index
    %c15_100 = arith.constant 15 : index
    %c0_101 = arith.constant 0 : index
    %104 = vector.load %arg7[%c0_99, %c15_100, %c0_101] : memref<18x18x128xf32, #tpu.memory_space<vmem>>, vector<18x1x128xf32>
    %c0_102 = arith.constant 0 : index
    %c17_103 = arith.constant 17 : index
    %c0_104 = arith.constant 0 : index
    %105 = vector.load %arg7[%c0_102, %c17_103, %c0_104] : memref<18x18x128xf32, #tpu.memory_space<vmem>>, vector<18x1x128xf32>
    tpu.vector_store %arg7[%c0_102, %c17_103, %c0_104], %104 {strides = array<i32>} : memref<18x18x128xf32, #tpu.memory_space<vmem>>, vector<18x1x128xf32>,
    %c0_105 = arith.constant 0 : index
    %c0_106 = arith.constant 0 : index
    %c0_107 = arith.constant 0 : index
    %106 = vector.load %arg7[%c0_105, %c0_106, %c0_107] : memref<18x18x128xf32, #tpu.memory_space<vmem>>, vector<16x16x128xf32>
    %107 = vector.shape_cast %106 : vector<16x16x128xf32> to vector<256x128xf32>
    %108 = arith.truncf %107 : vector<256x128xf32> to vector<256x128xbf16>
    %c0_108 = arith.constant 0 : index
    %c0_109 = arith.constant 0 : index
    %c0_110 = arith.constant 0 : index
    %109 = vector.load %arg4[%c0_108, %c0_109, %c0_110] : memref<9x128x128xbf16, #tpu.memory_space<vmem>>, vector<1x128x128xbf16>
    %110 = vector.shape_cast %109 : vector<1x128x128xbf16> to vector<128x128xbf16>
    %cst_111 = arith.constant dense<0.000000e+00> : vector<256x128xf32>
    %111 = tpu.matmul %108, %110, %cst_111 {dimension_numbers = #tpu.dot_dimension_numbers<[1], [0], [0], [1], [0, 0, 1, 1], [], []>} : vector<256x128xbf16>, vector<128x128xbf16>, vector<256x128xf32> -> vector<256x128xf32>
    %c0_112 = arith.constant 0 : index
    %c1_113 = arith.constant 1 : index
    %c0_114 = arith.constant 0 : index
    %112 = vector.load %arg7[%c0_112, %c1_113, %c0_114] : memref<18x18x128xf32, #tpu.memory_space<vmem>>, vector<16x16x128xf32>
    %113 = vector.shape_cast %112 : vector<16x16x128xf32> to vector<256x128xf32>
    %114 = arith.truncf %113 : vector<256x128xf32> to vector<256x128xbf16>
    %c1_115 = arith.constant 1 : index
    %c0_116 = arith.constant 0 : index
    %c0_117 = arith.constant 0 : index
    %115 = vector.load %arg4[%c1_115, %c0_116, %c0_117] : memref<9x128x128xbf16, #tpu.memory_space<vmem>>, vector<1x128x128xbf16>
    %116 = vector.shape_cast %115 : vector<1x128x128xbf16> to vector<128x128xbf16>
    %cst_118 = arith.constant dense<0.000000e+00> : vector<256x128xf32>
    %117 = tpu.matmul %114, %116, %cst_118 {dimension_numbers = #tpu.dot_dimension_numbers<[1], [0], [0], [1], [0, 0, 1, 1], [], []>} : vector<256x128xbf16>, vector<128x128xbf16>, vector<256x128xf32> -> vector<256x128xf32>
    %118 = arith.addf %111, %117 : vector<256x128xf32>
    %c0_119 = arith.constant 0 : index
    %c2_120 = arith.constant 2 : index
    %c0_121 = arith.constant 0 : index
    %119 = vector.load %arg7[%c0_119, %c2_120, %c0_121] : memref<18x18x128xf32, #tpu.memory_space<vmem>>, vector<16x16x128xf32>
    %120 = vector.shape_cast %119 : vector<16x16x128xf32> to vector<256x128xf32>
    %121 = arith.truncf %120 : vector<256x128xf32> to vector<256x128xbf16>
    %c2_122 = arith.constant 2 : index
    %c0_123 = arith.constant 0 : index
    %c0_124 = arith.constant 0 : index
    %122 = vector.load %arg4[%c2_122, %c0_123, %c0_124] : memref<9x128x128xbf16, #tpu.memory_space<vmem>>, vector<1x128x128xbf16>
    %123 = vector.shape_cast %122 : vector<1x128x128xbf16> to vector<128x128xbf16>
    %cst_125 = arith.constant dense<0.000000e+00> : vector<256x128xf32>
    %124 = tpu.matmul %121, %123, %cst_125 {dimension_numbers = #tpu.dot_dimension_numbers<[1], [0], [0], [1], [0, 0, 1, 1], [], []>} : vector<256x128xbf16>, vector<128x128xbf16>, vector<256x128xf32> -> vector<256x128xf32>
    %125 = arith.addf %118, %124 : vector<256x128xf32>
    %c1_126 = arith.constant 1 : index
    %c0_127 = arith.constant 0 : index
    %c0_128 = arith.constant 0 : index
    %126 = vector.load %arg7[%c1_126, %c0_127, %c0_128] : memref<18x18x128xf32, #tpu.memory_space<vmem>>, vector<16x16x128xf32>
    %127 = vector.shape_cast %126 : vector<16x16x128xf32> to vector<256x128xf32>
    %128 = arith.truncf %127 : vector<256x128xf32> to vector<256x128xbf16>
    %c3_129 = arith.constant 3 : index
    %c0_130 = arith.constant 0 : index
    %c0_131 = arith.constant 0 : index
    %129 = vector.load %arg4[%c3_129, %c0_130, %c0_131] : memref<9x128x128xbf16, #tpu.memory_space<vmem>>, vector<1x128x128xbf16>
    %130 = vector.shape_cast %129 : vector<1x128x128xbf16> to vector<128x128xbf16>
    %cst_132 = arith.constant dense<0.000000e+00> : vector<256x128xf32>
    %131 = tpu.matmul %128, %130, %cst_132 {dimension_numbers = #tpu.dot_dimension_numbers<[1], [0], [0], [1], [0, 0, 1, 1], [], []>} : vector<256x128xbf16>, vector<128x128xbf16>, vector<256x128xf32> -> vector<256x128xf32>
    %132 = arith.addf %125, %131 : vector<256x128xf32>
    %c1_133 = arith.constant 1 : index
    %c1_134 = arith.constant 1 : index
    %c0_135 = arith.constant 0 : index
    %133 = vector.load %arg7[%c1_133, %c1_134, %c0_135] : memref<18x18x128xf32, #tpu.memory_space<vmem>>, vector<16x16x128xf32>
    %134 = vector.shape_cast %133 : vector<16x16x128xf32> to vector<256x128xf32>
    %135 = arith.truncf %134 : vector<256x128xf32> to vector<256x128xbf16>
    %c4_136 = arith.constant 4 : index
    %c0_137 = arith.constant 0 : index
    %c0_138 = arith.constant 0 : index
    %136 = vector.load %arg4[%c4_136, %c0_137, %c0_138] : memref<9x128x128xbf16, #tpu.memory_space<vmem>>, vector<1x128x128xbf16>
    %137 = vector.shape_cast %136 : vector<1x128x128xbf16> to vector<128x128xbf16>
    %cst_139 = arith.constant dense<0.000000e+00> : vector<256x128xf32>
    %138 = tpu.matmul %135, %137, %cst_139 {dimension_numbers = #tpu.dot_dimension_numbers<[1], [0], [0], [1], [0, 0, 1, 1], [], []>} : vector<256x128xbf16>, vector<128x128xbf16>, vector<256x128xf32> -> vector<256x128xf32>
    %139 = arith.addf %132, %138 : vector<256x128xf32>
    %c1_140 = arith.constant 1 : index
    %c2_141 = arith.constant 2 : index
    %c0_142 = arith.constant 0 : index
    %140 = vector.load %arg7[%c1_140, %c2_141, %c0_142] : memref<18x18x128xf32, #tpu.memory_space<vmem>>, vector<16x16x128xf32>
    %141 = vector.shape_cast %140 : vector<16x16x128xf32> to vector<256x128xf32>
    %142 = arith.truncf %141 : vector<256x128xf32> to vector<256x128xbf16>
    %c5_143 = arith.constant 5 : index
    %c0_144 = arith.constant 0 : index
    %c0_145 = arith.constant 0 : index
    %143 = vector.load %arg4[%c5_143, %c0_144, %c0_145] : memref<9x128x128xbf16, #tpu.memory_space<vmem>>, vector<1x128x128xbf16>
    %144 = vector.shape_cast %143 : vector<1x128x128xbf16> to vector<128x128xbf16>
    %cst_146 = arith.constant dense<0.000000e+00> : vector<256x128xf32>
    %145 = tpu.matmul %142, %144, %cst_146 {dimension_numbers = #tpu.dot_dimension_numbers<[1], [0], [0], [1], [0, 0, 1, 1], [], []>} : vector<256x128xbf16>, vector<128x128xbf16>, vector<256x128xf32> -> vector<256x128xf32>
    %146 = arith.addf %139, %145 : vector<256x128xf32>
    %c2_147 = arith.constant 2 : index
    %c0_148 = arith.constant 0 : index
    %c0_149 = arith.constant 0 : index
    %147 = vector.load %arg7[%c2_147, %c0_148, %c0_149] : memref<18x18x128xf32, #tpu.memory_space<vmem>>, vector<16x16x128xf32>
    %148 = vector.shape_cast %147 : vector<16x16x128xf32> to vector<256x128xf32>
    %149 = arith.truncf %148 : vector<256x128xf32> to vector<256x128xbf16>
    %c6_150 = arith.constant 6 : index
    %c0_151 = arith.constant 0 : index
    %c0_152 = arith.constant 0 : index
    %150 = vector.load %arg4[%c6_150, %c0_151, %c0_152] : memref<9x128x128xbf16, #tpu.memory_space<vmem>>, vector<1x128x128xbf16>
    %151 = vector.shape_cast %150 : vector<1x128x128xbf16> to vector<128x128xbf16>
    %cst_153 = arith.constant dense<0.000000e+00> : vector<256x128xf32>
    %152 = tpu.matmul %149, %151, %cst_153 {dimension_numbers = #tpu.dot_dimension_numbers<[1], [0], [0], [1], [0, 0, 1, 1], [], []>} : vector<256x128xbf16>, vector<128x128xbf16>, vector<256x128xf32> -> vector<256x128xf32>
    %153 = arith.addf %146, %152 : vector<256x128xf32>
    %c2_154 = arith.constant 2 : index
    %c1_155 = arith.constant 1 : index
    %c0_156 = arith.constant 0 : index
    %154 = vector.load %arg7[%c2_154, %c1_155, %c0_156] : memref<18x18x128xf32, #tpu.memory_space<vmem>>, vector<16x16x128xf32>
    %155 = vector.shape_cast %154 : vector<16x16x128xf32> to vector<256x128xf32>
    %156 = arith.truncf %155 : vector<256x128xf32> to vector<256x128xbf16>
    %c7_157 = arith.constant 7 : index
    %c0_158 = arith.constant 0 : index
    %c0_159 = arith.constant 0 : index
    %157 = vector.load %arg4[%c7_157, %c0_158, %c0_159] : memref<9x128x128xbf16, #tpu.memory_space<vmem>>, vector<1x128x128xbf16>
    %158 = vector.shape_cast %157 : vector<1x128x128xbf16> to vector<128x128xbf16>
    %cst_160 = arith.constant dense<0.000000e+00> : vector<256x128xf32>
    %159 = tpu.matmul %156, %158, %cst_160 {dimension_numbers = #tpu.dot_dimension_numbers<[1], [0], [0], [1], [0, 0, 1, 1], [], []>} : vector<256x128xbf16>, vector<128x128xbf16>, vector<256x128xf32> -> vector<256x128xf32>
    %160 = arith.addf %153, %159 : vector<256x128xf32>
    %c2_161 = arith.constant 2 : index
    %c2_162 = arith.constant 2 : index
    %c0_163 = arith.constant 0 : index
    %161 = vector.load %arg7[%c2_161, %c2_162, %c0_163] : memref<18x18x128xf32, #tpu.memory_space<vmem>>, vector<16x16x128xf32>
    %162 = vector.shape_cast %161 : vector<16x16x128xf32> to vector<256x128xf32>
    %163 = arith.truncf %162 : vector<256x128xf32> to vector<256x128xbf16>
    %c8_164 = arith.constant 8 : index
    %c0_165 = arith.constant 0 : index
    %c0_166 = arith.constant 0 : index
    %164 = vector.load %arg4[%c8_164, %c0_165, %c0_166] : memref<9x128x128xbf16, #tpu.memory_space<vmem>>, vector<1x128x128xbf16>
    %165 = vector.shape_cast %164 : vector<1x128x128xbf16> to vector<128x128xbf16>
    %cst_167 = arith.constant dense<0.000000e+00> : vector<256x128xf32>
    %166 = tpu.matmul %163, %165, %cst_167 {dimension_numbers = #tpu.dot_dimension_numbers<[1], [0], [0], [1], [0, 0, 1, 1], [], []>} : vector<256x128xbf16>, vector<128x128xbf16>, vector<256x128xf32> -> vector<256x128xf32>
    %167 = arith.addf %160, %166 : vector<256x128xf32>
    %c0_168 = arith.constant 0 : index
    %c0_169 = arith.constant 0 : index
    %168 = vector.load %arg5[%c0_168, %c0_169] : memref<1x128xf32, #tpu.memory_space<vmem>>, vector<1x128xf32>
    %169 = vector.broadcast %168 : vector<1x128xf32> to vector<256x128xf32>
    %170 = arith.addf %167, %169 : vector<256x128xf32>
    %cst_170 = arith.constant dense<0.000000e+00> : vector<128xf32>
    %171 = vector.multi_reduction <add>, %170, %cst_170 [0] : vector<256x128xf32> to vector<128xf32>
    %172 = vector.shape_cast %171 : vector<128xf32> to vector<1x128xf32>
    %cst_171 = arith.constant 2.560000e+02 : f32
    %173 = vector.broadcast %cst_171 : f32 to vector<1x128xf32>
    %174 = arith.divf %172, %173 : vector<1x128xf32>
    %175 = vector.broadcast %174 : vector<1x128xf32> to vector<256x128xf32>
    %176 = arith.subf %170, %175 : vector<256x128xf32>
    %177 = arith.mulf %176, %176 : vector<256x128xf32>
    %cst_172 = arith.constant dense<0.000000e+00> : vector<128xf32>
    %178 = vector.multi_reduction <add>, %177, %cst_172 [0] : vector<256x128xf32> to vector<128xf32>
    %179 = vector.shape_cast %178 : vector<128xf32> to vector<1x128xf32>
    %cst_173 = arith.constant 2.560000e+02 : f32
    %180 = vector.broadcast %cst_173 : f32 to vector<1x128xf32>
    %181 = arith.divf %179, %180 : vector<1x128xf32>
    %182 = vector.broadcast %174 : vector<1x128xf32> to vector<256x128xf32>
    %183 = arith.subf %170, %182 : vector<256x128xf32>
    %cst_174 = arith.constant 9.99999974E-6 : f32
    %184 = vector.broadcast %cst_174 : f32 to vector<1x128xf32>
    %185 = arith.addf %181, %184 : vector<1x128xf32>
    %186 = math.rsqrt %185 : vector<1x128xf32>
    %187 = vector.broadcast %186 : vector<1x128xf32> to vector<256x128xf32>
    %188 = arith.mulf %183, %187 : vector<256x128xf32>
    %c0_175 = arith.constant 0 : index
    %c0_176 = arith.constant 0 : index
    %c0_177 = arith.constant 0 : index
    %c0_178 = arith.constant 0 : index
    %189 = vector.load %arg1[%c0_175, %c0_176, %c0_177, %c0_178] : memref<1x16x16x128xf32, #tpu.memory_space<vmem>>, vector<1x16x16x128xf32>
    %190 = vector.shape_cast %189 : vector<1x16x16x128xf32> to vector<16x16x128xf32>
    %191 = vector.shape_cast %188 : vector<256x128xf32> to vector<16x16x128xf32>
    %192 = arith.addf %190, %191 : vector<16x16x128xf32>
    %c0_179 = arith.constant 0 : index
    %c0_180 = arith.constant 0 : index
    %c0_181 = arith.constant 0 : index
    %c0_182 = arith.constant 0 : index
    %193 = vector.load %arg6[%c0_179, %c0_180, %c0_181, %c0_182] : memref<1x16x16x128xf32, #tpu.memory_space<vmem>>, vector<1x16x16x128xf32>
    %194 = vector.shape_cast %193 : vector<1x16x16x128xf32> to vector<16x16x128xf32>
    %195 = vector.shape_cast %192 : vector<16x16x128xf32> to vector<1x16x16x128xf32>
    tpu.vector_store %arg6[%c0_179, %c0_180, %c0_181, %c0_182], %195 {strides = array<i32>} : memref<1x16x16x128xf32, #tpu.memory_space<vmem>>, vector<1x16x16x128xf32>,
    return
  }
  func.func @transform_0(%arg0: i32) -> (i32, i32, i32, i32) {
    %c0_i32 = arith.constant 0 : i32
    %c0_i32_0 = arith.constant 0 : i32
    %c0_i32_1 = arith.constant 0 : i32
    %c0_i32_2 = arith.constant 0 : i32
    return %arg0, %c0_i32, %c0_i32_0, %c0_i32_1 : i32, i32, i32, i32
  }
  func.func @transform_1(%arg0: i32) -> (i32, i32, i32) {
    %c0_i32 = arith.constant 0 : i32
    %c0_i32_0 = arith.constant 0 : i32
    %c0_i32_1 = arith.constant 0 : i32
    %c0_i32_2 = arith.constant 0 : i32
    return %c0_i32, %c0_i32_0, %c0_i32_1 : i32, i32, i32
  }
  func.func @transform_2(%arg0: i32) -> (i32, i32) {
    %c0_i32 = arith.constant 0 : i32
    %c0_i32_0 = arith.constant 0 : i32
    %c0_i32_1 = arith.constant 0 : i32
    return %c0_i32, %c0_i32_0 : i32, i32
  }
  func.func @transform_3(%arg0: i32) -> (i32, i32, i32) {
    %c0_i32 = arith.constant 0 : i32
    %c0_i32_0 = arith.constant 0 : i32
    %c0_i32_1 = arith.constant 0 : i32
    %c0_i32_2 = arith.constant 0 : i32
    return %c0_i32, %c0_i32_0, %c0_i32_1 : i32, i32, i32
  }
  func.func @transform_4(%arg0: i32) -> (i32, i32) {
    %c0_i32 = arith.constant 0 : i32
    %c0_i32_0 = arith.constant 0 : i32
    %c0_i32_1 = arith.constant 0 : i32
    return %c0_i32, %c0_i32_0 : i32, i32
  }
  func.func @transform_5(%arg0: i32) -> (i32, i32, i32, i32) {
    %c0_i32 = arith.constant 0 : i32
    %c0_i32_0 = arith.constant 0 : i32
    %c0_i32_1 = arith.constant 0 : i32
    %c0_i32_2 = arith.constant 0 : i32
    return %arg0, %c0_i32, %c0_i32_0, %c0_i32_1 : i32, i32, i32, i32
  }
}

</mosaic_0001>

<bundles_post_ra>
// kernel: _lambda_.1
= control target key start
LH: loop header
LB: loop body
LE: loop exit
PB: predicated region body
PF: predicated region fallthrough
CT: control target
= control target key end

     0   :  { %10 = vsyncpa [#allocation4], 0  ;;  %s10590_s0 = inlined_call_operand.hbm [shape: f32[2,16,16,128], index: 0, kind: input, shape index: {}]   ;;  %s10591_s1 = inlined_call_operand.hbm [shape: bf16[9,128,128], index: 1, kind: input, shape index: {}]   ;;  %s10592_s2 = inlined_call_operand.vmem [shape: f32[1,128], index: 2, kind: input, shape index: {}]   ;;  %s10593_s3 = inlined_call_operand.hbm [shape: bf16[9,128,128], index: 3, kind: input, shape index: {}]   ;;  %s10594_s4 = inlined_call_operand.vmem [shape: f32[1,128], index: 4, kind: input, shape index: {}]   ;;  %s10595_s5 = inlined_call_operand.hbm [shape: f32[2,16,16,128], index: 5, kind: output, shape index: {}]  }
   0x1   :  { %12 = vsyncpa [#allocation4 + $0x1], 0 }
   0x2   :  { %13 = vsyncpa [#allocation7], 0 }
   0x3   :  { %14 = vsyncpa [#allocation5], 0 }
   0x4   :  { %16 = vsyncpa [#allocation5 + $0x1], 0  ;;  %s8956_s18 = smov 0   ;;  %s8958_s19 = smov 0  }
   0x5   :  { %s8960_s20 = smov 0   ;;  %s8962_s21 = smov 0  }
   0x6 LB: > { %s8977_s22 = sadd.s32 4294967295, %s8914_s21   ;;  %s6563_s23 = sadd.s32 4294967294, %s8914_s21   ;;  %s8914_s21 = sphi %s8962_s21, %s10615_s21   ;;  %s8910_s20 = sphi %s8960_s20, %s10614_s20   ;;  %s8906_s19 = sphi %s8958_s19, %s10613_s19   ;;  %s8902_s18 = sphi %s8956_s18, %s10612_s18  }
   0x7   : > { %p42_p0 = scmp.ne.s32.totalorder %s8906_s19, %s8902_s18  ;;  %p10596_p1 = scmp.eq.s32.totalorder %s8977_s22, 0 }
   0x8   : > { %p156_p3 = scmp.eq.s32.totalorder %s6563_s23, 1  ;;  %p6564_p5 = scmp.ge.s32.totalorder %s8914_s21, 1 }
   0x9   : > { %p8986_p4 = por %p10596_p1, %p42_p0  ;;  %p163_p7 = scmp.lt.s32.totalorder %s8914_s21, 3 }
   0xa   : > { %p8991_p6 = por %p156_p3, %p42_p0  ;;  %s8916_s27 = smov [#allocation6]  }
   0xb   : > { %s10599_s24 = scalar_select %p8986_p4, 1, 0 }
   0xc   : > { %s10600_s25 = scalar_select %p8991_p6, 1, 0 }
   0xd   : > { %p8996_p8 = pnand %p6564_p5, %p163_p7  ;;  %s175_s28 = sshll.u32 %s8916_s27, 4  ;;  %s9000_s28 = int_to_ptr.vmem [resolvable:$true] %s175_s28 }
   0xe   : > { %s8917_s30 = smov [#allocation8]   ;;  %s8758_s9 = scalar_lea.hbm %s10591_s1, 9216 }
   0xf   : > { %p8549_p9 = pneg %p8996_p8  ;;  %s191_s6 = sshll.u32 %s8917_s30, 4  ;;  %s9011_s6 = int_to_ptr.vmem [resolvable:$true] %s191_s6 }
  0x10   : > { %p8759_p12 = scmp.ne.s32.totalorder %s10591_s1, %s8758_s9  ;;  %p8765_p5 = scmp.lt.u32.totalorder %s8758_s9, %s10591_s1 }
  0x11   : > { %p9007_p11 = pnand %p8549_p9, %p10596_p1 }
  0x13   : > { %p8760_p13 = pneg %p9007_p11 }
  0x15   : > { %p8761_p0 = pnand %p8760_p13, %p8759_p12 }
  0x17   : > { %p8762_p3 = pneg %p8761_p0 }
  0x19   : > { %p8767_p7 = pnand %p8765_p5, %p8762_p3 }
  0x1b   : > { %8770 = shalt.err (!%p8767_p7)
}
  0x1c   : > { %s8771_s14 = scalar_lea.vmem %s9000_s28, 9216  ;;  %p8779_p2 = scmp.lt.s32.totalorder %s9000_s28, %s9000_s28 }
  0x1d   : > { %p8772_p9 = scmp.ne.s32.totalorder %s9000_s28, %s8771_s14  ;;  %p8780_p12 = scmp.lt.s32.totalorder %s8771_s14, %s8771_s14 }
  0x1f   : > { %p8774_p10 = pnand %p8772_p9, %p8760_p13  ;;  %p8781_p0 = por %p8780_p12, %p8779_p2 }
  0x21   : > { %p8775_p1 = pneg %p8774_p10 }
  0x23   : > { %p8782_p6 = pnand %p8781_p0, %p8775_p1 }
  0x25   : > { %8785 = shalt.err (!%p8782_p6)
}
  0x26   : > { %s8918_s15 = smov 64   ;;  %s8919_s16 = smov 4  }
  0x27   : > { %8552 = dma.hbm_to_vmem [thread:$0]  (!%p9007_p11), %s10591_s1, 9216, %s9000_s28, [#allocation7], %s8918_s15, %s8918_s15, %s8919_s16  }
  0x28   : > { %s8786_s7 = scalar_lea.hbm %s10593_s3, 9216 }
  0x29   : > { %p8787_p2 = scmp.ne.s32.totalorder %s10593_s3, %s8786_s7  ;;  %p8793_p10 = scmp.lt.u32.totalorder %s8786_s7, %s10593_s3 }
  0x2b   : > { %p8789_p1 = pnand %p8787_p2, %p8760_p13 }
  0x2d   : > { %p8790_p6 = pneg %p8789_p1 }
  0x2f   : > { %p8795_p3 = pnand %p8793_p10, %p8790_p6 }
  0x31   : > { %8798 = shalt.err (!%p8795_p3)
}
  0x32   : > { %s8799_s28 = scalar_lea.vmem %s9011_s6, 9216  ;;  %p8807_p12 = scmp.lt.s32.totalorder %s9011_s6, %s9011_s6 }
  0x33   : > { %p8800_p5 = scmp.ne.s32.totalorder %s9011_s6, %s8799_s28  ;;  %p8808_p0 = scmp.lt.s32.totalorder %s8799_s28, %s8799_s28 }
  0x35   : > { %p8802_p7 = pnand %p8800_p5, %p8760_p13  ;;  %p8809_p2 = por %p8808_p0, %p8807_p12 }
  0x37   : > { %p8803_p9 = pneg %p8802_p7 }
  0x39   : > { %p8810_p1 = pnand %p8809_p2, %p8803_p9 }
  0x3b   : > { %8813 = shalt.err (!%p8810_p1)
}
  0x3c   : > { %8555 = dma.hbm_to_vmem [thread:$0]  (!%p9007_p11), %s10593_s3, 9216, %s9011_s6, [#allocation7], %s8918_s15, %s8918_s15, %s8919_s16  }
  0x3d   : > { %s9066_s14 = sadd.s32 1, %s8914_s21   ;;  %s29_s29 = sadd.s32 1, %s8910_s20 }
  0x3e   : > { %s26_s17 = ssub.s32 %s8914_s21, %s9066_s14  ;;  %p36_p13 = scmp.ne.s32.totalorder %s8910_s20, %s8906_s19 }
  0x3f   : > { %p27_p6 = scmp.eq.s32.totalorder %s26_s17, 0  ;;  %p37_p10 = scmp.eq.s32.totalorder %s8914_s21, 0 }
  0x40   : > { %p10603_p3 = scmp.eq.s32.totalorder %s8977_s22, 1  ;;  %p8566_p7 = scmp.lt.s32.totalorder %s8914_s21, 2 }
  0x41   : > { %s9082_s27 = scalar_select %p27_p6, %s8910_s20, %s29_s29  }
  0x42   : > { %p9076_p5 = por %p10603_p3, %p36_p13  ;;  %p38_p9 = por %p37_p10, %p36_p13 }
  0x43   : > { %s208_s30 = sand.u32 1, %s8910_s20   ;;  %s6727_s6 = sshll.u32 %s8914_s21, 12 }
  0x44   : > { %s10604_s23 = scalar_select %p9076_p5, 1, 0 }
  0x45   : > { %s6568_s7 = sshll.u32 %s208_s30, 8  ;;  %s9089_s8 = scalar_lea.hbm %s10590_s0, %s6727_s6 }
  0x46   : > { %s212_s9 = scalar_lea.vmem [#allocation3], %s6568_s7  ;;  %p9093_p11 = pnand %p8566_p7, %p38_p9 }
  0x47   : > { %s219_s10 = sshll.u32 %s212_s9, 4  ;;  %s9097_s28 = scalar_lea.sflag [#allocation4], %s208_s30  ;;  %s9091_s10 = int_to_ptr.vmem [resolvable:$true] %s219_s10 }
  0x48   : > { %s8814_s12 = scalar_lea.hbm %s9089_s8, 4096  ;;  %p8816_p0 = pneg %p9093_p11 }
  0x49   : > { %p8815_p12 = scmp.ne.s32.totalorder %s9089_s8, %s8814_s12  ;;  %s8819_s17 = scalar_lea.hbm %s10590_s0, 8192 }
  0x4a   : > { %p8820_p13 = scmp.lt.u32.totalorder %s9089_s8, %s10590_s0  ;;  %p8821_p6 = scmp.lt.u32.totalorder %s8819_s17, %s8814_s12 }
  0x4b   : > { %p8817_p2 = pnand %p8816_p0, %p8815_p12  ;;  %p8823_p3 = scmp.lt.u32.totalorder %s8814_s12, %s9089_s8 }
  0x4c   : > { %p8822_p10 = por %p8821_p6, %p8820_p13 }
  0x4d   : > { %p8818_p1 = pneg %p8817_p2 }
  0x4e   : > { %p8824_p7 = por %p8823_p3, %p8822_p10 }
  0x50   : > { %p8825_p9 = pnand %p8824_p7, %p8818_p1 }
  0x52   : > { %8828 = shalt.err (!%p8825_p9)
}
  0x53   : > { %s8829_s30 = scalar_lea.vmem %s9091_s10, 4096  ;;  %s8920_s15 = smov [#allocation3]  }
  0x54   : > { %p8830_p12 = scmp.ne.s32.totalorder %s9091_s10, %s8829_s30  ;;  %s8834_s16 = sshll.u32 %s8920_s15, 4  ;;  %s8835_s16 = int_to_ptr.vmem [resolvable:$false] %s8834_s16 }
  0x55   : > { %s8836_s9 = scalar_lea.vmem %s8835_s16, 8192  ;;  %p8837_p4 = scmp.lt.s32.totalorder %s9091_s10, %s8835_s16 }
  0x56   : > { %p8832_p2 = pnand %p8830_p12, %p8816_p0  ;;  %p8838_p13 = scmp.lt.s32.totalorder %s8836_s9, %s8829_s30 }
  0x58   : > { %p8833_p5 = pneg %p8832_p2  ;;  %p8839_p6 = por %p8838_p13, %p8837_p4 }
  0x5a   : > { %p8840_p10 = pnand %p8839_p6, %p8833_p5 }
  0x5c   : > { %8843 = shalt.err (!%p8840_p10)
}
  0x5d   : > { %s8921_s12 = smov 128   ;;  %s8922_s13 = smov 8  }
  0x5e   : > { %8559 = dma.hbm_to_vmem [thread:$0]  (!%p9093_p11), %s9089_s8, 4096, %s9091_s10, %s9097_s28, %s8921_s12, %s8921_s12, %s8922_s13  }
  0x5f   : > { %231 = sbr.rel (%p8996_p8) target bundleno = 2004 (0x7d4), region = 40  ;;  %s9128_s29 = sand.u32 (!%p8996_p8), 1, %s8906_s19  }
  0x60   : > { %s6572_s17 = sshll.u32 (!%p8996_p8), %s9128_s29, 8  ;;  %s234_s7 = scalar_lea.sflag (!%p8996_p8), [#allocation4], %s9128_s29 }
  0x61   : > { %s9134_s6 = scalar_lea.vmem (!%p8996_p8), [#allocation3], %s6572_s17  ;;  %p10606_p4 = scmp.ne.s32.totalorder (!%p8996_p8), %s10599_s24, 0 }
  0x66   : > { %8889 = dma.done.wait (%p10606_p4), %s234_s7, 4096  }
  0x67   : > { %8891 = vsyncadd (%p10606_p4), %s234_s7, 4294963200  ;;  %p10607_p5 = scmp.eq.s32.totalorder %s8977_s22, 0 }
  0x69   : > { %8893 = dma.done.wait (%p10607_p5), [#allocation7], 18432   ;;  %p10608_p8 = pmov %p10607_p5 }
  0x6a   : > { %v8610_v0 = vld [vmem:[#allocation6 + $0x40] sm:$0xff]   ;;  %v8611_v1 = vld [vmem:[#allocation6 + $0x48] sm:$0xff]   ;;  %v8612_v2 = vld [vmem:[#allocation6 + $0x50] sm:$0xff]   ;;  %s10417_s11 = scalar_lea.vmem [#allocation9], %s6572_s17  ;;  %s6728_s28 = sshll.u32 %s8977_s22, 12 }
  0x6b   : > { %8895 = vsyncadd (%p10608_p8), [#allocation7], 4294948864  ;;  %7161 = vmatprep.subr.bf16.mxu0 %v8610_v0  ;;  %v8613_v3 = vld [vmem:[#allocation6 + $0x58] sm:$0xff]   ;;  %v275_v4 = vld [vmem:[%s9134_s6 + $0x10] sm:$0xff]  ;;  %s6471_s30 = sshll.u32 %s10417_s11, 4  ;;  %s10526_s9 = scalar_lea.hbm %s10595_s5, %s6728_s28  ;;  %s10530_s30 = int_to_ptr.vmem [resolvable:$true] %s6471_s30 }
  0x6c   : > { %7162 = vmatpush3.bf16.msra.mxu0 %v8610_v0  ;;  %v276_v5 = vld [vmem:[%s9134_s6 + $0x18] sm:$0xff]  ;;  %v9147_v6 = vld [vmem:[%s9134_s6] sm:$0xff]  ;;  %308 = vst [vmem:[#allocation2 + $0x31] sm:$0xff] %v275_v4  ;;  %338 = vst [vmem:[#allocation2 + $0x1] sm:$0xff] %v275_v4  ;;  %s6458_s22 = scalar_lea.sflag [#allocation5], %s9128_s29  ;;  %s8844_s12 = scalar_lea.vmem %s10530_s30, 4096 }
  0x6d   : > { %7163 = vmatprep.subr.bf16.mxu0 %v8611_v1  ;;  %309 = vst [vmem:[#allocation2 + $0x39] sm:$0xff] %v276_v5  ;;  %339 = vst [vmem:[#allocation2 + $0x9] sm:$0xff] %v276_v5  ;;  %v9149_v7 = vpack.c.bf16 %v276_v5, %v275_v4  ;;  %v9152_v8 = vld [vmem:[%s9134_s6 + $0x8] sm:$0xff]  ;;  %v9157_v9 = vld [vmem:[%s9134_s6 + $0x20] sm:$0xff]  ;;  %p8845_p11 = scmp.ne.s32.totalorder %s10530_s30, %s8844_s12  ;;  %p10609_p0 = scmp.ne.s32.totalorder %s10604_s23, 0 }
  0x6e   : > { %306 = vst [vmem:[#allocation2 + $0x19] sm:$0xff] %v9147_v6  ;;  %307 = vst [vmem:[#allocation2 + $0x21] sm:$0xff] %v9152_v8  ;;  %v9160_v10 = vld [vmem:[%s9134_s6 + $0x28] sm:$0xff]  ;;  %v8614_v11 = vld [vmem:[#allocation6 + $0x60] sm:$0xff]   ;;  %v512_v44 = vpack.c.bf16 %v9152_v8, %v9147_v6  ;;  %s8923_s13 = smov [#allocation9]  }
  0x6f   : > { %7177 = vmatprep.mubr.bf16.mxu0 %v9149_v7  ;;  %310 = vst [vmem:[#allocation2 + $0x49] sm:$0xff] %v9157_v9  ;;  %311 = vst [vmem:[#allocation2 + $0x51] sm:$0xff] %v9160_v10  ;;  %v9166_v12 = vld [vmem:[%s9134_s6 + $0x30] sm:$0xff]  ;;  %v9169_v13 = vld [vmem:[%s9134_s6 + $0x38] sm:$0xff]  ;;  %v514_v53 = vpack.c.bf16 %v9160_v10, %v9157_v9  ;;  %p8846_p1 = pnand %p8845_p11, %p10609_p0  ;;  %s8848_s17 = sshll.u32 %s8923_s13, 4  ;;  %s8849_s17 = int_to_ptr.vmem [resolvable:$false] %s8848_s17 }
  0x70   : > { %7164 = vmatpush3.bf16.msra.mxu0 %v8611_v1  ;;  %v9172_v14 = vld [vmem:[%s9134_s6 + $0x40] sm:$0xff]  ;;  %312 = vst [vmem:[#allocation2 + $0x61] sm:$0xff] %v9166_v12  ;;  %313 = vst [vmem:[#allocation2 + $0x69] sm:$0xff] %v9169_v13  ;;  %v9177_v15 = vld [vmem:[%s9134_s6 + $0x48] sm:$0xff]  ;;  %v515_v54 = vpack.c.bf16 %v9169_v13, %v9166_v12  ;;  %s8850_s7 = scalar_lea.vmem %s8849_s17, 8192  ;;  %p8851_p7 = scmp.lt.s32.totalorder %s10530_s30, %s8849_s17 }
  0x71   : > { %7165 = vmatprep.subr.bf16.mxu0 %v8612_v2  ;;  %314 = vst [vmem:[#allocation2 + $0x79] sm:$0xff] %v9172_v14  ;;  %315 = vst [vmem:[#allocation2 + $0x81] sm:$0xff] %v9177_v15  ;;  %v9182_v16 = vld [vmem:[%s9134_s6 + $0x50] sm:$0xff]  ;;  %v9185_v17 = vld [vmem:[%s9134_s6 + $0x58] sm:$0xff]  ;;  %v516_v62 = vpack.c.bf16 %v9177_v15, %v9172_v14  ;;  %p8847_p3 = pneg %p8846_p1  ;;  %p8852_p9 = scmp.lt.s32.totalorder %s8850_s7, %s8844_s12 }
  0x72   : > { %316 = vst [vmem:[#allocation2 + $0x91] sm:$0xff] %v9182_v16  ;;  %317 = vst [vmem:[#allocation2 + $0x99] sm:$0xff] %v9185_v17  ;;  %v9190_v18 = vld [vmem:[%s9134_s6 + $0x60] sm:$0xff]  ;;  %v9193_v19 = vld [vmem:[%s9134_s6 + $0x68] sm:$0xff]  ;;  %v517_v0 = vpack.c.bf16 %v9185_v17, %v9182_v16 }
  0x73   : > { %v8615_v20 = vld [vmem:[#allocation6 + $0x68] sm:$0xff]   ;;  %318 = vst [vmem:[#allocation2 + $0xa9] sm:$0xff] %v9190_v18  ;;  %319 = vst [vmem:[#allocation2 + $0xb1] sm:$0xff] %v9193_v19  ;;  %v9198_v21 = vld [vmem:[%s9134_s6 + $0x70] sm:$0xff]  ;;  %p8853_p12 = por %p8852_p9, %p8851_p7 }
  0x74   : > { %7166 = vmatpush3.bf16.msra.mxu0 %v8612_v2  ;;  %v9201_v22 = vld [vmem:[%s9134_s6 + $0x78] sm:$0xff]  ;;  %320 = vst [vmem:[#allocation2 + $0xc1] sm:$0xff] %v9198_v21  ;;  %v9205_v23 = vld [vmem:[%s9134_s6 + $0x80] sm:$0xff]  ;;  %v9208_v24 = vld [vmem:[%s9134_s6 + $0x88] sm:$0xff] }
  0x75   : > { %7167 = vmatprep.subr.bf16.mxu0 %v8613_v3  ;;  %v8616_v25 = vld [vmem:[#allocation6 + $0x70] sm:$0xff]   ;;  %321 = vst [vmem:[#allocation2 + $0xc9] sm:$0xff] %v9201_v22  ;;  %322 = vst [vmem:[#allocation2 + $0xd9] sm:$0xff] %v9205_v23  ;;  %v9217_v27 = vld [vmem:[%s9134_s6 + $0x98] sm:$0xff]  ;;  %v9278_v9 = vpack.c.bf16 %v9201_v22, %v9198_v21  ;;  %v9283_v17 = vpack.c.bf16 %v9208_v24, %v9205_v23  ;;  %p8854_p2 = pnand %p8853_p12, %p8847_p3 }
  0x76   : > { %323 = vst [vmem:[#allocation2 + $0xe1] sm:$0xff] %v9208_v24  ;;  %v9214_v26 = vld [vmem:[%s9134_s6 + $0x90] sm:$0xff]  ;;  %v9220_v28 = vld [vmem:[%s9134_s6 + $0xa0] sm:$0xff]  ;;  %325 = vst [vmem:[#allocation2 + $0xf9] sm:$0xff] %v9217_v27 }
  0x77   : > { %324 = vst [vmem:[#allocation2 + $0xf1] sm:$0xff] %v9214_v26  ;;  %v9225_v29 = vld [vmem:[%s9134_s6 + $0xa8] sm:$0xff]  ;;  %326 = vst [vmem:[#allocation2 + $0x109] sm:$0xff] %v9220_v28  ;;  %v9230_v30 = vld [vmem:[%s9134_s6 + $0xb0] sm:$0xff] }
  0x78   : > { %7168 = vmatpush3.bf16.msra.mxu0 %v8613_v3  ;;  %327 = vst [vmem:[#allocation2 + $0x111] sm:$0xff] %v9225_v29  ;;  %v9233_v31 = vld [vmem:[%s9134_s6 + $0xb8] sm:$0xff]  ;;  %328 = vst [vmem:[#allocation2 + $0x121] sm:$0xff] %v9230_v30  ;;  %v9238_v32 = vld [vmem:[%s9134_s6 + $0xc0] sm:$0xff]  ;;  %v9293_v21 = vpack.c.bf16 %v9225_v29, %v9220_v28 }
  0x79   : > { %7169 = vmatprep.subr.bf16.mxu0 %v8614_v11  ;;  %329 = vst [vmem:[#allocation2 + $0x129] sm:$0xff] %v9233_v31  ;;  %v9241_v33 = vld [vmem:[%s9134_s6 + $0xc8] sm:$0xff]  ;;  %v8617_v34 = vld [vmem:[#allocation6 + $0x78] sm:$0xff]   ;;  %330 = vst [vmem:[#allocation2 + $0x139] sm:$0xff] %v9238_v32  ;;  %v9297_v23 = vpack.c.bf16 %v9233_v31, %v9230_v30 }
  0x7a   : > { %331 = vst [vmem:[#allocation2 + $0x141] sm:$0xff] %v9241_v33  ;;  %v9246_v35 = vld [vmem:[%s9134_s6 + $0xd0] sm:$0xff]  ;;  %v9249_v36 = vld [vmem:[%s9134_s6 + $0xd8] sm:$0xff]  ;;  %v9253_v37 = vld [vmem:[%s9134_s6 + $0xe0] sm:$0xff] }
  0x7b   : > { %332 = vst [vmem:[#allocation2 + $0x151] sm:$0xff] %v9246_v35  ;;  %v9256_v38 = vld [vmem:[%s9134_s6 + $0xe8] sm:$0xff]  ;;  %333 = vst [vmem:[#allocation2 + $0x159] sm:$0xff] %v9249_v36  ;;  %v343_v39 = vld [vmem:[#allocation2 + $0x2] sm:$0x1] }
  0x7c   : > { %7170 = vmatpush3.bf16.msra.mxu0 %v8614_v11  ;;  %334 = vst [vmem:[#allocation2 + $0x169] sm:$0xff] %v9253_v37  ;;  %335 = vst [vmem:[#allocation2 + $0x171] sm:$0xff] %v9256_v38  ;;  %v344_v40 = vld [vmem:[#allocation2 + $0x1a] sm:$0x1]  ;;  %v8618_v41 = vld [vmem:[#allocation6] sm:$0xff]   ;;  %v9313_v31 = vpack.c.bf16 %v9256_v38, %v9253_v37 }
  0x7d   : > { %7171 = vmatprep.subr.bf16.mxu0 %v8615_v20  ;;  %341 = vst [vmem:[#allocation2 + $0x199] sm:$0xff] %v9253_v37  ;;  %342 = vst [vmem:[#allocation2 + $0x1a1] sm:$0xff] %v9256_v38  ;;  %v345_v42 = vld [vmem:[#allocation2 + $0x32] sm:$0x1]  ;;  %v346_v43 = vld [vmem:[#allocation2 + $0x4a] sm:$0x1] }
  0x7e   : > { %361 = vst [vmem:[#allocation2] sm:$0x1] %v343_v39  ;;  %362 = vst [vmem:[#allocation2 + $0x18] sm:$0x1] %v344_v40  ;;  %v347_v45 = vld [vmem:[#allocation2 + $0x62] sm:$0x1] }
  0x7f   : > { %363 = vst [vmem:[#allocation2 + $0x30] sm:$0x1] %v345_v42  ;;  %364 = vst [vmem:[#allocation2 + $0x48] sm:$0x1] %v346_v43  ;;  %v348_v46 = vld [vmem:[#allocation2 + $0x7a] sm:$0x1] }
  0x80   : > { %7172 = vmatpush3.bf16.msra.mxu0 %v8615_v20  ;;  %365 = vst [vmem:[#allocation2 + $0x60] sm:$0x1] %v347_v45  ;;  %v8619_v47 = vld [vmem:[#allocation6 + $0x8] sm:$0xff]   ;;  %366 = vst [vmem:[#allocation2 + $0x78] sm:$0x1] %v348_v46  ;;  %v8620_v50 = vld [vmem:[#allocation6 + $0x10] sm:$0xff]  }
  0x81   : > { %7173 = vmatprep.subr.bf16.mxu0 %v8616_v25  ;;  %v349_v48 = vld [vmem:[#allocation2 + $0x92] sm:$0x1]  ;;  %v350_v49 = vld [vmem:[#allocation2 + $0xaa] sm:$0x1]  ;;  %v351_v51 = vld [vmem:[#allocation2 + $0xc2] sm:$0x1] }
  0x82   : > { %367 = vst [vmem:[#allocation2 + $0x90] sm:$0x1] %v349_v48  ;;  %368 = vst [vmem:[#allocation2 + $0xa8] sm:$0x1] %v350_v49  ;;  %v352_v52 = vld [vmem:[#allocation2 + $0xda] sm:$0x1] }
  0x83   : > { %369 = vst [vmem:[#allocation2 + $0xc0] sm:$0x1] %v351_v51  ;;  %370 = vst [vmem:[#allocation2 + $0xd8] sm:$0x1] %v352_v52  ;;  %v353_v55 = vld [vmem:[#allocation2 + $0xf2] sm:$0x1] }
  0x84   : > { %7174 = vmatpush3.bf16.msra.mxu0 %v8616_v25  ;;  %v8621_v56 = vld [vmem:[#allocation6 + $0x18] sm:$0xff]   ;;  %371 = vst [vmem:[#allocation2 + $0xf0] sm:$0x1] %v353_v55  ;;  %v355_v58 = vld [vmem:[#allocation2 + $0x122] sm:$0x1]  ;;  %v8622_v60 = vld [vmem:[#allocation6 + $0x20] sm:$0xff]   ;;  %v9303_v25 = vpack.c.bf16 %v9241_v33, %v9238_v32 }
  0x85   : > { %7175 = vmatprep.subr.bf16.mxu0 %v8617_v34  ;;  %v354_v57 = vld [vmem:[#allocation2 + $0x10a] sm:$0x1]  ;;  %373 = vst [vmem:[#allocation2 + $0x120] sm:$0x1] %v355_v58  ;;  %v356_v59 = vld [vmem:[#allocation2 + $0x13a] sm:$0x1] }
  0x86   : > { %372 = vst [vmem:[#allocation2 + $0x108] sm:$0x1] %v354_v57  ;;  %374 = vst [vmem:[#allocation2 + $0x138] sm:$0x1] %v356_v59  ;;  %v357_v61 = vld [vmem:[#allocation2 + $0x152] sm:$0x1] }
  0x87   : > { %375 = vst [vmem:[#allocation2 + $0x150] sm:$0x1] %v357_v61  ;;  %v358_v63 = vld [vmem:[#allocation2 + $0x16a] sm:$0x1]  ;;  %v8623_v1 = vld [vmem:[#allocation6 + $0x28] sm:$0xff]   ;;  %v8624_v5 = vld [vmem:[#allocation6 + $0x30] sm:$0xff]  }
  0x88   : > { %7176 = vmatpush3.bf16.msra.mxu0 %v8617_v34  ;;  %376 = vst [vmem:[#allocation2 + $0x168] sm:$0x1] %v358_v63  ;;  %v379_v2 = vld [vmem:[#allocation2 + $0xf] sm:$0x1]  ;;  %v380_v3 = vld [vmem:[#allocation2 + $0x27] sm:$0x1] }
  0x89   : > { %7209 = vmatprep.subr.bf16.mxu0 %v8618_v41  ;;  %397 = vst [vmem:[#allocation2 + $0x11] sm:$0x1] %v379_v2  ;;  %398 = vst [vmem:[#allocation2 + $0x29] sm:$0x1] %v380_v3  ;;  %v381_v4 = vld [vmem:[#allocation2 + $0x3f] sm:$0x1] }
  0x8a   : > { %399 = vst [vmem:[#allocation2 + $0x41] sm:$0x1] %v381_v4  ;;  %v382_v6 = vld [vmem:[#allocation2 + $0x57] sm:$0x1]  ;;  %v383_v8 = vld [vmem:[#allocation2 + $0x6f] sm:$0x1] }
  0x8b   : > { %7178 = vmatmul.mubr.bf16.vlgmr.msra.gmra.mrb[0].mxu0 %v512_v44  ;;  %400 = vst [vmem:[#allocation2 + $0x59] sm:$0x1] %v382_v6  ;;  %401 = vst [vmem:[#allocation2 + $0x71] sm:$0x1] %v383_v8  ;;  %v384_v10 = vld [vmem:[#allocation2 + $0x87] sm:$0x1] }
  0x8c   : > { %7210 = vmatpush3.bf16.msra.mxu0 %v8618_v41  ;;  %7181 = vmatprep.mubr.bf16.mxu0 %v9149_v7  ;;  %v518_v7 = vpack.c.bf16 %v9193_v19, %v9190_v18  ;;  %v8625_v11 = vld [vmem:[#allocation6 + $0x38] sm:$0xff]   ;;  %402 = vst [vmem:[#allocation2 + $0x89] sm:$0x1] %v384_v10  ;;  %v385_v12 = vld [vmem:[#allocation2 + $0x9f] sm:$0x1]  ;;  %v8626_v14 = vld [vmem:[#allocation6 + $0x80] sm:$0xff]   ;;  %v9287_v18 = vpack.c.bf16 %v9217_v27, %v9214_v26 }
  0x8d   : > { %7211 = vmatprep.subr.bf16.mxu0 %v8619_v47  ;;  %403 = vst [vmem:[#allocation2 + $0xa1] sm:$0x1] %v385_v12  ;;  %v386_v13 = vld [vmem:[#allocation2 + $0xb7] sm:$0x1]  ;;  %v387_v15 = vld [vmem:[#allocation2 + $0xcf] sm:$0x1]  ;;  %v9307_v27 = vpack.c.bf16 %v9249_v36, %v9246_v35 }
  0x8e   : > { %404 = vst [vmem:[#allocation2 + $0xb9] sm:$0x1] %v386_v13  ;;  %405 = vst [vmem:[#allocation2 + $0xd1] sm:$0x1] %v387_v15  ;;  %v388_v16 = vld [vmem:[#allocation2 + $0xe7] sm:$0x1] }
  0x8f   : > { %406 = vst [vmem:[#allocation2 + $0xe9] sm:$0x1] %v388_v16  ;;  %v389_v19 = vld [vmem:[#allocation2 + $0xff] sm:$0x1]  ;;  %v390_v20 = vld [vmem:[#allocation2 + $0x117] sm:$0x1] }
  0x90   : > { %7212 = vmatpush3.bf16.msra.mxu0 %v8619_v47  ;;  %407 = vst [vmem:[#allocation2 + $0x101] sm:$0x1] %v389_v19  ;;  %408 = vst [vmem:[#allocation2 + $0x119] sm:$0x1] %v390_v20  ;;  %v391_v22 = vld [vmem:[#allocation2 + $0x12f] sm:$0x1] }
  0x91   : > { %7213 = vmatprep.subr.bf16.mxu0 %v8620_v50  ;;  %409 = vst [vmem:[#allocation2 + $0x131] sm:$0x1] %v391_v22  ;;  %v392_v24 = vld [vmem:[#allocation2 + $0x147] sm:$0x1]  ;;  %v393_v26 = vld [vmem:[#allocation2 + $0x15f] sm:$0x1] }
  0x92   : > { %410 = vst [vmem:[#allocation2 + $0x149] sm:$0x1] %v392_v24  ;;  %411 = vst [vmem:[#allocation2 + $0x161] sm:$0x1] %v393_v26  ;;  %v394_v28 = vld [vmem:[#allocation2 + $0x177] sm:$0x1] }
  0x93   : > { %7182 = vmatmul.mubr.bf16.gmra.mrb[4].mxu0 %v514_v53  ;;  %412 = vst [vmem:[#allocation2 + $0x179] sm:$0x1] %v394_v28  ;;  %v416_v29 = vld [vmem:[#allocation2 + $0x8] sm:$0xff]  ;;  %v415_v30 = vld [vmem:[#allocation2] sm:$0xff]  ;;  %v417_v33 = vld [vmem:[#allocation2 + $0x18] sm:$0xff] }
  0x94   : > { %7185 = vmatprep.mubr.bf16.mxu0 %v515_v54  ;;  %7214 = vmatpush3.bf16.msra.mxu0 %v8620_v50  ;;  %v447_v32 = vpack.c.bf16 %v416_v29, %v415_v30  ;;  %v418_v34 = vld [vmem:[#allocation2 + $0x20] sm:$0xff]  ;;  %v419_v35 = vld [vmem:[#allocation2 + $0x30] sm:$0xff]  ;;  %v420_v36 = vld [vmem:[#allocation2 + $0x38] sm:$0xff] }
  0x95   : > { %7215 = vmatprep.subr.bf16.mxu0 %v8621_v56  ;;  %v9316_v39 = vpack.c.bf16 %v418_v34, %v417_v33  ;;  %v8627_v40 = vld [vmem:[#allocation6 + $0x88] sm:$0xff]   ;;  %v9318_v41 = vpack.c.bf16 %v420_v36, %v419_v35  ;;  %v421_v42 = vld [vmem:[#allocation2 + $0x48] sm:$0xff]  ;;  %v422_v43 = vld [vmem:[#allocation2 + $0x50] sm:$0xff] }
  0x96   : > { %v423_v44 = vld [vmem:[#allocation2 + $0x60] sm:$0xff]  ;;  %v424_v37 = vld [vmem:[#allocation2 + $0x68] sm:$0xff]  ;;  %v9322_v45 = vpack.c.bf16 %v422_v43, %v421_v42  ;;  %v425_v48 = vld [vmem:[#allocation2 + $0x78] sm:$0xff] }
  0x97   : > { %v8628_v38 = vld [vmem:[#allocation6 + $0x90] sm:$0xff]   ;;  %v8629_v46 = vld [vmem:[#allocation6 + $0x98] sm:$0xff]   ;;  %v9324_v47 = vpack.c.bf16 %v424_v37, %v423_v44  ;;  %v427_v50 = vld [vmem:[#allocation2 + $0x90] sm:$0xff] }
  0x98   : > { %7216 = vmatpush3.bf16.msra.mxu0 %v8621_v56  ;;  %v426_v49 = vld [vmem:[#allocation2 + $0x80] sm:$0xff]  ;;  %v428_v51 = vld [vmem:[#allocation2 + $0x98] sm:$0xff]  ;;  %v8630_v52 = vld [vmem:[#allocation6 + $0xa0] sm:$0xff]  }
  0x99   : > { %7217 = vmatprep.subr.bf16.mxu0 %v8622_v60  ;;  %v9328_v53 = vpack.c.bf16 %v426_v49, %v425_v48  ;;  %v8631_v54 = vld [vmem:[#allocation6 + $0xa8] sm:$0xff]   ;;  %v9330_v55 = vpack.c.bf16 %v428_v51, %v427_v50  ;;  %v429_v56 = vld [vmem:[#allocation2 + $0xa8] sm:$0xff]  ;;  %v430_v57 = vld [vmem:[#allocation2 + $0xb0] sm:$0xff] }
  0x9a   : > { %v431_v58 = vld [vmem:[#allocation2 + $0xc0] sm:$0xff]  ;;  %v432_v59 = vld [vmem:[#allocation2 + $0xc8] sm:$0xff]  ;;  %v9334_v61 = vpack.c.bf16 %v430_v57, %v429_v56  ;;  %v435_v2 = vld [vmem:[#allocation2 + $0xf0] sm:$0xff] }
  0x9b   : > { %7186 = vmatmul.mubr.bf16.gmra.mrb[8].mxu0 %v516_v62  ;;  %v8633_v62 = vld [vmem:[#allocation6 + $0xb8] sm:$0xff]   ;;  %v9336_v63 = vpack.c.bf16 %v432_v59, %v431_v58  ;;  %v436_v3 = vld [vmem:[#allocation2 + $0xf8] sm:$0xff]  ;;  %v8634_v4 = vld [vmem:[#allocation6 + $0xc0] sm:$0xff]  }
  0x9c   : > { %7189 = vmatprep.mubr.bf16.mxu0 %v517_v0  ;;  %7218 = vmatpush3.bf16.msra.mxu0 %v8622_v60  ;;  %v8632_v60 = vld [vmem:[#allocation6 + $0xb0] sm:$0xff]   ;;  %v433_v0 = vld [vmem:[#allocation2 + $0xd8] sm:$0xff]  ;;  %v9342_v6 = vpack.c.bf16 %v436_v3, %v435_v2  ;;  %v438_v8 = vld [vmem:[#allocation2 + $0x110] sm:$0xff] }
  0x9d   : > { %7219 = vmatprep.subr.bf16.mxu0 %v8623_v1  ;;  %v439_v10 = vld [vmem:[#allocation2 + $0x120] sm:$0xff]  ;;  %v441_v15 = vld [vmem:[#allocation2 + $0x138] sm:$0xff]  ;;  %v443_v19 = vld [vmem:[#allocation2 + $0x150] sm:$0xff] }
  0x9e   : > { %v442_v16 = vld [vmem:[#allocation2 + $0x140] sm:$0xff]  ;;  %v444_v20 = vld [vmem:[#allocation2 + $0x158] sm:$0xff]  ;;  %v9361_v26 = vld [vmem:[%s9134_s6 + $0xf8] sm:$0xff] }
  0x9f   : > { %v9356_v22 = vpack.c.bf16 %v442_v16, %v441_v15  ;;  %v9358_v24 = vpack.c.bf16 %v444_v20, %v443_v19  ;;  %337 = vst [vmem:[#allocation2 + $0x189] sm:$0xff] %v9361_v26  ;;  %v445_v29 = vld [vmem:[#allocation2 + $0x168] sm:$0xff]  ;;  %v446_v30 = vld [vmem:[#allocation2 + $0x170] sm:$0xff]  ;;  %v964_v36 = vld [vmem:[#allocation2 + $0x1a] sm:$0xff] }
  0xa0   : > { %7220 = vmatpush3.bf16.msra.mxu0 %v8623_v1  ;;  %v434_v1 = vld [vmem:[#allocation2 + $0xe0] sm:$0xff]  ;;  %v963_v33 = vld [vmem:[#allocation2 + $0xa] sm:$0xff]  ;;  %v9366_v34 = vpack.c.bf16 %v446_v30, %v445_v29  ;;  %v966_v42 = vld [vmem:[#allocation2 + $0x32] sm:$0xff] }
  0xa1   : > { %7221 = vmatprep.subr.bf16.mxu0 %v8624_v5  ;;  %v967_v43 = vld [vmem:[#allocation2 + $0x3a] sm:$0xff]  ;;  %v969_v48 = vld [vmem:[#allocation2 + $0x52] sm:$0xff]  ;;  %v970_v49 = vld [vmem:[#allocation2 + $0x62] sm:$0xff] }
  0xa2   : > { %v9371_v37 = vpack.c.bf16 %v967_v43, %v966_v42  ;;  %v971_v50 = vld [vmem:[#allocation2 + $0x6a] sm:$0xff]  ;;  %v8636_v51 = vld [vmem:[#allocation6 + $0xd0] sm:$0xff]   ;;  %v974_v59 = vld [vmem:[#allocation2 + $0x92] sm:$0xff] }
  0xa3   : > { %7190 = vmatmul.mubr.bf16.gmra.mrb[12].mxu0 %v518_v7  ;;  %v437_v7 = vld [vmem:[#allocation2 + $0x108] sm:$0xff]  ;;  %v972_v57 = vld [vmem:[#allocation2 + $0x7a] sm:$0xff]  ;;  %v8642_v30 = vld [vmem:[#allocation6 + $0x100] sm:$0xff]  }
  0xa4   : > { %7193 = vmatprep.mubr.bf16.mxu0 %v9278_v9  ;;  %7222 = vmatpush3.bf16.msra.mxu0 %v8624_v5  ;;  %v9340_v5 = vpack.c.bf16 %v434_v1, %v433_v0  ;;  %v9346_v12 = vpack.c.bf16 %v438_v8, %v437_v7  ;;  %v8637_v56 = vld [vmem:[#allocation6 + $0xd8] sm:$0xff]   ;;  %v8639_v2 = vld [vmem:[#allocation6 + $0xe8] sm:$0xff]  }
  0xa5   : > { %7223 = vmatprep.subr.bf16.mxu0 %v8625_v11  ;;  %v973_v58 = vld [vmem:[#allocation2 + $0x82] sm:$0xff]  ;;  %v976_v3 = vld [vmem:[#allocation2 + $0xaa] sm:$0xff]  ;;  %v980_v19 = vld [vmem:[#allocation2 + $0xda] sm:$0xff] }
  0xa6   : > { %v9381_v0 = vpack.c.bf16 %v973_v58, %v972_v57  ;;  %v978_v7 = vld [vmem:[#allocation2 + $0xc2] sm:$0xff]  ;;  %v979_v8 = vld [vmem:[#allocation2 + $0xca] sm:$0xff]  ;;  %v983_v29 = vld [vmem:[#allocation2 + $0xfa] sm:$0xff] }
  0xa7   : > { %v9389_v15 = vpack.c.bf16 %v979_v8, %v978_v7  ;;  %v8641_v16 = vld [vmem:[#allocation6 + $0xf8] sm:$0xff]   ;;  %v993_v58 = vld [vmem:[#allocation2 + $0x172] sm:$0xff] }
  0xa8   : > { %7224 = vmatpush3.bf16.msra.mxu0 %v8625_v11  ;;  %v440_v11 = vld [vmem:[#allocation2 + $0x128] sm:$0xff] }
  0xa9   : > { %7257 = vmatprep.subr.bf16.mxu0 %v8626_v14  ;;  %v9348_v13 = vpack.c.bf16 %v440_v11, %v439_v10  ;;  %v8640_v10 = vld [vmem:[#allocation6 + $0xf0] sm:$0xff]   ;;  %v987_v42 = vld [vmem:[#allocation2 + $0x12a] sm:$0xff] }
  0xaa   : > { %v981_v20 = vld [vmem:[#allocation2 + $0xe2] sm:$0xff]  ;;  %v992_v57 = vld [vmem:[#allocation2 + $0x16a] sm:$0xff] }
  0xab   : > { %7194 = vmatmul.mubr.bf16.gmra.mrb[16].mxu0 %v9283_v17 }
  0xac   : > { %7197 = vmatprep.mubr.bf16.mxu0 %v9287_v18 }
  0xb3   : > { %7198 = vmatmul.mubr.bf16.gmra.mrb[20].mxu0 %v9293_v21 }
  0xb4   : > { %7201 = vmatprep.mubr.bf16.mxu0 %v9297_v23 }
  0xbb   : > { %7202 = vmatmul.mubr.bf16.gmra.mrb[24].mxu0 %v9303_v25 }
  0xbc   : > { %7205 = vmatprep.mubr.bf16.mxu0 %v9307_v27 }
  0xc3   : > { %7206 = vmatmul.mubr.bf16.gmra.mrb[28].mxu0 %v9313_v31 }
  0xc4   : > { %7225 = vmatprep.mubr.bf16.mxu0 %v447_v32  ;;  %v962_v32 = vld [vmem:[#allocation2 + $0x2] sm:$0xff] }
  0xc5   : > { %v994_v35 = vpack.c.bf16 %v963_v33, %v962_v32  ;;  %v9393_v32 = vpack.c.bf16 %v981_v20, %v980_v19  ;;  %v1582_v19 = vld [vmem:[#allocation2 + $0x79] sm:$0xff]  ;;  %v1583_v20 = vld [vmem:[#allocation2 + $0x81] sm:$0xff] }
  0xcb   : > { %7226 = vmatmul.mubr.bf16.vlgmr.msra.gmra.mrb[0].mxu0 %v9316_v39 }
  0xcc   : > { %7258 = vmatpush3.bf16.msra.mxu0 %v8626_v14  ;;  %7229 = vmatprep.mubr.bf16.mxu0 %v9318_v41  ;;  %v9351_v14 = vld [vmem:[%s9134_s6 + $0xf0] sm:$0xff] }
  0xcd   : > { %7259 = vmatprep.subr.bf16.mxu0 %v8627_v40  ;;  %336 = vst [vmem:[#allocation2 + $0x181] sm:$0xff] %v9351_v14 }
  0xd0   : > { %7260 = vmatpush3.bf16.msra.mxu0 %v8627_v40  ;;  %v965_v40 = vld [vmem:[#allocation2 + $0x22] sm:$0xff] }
  0xd1   : > { %7261 = vmatprep.subr.bf16.mxu0 %v8628_v38  ;;  %v9369_v44 = vpack.c.bf16 %v965_v40, %v964_v36  ;;  %v985_v36 = vld [vmem:[#allocation2 + $0x112] sm:$0xff]  ;;  %v986_v40 = vld [vmem:[#allocation2 + $0x122] sm:$0xff] }
  0xd3   : > { %7230 = vmatmul.mubr.bf16.gmra.mrb[4].mxu0 %v9322_v45 }
  0xd4   : > { %7233 = vmatprep.mubr.bf16.mxu0 %v9324_v47  ;;  %7262 = vmatpush3.bf16.msra.mxu0 %v8628_v38  ;;  %v359_v28 = vld [vmem:[#allocation2 + $0x182] sm:$0x1]  ;;  %v8635_v38 = vld [vmem:[#allocation6 + $0xc8] sm:$0xff]  }
  0xd5   : > { %7263 = vmatprep.subr.bf16.mxu0 %v8629_v46  ;;  %377 = vst [vmem:[#allocation2 + $0x180] sm:$0x1] %v359_v28  ;;  %v982_v28 = vld [vmem:[#allocation2 + $0xf2] sm:$0xff] }
  0xd6   : > { %v9395_v33 = vpack.c.bf16 %v983_v29, %v982_v28  ;;  %v8652_v28 = vld [vmem:[#allocation6 + $0x150] sm:$0xff]  }
  0xd8   : > { %7264 = vmatpush3.bf16.msra.mxu0 %v8629_v46  ;;  %v968_v46 = vld [vmem:[#allocation2 + $0x4a] sm:$0xff] }
  0xd9   : > { %7265 = vmatprep.subr.bf16.mxu0 %v8630_v52 }
  0xdb   : > { %7234 = vmatmul.mubr.bf16.gmra.mrb[8].mxu0 %v9328_v53 }
  0xdc   : > { %7237 = vmatprep.mubr.bf16.mxu0 %v9330_v55  ;;  %7266 = vmatpush3.bf16.msra.mxu0 %v8630_v52  ;;  %v9375_v52 = vpack.c.bf16 %v969_v48, %v968_v46  ;;  %v988_v46 = vld [vmem:[#allocation2 + $0x13a] sm:$0xff]  ;;  %v989_v48 = vld [vmem:[#allocation2 + $0x142] sm:$0xff] }
  0xdd   : > { %7267 = vmatprep.subr.bf16.mxu0 %v8631_v54 }
  0xe0   : > { %7268 = vmatpush3.bf16.msra.mxu0 %v8631_v54  ;;  %v9377_v54 = vpack.c.bf16 %v971_v50, %v970_v49  ;;  %v990_v49 = vld [vmem:[#allocation2 + $0x152] sm:$0xff]  ;;  %v991_v50 = vld [vmem:[#allocation2 + $0x15a] sm:$0xff] }
  0xe1   : > { %7269 = vmatprep.subr.bf16.mxu0 %v8632_v60 }
  0xe3   : > { %7238 = vmatmul.mubr.bf16.gmra.mrb[12].mxu0 %v9334_v61 }
  0xe4   : > { %7241 = vmatprep.mubr.bf16.mxu0 %v9336_v63  ;;  %7270 = vmatpush3.bf16.msra.mxu0 %v8632_v60  ;;  %v975_v60 = vld [vmem:[#allocation2 + $0x9a] sm:$0xff] }
  0xe5   : > { %7271 = vmatprep.subr.bf16.mxu0 %v8633_v62  ;;  %v9383_v1 = vpack.c.bf16 %v975_v60, %v974_v59  ;;  %v9411_v59 = vpack.c.bf16 %v993_v58, %v992_v57  ;;  %v8643_v60 = vld [vmem:[#allocation6 + $0x108] sm:$0xff]   ;;  %v8656_v58 = vld [vmem:[#allocation6 + $0x170] sm:$0xff]  }
  0xe6   : > { %v8655_v57 = vld [vmem:[#allocation6 + $0x168] sm:$0xff]  }
  0xe8   : > { %7272 = vmatpush3.bf16.msra.mxu0 %v8633_v62  ;;  %v8638_v62 = vld [vmem:[#allocation6 + $0xe0] sm:$0xff]  }
  0xe9   : > { %7305 = vmatprep.subr.bf16.mxu0 %v8634_v4 }
  0xeb   : > { %7242 = vmatmul.mubr.bf16.gmra.mrb[16].mxu0 %v9340_v5 }
  0xec   : > { %7245 = vmatprep.mubr.bf16.mxu0 %v9342_v6 }
  0xf3   : > { %7246 = vmatmul.mubr.bf16.gmra.mrb[20].mxu0 %v9346_v12 }
  0xf4   : > { %7249 = vmatprep.mubr.bf16.mxu0 %v9348_v13 }
  0xfb   : > { %7250 = vmatmul.mubr.bf16.gmra.mrb[24].mxu0 %v9356_v22 }
  0xfc   : > { %7253 = vmatprep.mubr.bf16.mxu0 %v9358_v24 }
 0x103   : > { %7254 = vmatmul.mubr.bf16.gmra.mrb[28].mxu0 %v9366_v34 }
 0x104   : > { %7273 = vmatprep.mubr.bf16.mxu0 %v994_v35  ;;  %v984_v35 = vld [vmem:[#allocation2 + $0x10a] sm:$0xff] }
 0x105   : > { %v9399_v43 = vpack.c.bf16 %v985_v36, %v984_v35  ;;  %v8653_v35 = vld [vmem:[#allocation6 + $0x158] sm:$0xff]   ;;  %v1584_v36 = vld [vmem:[#allocation2 + $0x91] sm:$0xff] }
 0x10b   : > { %7274 = vmatmul.mubr.bf16.vlgmr.msra.gmra.mrb[0].mxu0 %v9369_v44 }
 0x10c   : > { %7306 = vmatpush3.bf16.msra.mxu0 %v8634_v4  ;;  %7277 = vmatprep.mubr.bf16.mxu0 %v9371_v37  ;;  %v977_v4 = vld [vmem:[#allocation2 + $0xb2] sm:$0xff] }
 0x10d   : > { %7307 = vmatprep.subr.bf16.mxu0 %v8635_v38  ;;  %v9387_v11 = vpack.c.bf16 %v977_v4, %v976_v3  ;;  %v8646_v3 = vld [vmem:[#allocation6 + $0x120] sm:$0xff]  }
 0x110   : > { %7308 = vmatpush3.bf16.msra.mxu0 %v8635_v38  ;;  %v9401_v38 = vpack.c.bf16 %v987_v42, %v986_v40  ;;  %v1585_v40 = vld [vmem:[#allocation2 + $0x99] sm:$0xff]  ;;  %v1586_v42 = vld [vmem:[#allocation2 + $0xa9] sm:$0xff] }
 0x111   : > { %7309 = vmatprep.subr.bf16.mxu0 %v8636_v51 }
 0x113   : > { %7278 = vmatmul.mubr.bf16.gmra.mrb[4].mxu0 %v9375_v52 }
 0x114   : > { %7281 = vmatprep.mubr.bf16.mxu0 %v9377_v54  ;;  %7310 = vmatpush3.bf16.msra.mxu0 %v8636_v51  ;;  %v9405_v51 = vpack.c.bf16 %v989_v48, %v988_v46  ;;  %v1587_v46 = vld [vmem:[#allocation2 + $0xb1] sm:$0xff] }
 0x115   : > { %7311 = vmatprep.subr.bf16.mxu0 %v8637_v56  ;;  %v8654_v48 = vld [vmem:[#allocation6 + $0x160] sm:$0xff]  }
 0x118   : > { %7312 = vmatpush3.bf16.msra.mxu0 %v8637_v56  ;;  %v9407_v56 = vpack.c.bf16 %v991_v50, %v990_v49  ;;  %v9444_v49 = vpack.c.bf16 %v1585_v40, %v1584_v36  ;;  %v9446_v50 = vpack.c.bf16 %v1587_v46, %v1586_v42  ;;  %v2206_v36 = vld [vmem:[#allocation2 + $0x110] sm:$0xff]  ;;  %v2207_v40 = vld [vmem:[#allocation2 + $0x120] sm:$0xff]  ;;  %v2208_v42 = vld [vmem:[#allocation2 + $0x128] sm:$0xff] }
 0x119   : > { %7313 = vmatprep.subr.bf16.mxu0 %v8638_v62  ;;  %v8674_v46 = vld [vmem:[#allocation6 + $0x200] sm:$0xff]  }
 0x11b   : > { %7282 = vmatmul.mubr.bf16.gmra.mrb[8].mxu0 %v9381_v0 }
 0x11c   : > { %7285 = vmatprep.mubr.bf16.mxu0 %v9383_v1  ;;  %7314 = vmatpush3.bf16.msra.mxu0 %v8638_v62  ;;  %v8644_v62 = vld [vmem:[#allocation6 + $0x110] sm:$0xff]  }
 0x11d   : > { %7315 = vmatprep.subr.bf16.mxu0 %v8639_v2 }
 0x120   : > { %7316 = vmatpush3.bf16.msra.mxu0 %v8639_v2  ;;  %v8645_v2 = vld [vmem:[#allocation6 + $0x118] sm:$0xff]  }
 0x121   : > { %7317 = vmatprep.subr.bf16.mxu0 %v8640_v10 }
 0x123   : > { %7286 = vmatmul.mubr.bf16.gmra.mrb[12].mxu0 %v9387_v11 }
 0x124   : > { %7289 = vmatprep.mubr.bf16.mxu0 %v9389_v15  ;;  %7318 = vmatpush3.bf16.msra.mxu0 %v8640_v10 }
 0x125   : > { %7319 = vmatprep.subr.bf16.mxu0 %v8641_v16 }
 0x128   : > { %7320 = vmatpush3.bf16.msra.mxu0 %v8641_v16  ;;  %v1581_v16 = vld [vmem:[#allocation2 + $0x69] sm:$0xff] }
 0x129   : > { %7353 = vmatprep.subr.bf16.mxu0 %v8642_v30 }
 0x12b   : > { %7290 = vmatmul.mubr.bf16.gmra.mrb[16].mxu0 %v9393_v32 }
 0x12c   : > { %7293 = vmatprep.mubr.bf16.mxu0 %v9395_v33 }
 0x133   : > { %7294 = vmatmul.mubr.bf16.gmra.mrb[20].mxu0 %v9399_v43 }
 0x134   : > { %7297 = vmatprep.mubr.bf16.mxu0 %v9401_v38 }
 0x13b   : > { %7298 = vmatmul.mubr.bf16.gmra.mrb[24].mxu0 %v9405_v51 }
 0x13c   : > { %7301 = vmatprep.mubr.bf16.mxu0 %v9407_v56 }
 0x143   : > { %7302 = vmatmul.mubr.bf16.gmra.mrb[28].mxu0 %v9411_v59 }
 0x144   : > { %7321 = vmatprep.mubr.bf16.mxu0 %v9316_v39  ;;  %v8647_v39 = vld [vmem:[#allocation6 + $0x128] sm:$0xff]  }
 0x14b   : > { %7322 = vmatmul.mubr.bf16.vlgmr.msra.gmra.mrb[0].mxu0 %v9318_v41  ;;  %v8648_v41 = vld [vmem:[#allocation6 + $0x130] sm:$0xff]  }
 0x14c   : > { %7354 = vmatpush3.bf16.msra.mxu0 %v8642_v30  ;;  %7325 = vmatprep.mubr.bf16.mxu0 %v9322_v45  ;;  %v8649_v45 = vld [vmem:[#allocation6 + $0x138] sm:$0xff]   ;;  %v9440_v30 = vpack.c.bf16 %v1583_v20, %v1582_v19 }
 0x14d   : > { %7355 = vmatprep.subr.bf16.mxu0 %v8643_v60 }
 0x150   : > { %7356 = vmatpush3.bf16.msra.mxu0 %v8643_v60  ;;  %v8657_v60 = vld [vmem:[#allocation6 + $0x178] sm:$0xff]  }
 0x151   : > { %7357 = vmatprep.subr.bf16.mxu0 %v8644_v62 }
 0x153   : > { %7326 = vmatmul.mubr.bf16.gmra.mrb[4].mxu0 %v9324_v47  ;;  %v8650_v47 = vld [vmem:[#allocation6 + $0x140] sm:$0xff]  }
 0x154   : > { %7329 = vmatprep.mubr.bf16.mxu0 %v9328_v53  ;;  %7358 = vmatpush3.bf16.msra.mxu0 %v8644_v62  ;;  %v395_v53 = vld [vmem:[#allocation2 + $0x18f] sm:$0x1]  ;;  %v8658_v62 = vld [vmem:[#allocation6 + $0x180] sm:$0xff]  }
 0x155   : > { %7359 = vmatprep.subr.bf16.mxu0 %v8645_v2  ;;  %413 = vst [vmem:[#allocation2 + $0x191] sm:$0x1] %v395_v53  ;;  %v2197_v53 = vld [vmem:[#allocation2 + $0xa8] sm:$0xff] }
 0x158   : > { %7360 = vmatpush3.bf16.msra.mxu0 %v8645_v2  ;;  %v360_v2 = vld [vmem:[#allocation2 + $0x19a] sm:$0x1] }
 0x159   : > { %7361 = vmatprep.subr.bf16.mxu0 %v8646_v3  ;;  %378 = vst [vmem:[#allocation2 + $0x198] sm:$0x1] %v360_v2  ;;  %v2212_v2 = vld [vmem:[#allocation2 + $0x158] sm:$0xff] }
 0x15b   : > { %7330 = vmatmul.mubr.bf16.gmra.mrb[8].mxu0 %v9330_v55  ;;  %v1298_v55 = vld [vmem:[#allocation2 + $0x180] sm:$0xff] }
 0x15c   : > { %7333 = vmatprep.mubr.bf16.mxu0 %v9334_v61  ;;  %7362 = vmatpush3.bf16.msra.mxu0 %v8646_v3  ;;  %v1299_v61 = vld [vmem:[#allocation2 + $0x188] sm:$0xff]  ;;  %v2196_v3 = vld [vmem:[#allocation2 + $0x98] sm:$0xff] }
 0x15d   : > { %7363 = vmatprep.subr.bf16.mxu0 %v8647_v39  ;;  %v9429_v4 = vpack.c.bf16 %v1299_v61, %v1298_v55  ;;  %v2198_v55 = vld [vmem:[#allocation2 + $0xb0] sm:$0xff]  ;;  %v2199_v61 = vld [vmem:[#allocation2 + $0xc0] sm:$0xff] }
 0x160   : > { %7364 = vmatpush3.bf16.msra.mxu0 %v8647_v39  ;;  %v8668_v39 = vld [vmem:[#allocation6 + $0x1d0] sm:$0xff]  }
 0x161   : > { %7365 = vmatprep.subr.bf16.mxu0 %v8648_v41 }
 0x163   : > { %7334 = vmatmul.mubr.bf16.gmra.mrb[12].mxu0 %v9336_v63  ;;  %v1574_v63 = vld [vmem:[#allocation2 + $0x19] sm:$0xff] }
 0x164   : > { %7337 = vmatprep.mubr.bf16.mxu0 %v9340_v5  ;;  %7366 = vmatpush3.bf16.msra.mxu0 %v8648_v41  ;;  %v1575_v5 = vld [vmem:[#allocation2 + $0x21] sm:$0xff] }
 0x165   : > { %7367 = vmatprep.subr.bf16.mxu0 %v8649_v45  ;;  %v1606_v7 = vpack.c.bf16 %v1575_v5, %v1574_v63  ;;  %v2200_v63 = vld [vmem:[#allocation2 + $0xc8] sm:$0xff]  ;;  %v8670_v5 = vld [vmem:[#allocation6 + $0x1e0] sm:$0xff]  }
 0x168   : > { %7368 = vmatpush3.bf16.msra.mxu0 %v8649_v45 }
 0x169   : > { %7401 = vmatprep.subr.bf16.mxu0 %v8650_v47 }
 0x16b   : > { %7338 = vmatmul.mubr.bf16.gmra.mrb[16].mxu0 %v9342_v6  ;;  %v1576_v6 = vld [vmem:[#allocation2 + $0x31] sm:$0xff] }
 0x16c   : > { %7341 = vmatprep.mubr.bf16.mxu0 %v9346_v12  ;;  %v1577_v12 = vld [vmem:[#allocation2 + $0x39] sm:$0xff] }
 0x16d   : > { %v9432_v8 = vpack.c.bf16 %v1577_v12, %v1576_v6  ;;  %v2225_v6 = vpack.c.bf16 %v2200_v63, %v2199_v61  ;;  %v8671_v12 = vld [vmem:[#allocation6 + $0x1e8] sm:$0xff]   ;;  %v2519_v61 = vld [vmem:[#allocation2 + $0x169] sm:$0xff] }
 0x16e   : > { %v2520_v63 = vld [vmem:[#allocation2 + $0x171] sm:$0xff] }
 0x173   : > { %7342 = vmatmul.mubr.bf16.gmra.mrb[20].mxu0 %v9348_v13  ;;  %v1578_v13 = vld [vmem:[#allocation2 + $0x49] sm:$0xff] }
 0x174   : > { %7345 = vmatprep.mubr.bf16.mxu0 %v9356_v22  ;;  %v1579_v22 = vld [vmem:[#allocation2 + $0x51] sm:$0xff] }
 0x175   : > { %v9434_v10 = vpack.c.bf16 %v1579_v22, %v1578_v13  ;;  %v2201_v13 = vld [vmem:[#allocation2 + $0xd8] sm:$0xff]  ;;  %v2202_v22 = vld [vmem:[#allocation2 + $0xe0] sm:$0xff] }
 0x176   : > { %v2226_v19 = vpack.c.bf16 %v2202_v22, %v2201_v13  ;;  %v2800_v13 = vld [vmem:[#allocation2 + $0x3a] sm:$0xff] }
 0x17b   : > { %7346 = vmatmul.mubr.bf16.gmra.mrb[24].mxu0 %v9358_v24  ;;  %v8651_v24 = vld [vmem:[#allocation6 + $0x148] sm:$0xff]  }
 0x17c   : > { %7349 = vmatprep.mubr.bf16.mxu0 %v9366_v34  ;;  %v1580_v34 = vld [vmem:[#allocation2 + $0x61] sm:$0xff] }
 0x17d   : > { %v9438_v29 = vpack.c.bf16 %v1581_v16, %v1580_v34  ;;  %v2204_v34 = vld [vmem:[#allocation2 + $0xf8] sm:$0xff]  ;;  %v8672_v16 = vld [vmem:[#allocation6 + $0x1f0] sm:$0xff]  }
 0x183   : > { %7350 = vmatmul.mubr.bf16.gmra.mrb[28].mxu0 %v9429_v4 }
 0x184   : > { %7369 = vmatprep.mubr.bf16.mxu0 %v1606_v7  ;;  %v2224_v7 = vpack.c.bf16 %v2198_v55, %v2197_v53 }
 0x18b   : > { %7370 = vmatmul.mubr.bf16.vlgmr.msra.gmra.mrb[0].mxu0 %v9432_v8 }
 0x18c   : > { %7402 = vmatpush3.bf16.msra.mxu0 %v8650_v47  ;;  %7373 = vmatprep.mubr.bf16.mxu0 %v9434_v10  ;;  %v8669_v47 = vld [vmem:[#allocation6 + $0x1d8] sm:$0xff]  }
 0x18d   : > { %7403 = vmatprep.subr.bf16.mxu0 %v8651_v24 }
 0x190   : > { %7404 = vmatpush3.bf16.msra.mxu0 %v8651_v24  ;;  %v2203_v24 = vld [vmem:[#allocation2 + $0xf0] sm:$0xff] }
 0x191   : > { %7405 = vmatprep.subr.bf16.mxu0 %v8652_v28  ;;  %v2227_v20 = vpack.c.bf16 %v2204_v34, %v2203_v24  ;;  %v2801_v34 = vld [vmem:[#allocation2 + $0x4a] sm:$0xff] }
 0x193   : > { %7374 = vmatmul.mubr.bf16.gmra.mrb[4].mxu0 %v9438_v29 }
 0x194   : > { %7377 = vmatprep.mubr.bf16.mxu0 %v9440_v30  ;;  %7406 = vmatpush3.bf16.msra.mxu0 %v8652_v28  ;;  %v8673_v28 = vld [vmem:[#allocation6 + $0x1f8] sm:$0xff]  }
 0x195   : > { %7407 = vmatprep.subr.bf16.mxu0 %v8653_v35 }
 0x198   : > { %7408 = vmatpush3.bf16.msra.mxu0 %v8653_v35  ;;  %v2205_v35 = vld [vmem:[#allocation2 + $0x108] sm:$0xff] }
 0x199   : > { %7409 = vmatprep.subr.bf16.mxu0 %v8654_v48 }
 0x19b   : > { %7378 = vmatmul.mubr.bf16.gmra.mrb[8].mxu0 %v9444_v49 }
 0x19c   : > { %7381 = vmatprep.mubr.bf16.mxu0 %v9446_v50  ;;  %7410 = vmatpush3.bf16.msra.mxu0 %v8654_v48  ;;  %v2228_v48 = vpack.c.bf16 %v2206_v36, %v2205_v35  ;;  %v2805_v36 = vld [vmem:[#allocation2 + $0x7a] sm:$0xff] }
 0x19d   : > { %7411 = vmatprep.subr.bf16.mxu0 %v8655_v57 }
 0x1a0   : > { %7412 = vmatpush3.bf16.msra.mxu0 %v8655_v57  ;;  %v2229_v57 = vpack.c.bf16 %v2208_v42, %v2207_v40  ;;  %v2806_v40 = vld [vmem:[#allocation2 + $0x82] sm:$0xff]  ;;  %v2807_v42 = vld [vmem:[#allocation2 + $0x92] sm:$0xff] }
 0x1a1   : > { %7413 = vmatprep.subr.bf16.mxu0 %v8656_v58 }
 0x1a3   : > { %7382 = vmatmul.mubr.bf16.gmra.mrb[12].mxu0 %v9278_v9  ;;  %v9460_v9 = vpack.c.bf16 %v9361_v26, %v9351_v14  ;;  %v8666_v14 = vld [vmem:[#allocation6 + $0x1c0] sm:$0xff]   ;;  %v1910_v26 = vld [vmem:[#allocation2 + $0x182] sm:$0xff] }
 0x1a4   : > { %7385 = vmatprep.mubr.bf16.mxu0 %v9283_v17  ;;  %7414 = vmatpush3.bf16.msra.mxu0 %v8656_v58  ;;  %v8659_v17 = vld [vmem:[#allocation6 + $0x188] sm:$0xff]  }
 0x1a5   : > { %7415 = vmatprep.subr.bf16.mxu0 %v8657_v60  ;;  %v2209_v58 = vld [vmem:[#allocation2 + $0x138] sm:$0xff] }
 0x1a8   : > { %7416 = vmatpush3.bf16.msra.mxu0 %v8657_v60  ;;  %v2210_v60 = vld [vmem:[#allocation2 + $0x140] sm:$0xff] }
 0x1a9   : > { %7449 = vmatprep.subr.bf16.mxu0 %v8658_v62 }
 0x1ab   : > { %7386 = vmatmul.mubr.bf16.gmra.mrb[16].mxu0 %v9287_v18  ;;  %v8660_v18 = vld [vmem:[#allocation6 + $0x190] sm:$0xff]  }
 0x1ac   : > { %7389 = vmatprep.mubr.bf16.mxu0 %v9293_v21  ;;  %v8661_v21 = vld [vmem:[#allocation6 + $0x198] sm:$0xff]  }
 0x1b3   : > { %7390 = vmatmul.mubr.bf16.gmra.mrb[20].mxu0 %v9297_v23  ;;  %v8662_v23 = vld [vmem:[#allocation6 + $0x1a0] sm:$0xff]  }
 0x1b4   : > { %7393 = vmatprep.mubr.bf16.mxu0 %v9303_v25  ;;  %v8663_v25 = vld [vmem:[#allocation6 + $0x1a8] sm:$0xff]  }
 0x1bb   : > { %7394 = vmatmul.mubr.bf16.gmra.mrb[24].mxu0 %v9307_v27  ;;  %v8664_v27 = vld [vmem:[#allocation6 + $0x1b0] sm:$0xff]  }
 0x1bc   : > { %7397 = vmatprep.mubr.bf16.mxu0 %v9313_v31  ;;  %v8665_v31 = vld [vmem:[#allocation6 + $0x1b8] sm:$0xff]  }
 0x1c3   : > { %7398 = vmatmul.mubr.bf16.gmra.mrb[28].mxu0 %v9460_v9 }
 0x1c4   : > { %7417 = vmatprep.mubr.bf16.mxu0 %v9369_v44  ;;  %v1911_v44 = vld [vmem:[#allocation2 + $0x18a] sm:$0xff] }
 0x1cb   : > { %7418 = vmatmul.mubr.bf16.vlgmr.msra.gmra.mrb[0].mxu0 %v9371_v37  ;;  %v2187_v37 = vld [vmem:[#allocation2 + $0x30] sm:$0xff] }
 0x1cc   : > { %7450 = vmatpush3.bf16.msra.mxu0 %v8658_v62  ;;  %7421 = vmatprep.mubr.bf16.mxu0 %v9375_v52  ;;  %v2188_v52 = vld [vmem:[#allocation2 + $0x38] sm:$0xff]  ;;  %v2211_v62 = vld [vmem:[#allocation2 + $0x150] sm:$0xff] }
 0x1cd   : > { %7451 = vmatprep.subr.bf16.mxu0 %v8659_v17 }
 0x1d0   : > { %7452 = vmatpush3.bf16.msra.mxu0 %v8659_v17  ;;  %v2230_v17 = vpack.c.bf16 %v2210_v60, %v2209_v58  ;;  %v2810_v58 = vld [vmem:[#allocation2 + $0xb2] sm:$0xff]  ;;  %v2811_v60 = vld [vmem:[#allocation2 + $0xc2] sm:$0xff] }
 0x1d1   : > { %7453 = vmatprep.subr.bf16.mxu0 %v8660_v18 }
 0x1d3   : > { %7422 = vmatmul.mubr.bf16.gmra.mrb[4].mxu0 %v9377_v54  ;;  %v9478_v54 = vpack.c.bf16 %v1911_v44, %v1910_v26  ;;  %v8675_v44 = vld [vmem:[#allocation6 + $0x208] sm:$0xff]  }
 0x1d4   : > { %7425 = vmatprep.mubr.bf16.mxu0 %v9381_v0  ;;  %7454 = vmatpush3.bf16.msra.mxu0 %v8660_v18  ;;  %v2219_v0 = vpack.c.bf16 %v2188_v52, %v2187_v37  ;;  %v2231_v18 = vpack.c.bf16 %v2212_v2, %v2211_v62  ;;  %v8676_v37 = vld [vmem:[#allocation6 + $0x210] sm:$0xff]   ;;  %v8677_v52 = vld [vmem:[#allocation6 + $0x218] sm:$0xff]  }
 0x1d5   : > { %7455 = vmatprep.subr.bf16.mxu0 %v8661_v21  ;;  %v2812_v62 = vld [vmem:[#allocation2 + $0xca] sm:$0xff] }
 0x1d8   : > { %7456 = vmatpush3.bf16.msra.mxu0 %v8661_v21  ;;  %v2213_v21 = vld [vmem:[#allocation2 + $0x168] sm:$0xff] }
 0x1d9   : > { %7457 = vmatprep.subr.bf16.mxu0 %v8662_v23 }
 0x1db   : > { %7426 = vmatmul.mubr.bf16.gmra.mrb[8].mxu0 %v9383_v1  ;;  %v2189_v1 = vld [vmem:[#allocation2 + $0x48] sm:$0xff] }
 0x1dc   : > { %7429 = vmatprep.mubr.bf16.mxu0 %v9387_v11  ;;  %7458 = vmatpush3.bf16.msra.mxu0 %v8662_v23  ;;  %v2190_v11 = vld [vmem:[#allocation2 + $0x50] sm:$0xff] }
 0x1dd   : > { %7459 = vmatprep.subr.bf16.mxu0 %v8663_v25  ;;  %v2214_v23 = vld [vmem:[#allocation2 + $0x170] sm:$0xff] }
 0x1e0   : > { %7460 = vmatpush3.bf16.msra.mxu0 %v8663_v25  ;;  %v2232_v25 = vpack.c.bf16 %v2214_v23, %v2213_v21  ;;  %v2814_v21 = vld [vmem:[#allocation2 + $0xe2] sm:$0xff]  ;;  %v2815_v23 = vld [vmem:[#allocation2 + $0xf2] sm:$0xff] }
 0x1e1   : > { %7461 = vmatprep.subr.bf16.mxu0 %v8664_v27 }
 0x1e3   : > { %7430 = vmatmul.mubr.bf16.gmra.mrb[12].mxu0 %v9389_v15  ;;  %v2191_v15 = vld [vmem:[#allocation2 + $0x60] sm:$0xff] }
 0x1e4   : > { %7433 = vmatprep.mubr.bf16.mxu0 %v9393_v32  ;;  %7462 = vmatpush3.bf16.msra.mxu0 %v8664_v27  ;;  %v2192_v32 = vld [vmem:[#allocation2 + $0x68] sm:$0xff]  ;;  %v396_v27 = vld [vmem:[#allocation2 + $0x1a7] sm:$0x1] }
 0x1e5   : > { %7463 = vmatprep.subr.bf16.mxu0 %v8665_v31  ;;  %414 = vst [vmem:[#allocation2 + $0x1a9] sm:$0x1] %v396_v27 }
 0x1e8   : > { %7464 = vmatpush3.bf16.msra.mxu0 %v8665_v31  ;;  %v2217_v31 = vld [vmem:[#allocation2 + $0x198] sm:$0xff] }
 0x1e9   : > { %7497 = vmatprep.subr.bf16.mxu0 %v8666_v14 }
 0x1eb   : > { %7434 = vmatmul.mubr.bf16.gmra.mrb[16].mxu0 %v9395_v33  ;;  %v2220_v33 = vpack.c.bf16 %v2190_v11, %v2189_v1  ;;  %v2508_v11 = vld [vmem:[#allocation2 + $0xe1] sm:$0xff] }
 0x1ec   : > { %7437 = vmatprep.mubr.bf16.mxu0 %v9399_v43  ;;  %v2221_v43 = vpack.c.bf16 %v2192_v32, %v2191_v15  ;;  %v2509_v15 = vld [vmem:[#allocation2 + $0xf1] sm:$0xff]  ;;  %v2510_v32 = vld [vmem:[#allocation2 + $0xf9] sm:$0xff] }
 0x1f3   : > { %7438 = vmatmul.mubr.bf16.gmra.mrb[20].mxu0 %v9401_v38  ;;  %v8667_v38 = vld [vmem:[#allocation6 + $0x1c8] sm:$0xff]  }
 0x1f4   : > { %7441 = vmatprep.mubr.bf16.mxu0 %v9405_v51  ;;  %v2193_v51 = vld [vmem:[#allocation2 + $0x78] sm:$0xff] }
 0x1fb   : > { %7442 = vmatmul.mubr.bf16.gmra.mrb[24].mxu0 %v9407_v56  ;;  %v2194_v56 = vld [vmem:[#allocation2 + $0x80] sm:$0xff] }
 0x1fc   : > { %7445 = vmatprep.mubr.bf16.mxu0 %v9411_v59  ;;  %v2195_v59 = vld [vmem:[#allocation2 + $0x90] sm:$0xff]  ;;  %v2222_v41 = vpack.c.bf16 %v2194_v56, %v2193_v51  ;;  %v2513_v56 = vld [vmem:[#allocation2 + $0x121] sm:$0xff] }
 0x1fd   : > { %v2223_v45 = vpack.c.bf16 %v2196_v3, %v2195_v59  ;;  %v2512_v51 = vld [vmem:[#allocation2 + $0x111] sm:$0xff] }
 0x203   : > { %7446 = vmatmul.mubr.bf16.gmra.mrb[28].mxu0 %v9478_v54 }
 0x204   : > { %7465 = vmatprep.mubr.bf16.mxu0 %v2219_v0  ;;  %v2506_v0 = vld [vmem:[#allocation2 + $0xc9] sm:$0xff] }
 0x20b   : > { %7466 = vmatmul.mubr.bf16.vlgmr.msra.gmra.mrb[0].mxu0 %v2220_v33  ;;  %v2533_v33 = vpack.c.bf16 %v2510_v32, %v2509_v15  ;;  %v2825_v15 = vld [vmem:[#allocation2 + $0x16a] sm:$0xff]  ;;  %v2826_v32 = vld [vmem:[#allocation2 + $0x172] sm:$0xff] }
 0x20c   : > { %7498 = vmatpush3.bf16.msra.mxu0 %v8666_v14  ;;  %7469 = vmatprep.mubr.bf16.mxu0 %v2221_v43  ;;  %v2218_v14 = vld [vmem:[#allocation2 + $0x1a0] sm:$0xff]  ;;  %v8681_v43 = vld [vmem:[#allocation6 + $0x238] sm:$0xff]  }
 0x20d   : > { %7499 = vmatprep.subr.bf16.mxu0 %v8667_v38  ;;  %v2234_v26 = vpack.c.bf16 %v2218_v14, %v2217_v31  ;;  %v2817_v14 = vld [vmem:[#allocation2 + $0x10a] sm:$0xff] }
 0x210   : > { %7500 = vmatpush3.bf16.msra.mxu0 %v8667_v38  ;;  %v2511_v38 = vld [vmem:[#allocation2 + $0x109] sm:$0xff] }
 0x211   : > { %7501 = vmatprep.subr.bf16.mxu0 %v8668_v39  ;;  %v2534_v59 = vpack.c.bf16 %v2512_v51, %v2511_v38  ;;  %v9493_v51 = vld [vmem:[%s10592_s2] ss:$0 sm:$0xff] }
 0x213   : > { %7470 = vmatmul.mubr.bf16.gmra.mrb[4].mxu0 %v2222_v41  ;;  %v2516_v41 = vld [vmem:[#allocation2 + $0x141] sm:$0xff] }
 0x214   : > { %7473 = vmatprep.mubr.bf16.mxu0 %v2223_v45  ;;  %7502 = vmatpush3.bf16.msra.mxu0 %v8668_v39  ;;  %v2515_v39 = vld [vmem:[#allocation2 + $0x139] sm:$0xff]  ;;  %v2517_v45 = vld [vmem:[#allocation2 + $0x151] sm:$0xff] }
 0x215   : > { %7503 = vmatprep.subr.bf16.mxu0 %v8669_v47  ;;  %v2536_v53 = vpack.c.bf16 %v2516_v41, %v2515_v39 }
 0x218   : > { %7504 = vmatpush3.bf16.msra.mxu0 %v8669_v47  ;;  %v2518_v47 = vld [vmem:[#allocation2 + $0x159] sm:$0xff] }
 0x219   : > { %7505 = vmatprep.subr.bf16.mxu0 %v8670_v5  ;;  %v2537_v55 = vpack.c.bf16 %v2518_v47, %v2517_v45 }
 0x21b   : > { %7474 = vmatmul.mubr.bf16.gmra.mrb[8].mxu0 %v2224_v7  ;;  %v2523_v7 = vld [vmem:[#allocation2 + $0x199] sm:$0xff] }
 0x21c   : > { %7477 = vmatprep.mubr.bf16.mxu0 %v2225_v6  ;;  %7506 = vmatpush3.bf16.msra.mxu0 %v8670_v5  ;;  %v2538_v5 = vpack.c.bf16 %v2520_v63, %v2519_v61  ;;  %v2524_v6 = vld [vmem:[#allocation2 + $0x1a1] sm:$0xff] }
 0x21d   : > { %7507 = vmatprep.subr.bf16.mxu0 %v8671_v12  ;;  %v2540_v22 = vpack.c.bf16 %v2524_v6, %v2523_v7 }
 0x220   : > { %7508 = vmatpush3.bf16.msra.mxu0 %v8671_v12  ;;  %v2799_v12 = vld [vmem:[#allocation2 + $0x32] sm:$0xff] }
 0x221   : > { %7509 = vmatprep.subr.bf16.mxu0 %v8672_v16  ;;  %v2831_v24 = vpack.c.bf16 %v2800_v13, %v2799_v12 }
 0x223   : > { %7478 = vmatmul.mubr.bf16.gmra.mrb[12].mxu0 %v2226_v19  ;;  %v2803_v19 = vld [vmem:[#allocation2 + $0x62] sm:$0xff] }
 0x224   : > { %7481 = vmatprep.mubr.bf16.mxu0 %v2227_v20  ;;  %7510 = vmatpush3.bf16.msra.mxu0 %v8672_v16  ;;  %v2802_v16 = vld [vmem:[#allocation2 + $0x52] sm:$0xff]  ;;  %v2804_v20 = vld [vmem:[#allocation2 + $0x6a] sm:$0xff] }
 0x225   : > { %7511 = vmatprep.subr.bf16.mxu0 %v8673_v28  ;;  %v2833_v35 = vpack.c.bf16 %v2804_v20, %v2803_v19 }
 0x228   : > { %7512 = vmatpush3.bf16.msra.mxu0 %v8673_v28  ;;  %v2832_v28 = vpack.c.bf16 %v2802_v16, %v2801_v34 }
 0x229   : > { %7545 = vmatprep.subr.bf16.mxu0 %v8674_v46 }
 0x22b   : > { %7482 = vmatmul.mubr.bf16.gmra.mrb[16].mxu0 %v2228_v48 }
 0x22c   : > { %7485 = vmatprep.mubr.bf16.mxu0 %v2229_v57  ;;  %v2809_v57 = vld [vmem:[#allocation2 + $0xaa] sm:$0xff] }
 0x22d   : > { %v2836_v2 = vpack.c.bf16 %v2810_v58, %v2809_v57 }
 0x233   : > { %7486 = vmatmul.mubr.bf16.gmra.mrb[20].mxu0 %v2230_v17  ;;  %v2837_v17 = vpack.c.bf16 %v2812_v62, %v2811_v60 }
 0x234   : > { %7489 = vmatprep.mubr.bf16.mxu0 %v2231_v18  ;;  %v2813_v18 = vld [vmem:[#allocation2 + $0xda] sm:$0xff] }
 0x235   : > { %v2838_v27 = vpack.c.bf16 %v2814_v21, %v2813_v18 }
 0x23b   : > { %7490 = vmatmul.mubr.bf16.gmra.mrb[24].mxu0 %v2232_v25  ;;  %v2816_v25 = vld [vmem:[#allocation2 + $0xfa] sm:$0xff] }
 0x23c   : > { %7493 = vmatprep.mubr.bf16.mxu0 %v9429_v4  ;;  %v2505_v4 = vld [vmem:[#allocation2 + $0xc1] sm:$0xff]  ;;  %v2839_v31 = vpack.c.bf16 %v2816_v25, %v2815_v23 }
 0x23d   : > { %v2531_v1 = vpack.c.bf16 %v2506_v0, %v2505_v4  ;;  %v2821_v0 = vld [vmem:[#allocation2 + $0x13a] sm:$0xff] }
 0x243   : > { %7494 = vmatmul.mubr.bf16.gmra.mrb[28].mxu0 %v2234_v26  ;;  %v2818_v26 = vld [vmem:[#allocation2 + $0x112] sm:$0xff] }
 0x244   : > { %7513 = vmatprep.mubr.bf16.mxu0 %v9432_v8  ;;  %v8678_v8 = vld [vmem:[#allocation6 + $0x220] sm:$0xff]  }
 0x24b   : > { %7514 = vmatmul.mubr.bf16.vlgmr.msra.gmra.mrb[0].mxu0 %v9434_v10  ;;  %v8679_v10 = vld [vmem:[#allocation6 + $0x228] sm:$0xff]  }
 0x24c   : > { %7546 = vmatpush3.bf16.msra.mxu0 %v8674_v46  ;;  %7517 = vmatprep.mubr.bf16.mxu0 %v9438_v29  ;;  %v2507_v29 = vld [vmem:[#allocation2 + $0xd9] sm:$0xff]  ;;  %v2834_v46 = vpack.c.bf16 %v2806_v40, %v2805_v36 }
 0x24d   : > { %7547 = vmatprep.subr.bf16.mxu0 %v8675_v44 }
 0x250   : > { %7548 = vmatpush3.bf16.msra.mxu0 %v8675_v44  ;;  %v2819_v44 = vld [vmem:[#allocation2 + $0x122] sm:$0xff] }
 0x251   : > { %7549 = vmatprep.subr.bf16.mxu0 %v8676_v37 }
 0x253   : > { %7518 = vmatmul.mubr.bf16.gmra.mrb[4].mxu0 %v9440_v30  ;;  %v8680_v30 = vld [vmem:[#allocation6 + $0x230] sm:$0xff]  }
 0x254   : > { %7521 = vmatprep.mubr.bf16.mxu0 %v9444_v49  ;;  %7550 = vmatpush3.bf16.msra.mxu0 %v8676_v37  ;;  %v2532_v49 = vpack.c.bf16 %v2508_v11, %v2507_v29  ;;  %v2820_v37 = vld [vmem:[#allocation2 + $0x12a] sm:$0xff] }
 0x255   : > { %7551 = vmatprep.subr.bf16.mxu0 %v8677_v52  ;;  %v2841_v4 = vpack.c.bf16 %v2820_v37, %v2819_v44 }
 0x258   : > { %7552 = vmatpush3.bf16.msra.mxu0 %v8677_v52  ;;  %v2840_v52 = vpack.c.bf16 %v2818_v26, %v2817_v14 }
 0x259   : > { %7553 = vmatprep.subr.bf16.mxu0 %v8678_v8 }
 0x25b   : > { %7522 = vmatmul.mubr.bf16.gmra.mrb[8].mxu0 %v9446_v50  ;;  %v2514_v50 = vld [vmem:[#allocation2 + $0x129] sm:$0xff] }
 0x25c   : > { %7525 = vmatprep.mubr.bf16.mxu0 %v2531_v1  ;;  %7554 = vmatpush3.bf16.msra.mxu0 %v8678_v8  ;;  %v2535_v3 = vpack.c.bf16 %v2514_v50, %v2513_v56  ;;  %v2822_v8 = vld [vmem:[#allocation2 + $0x142] sm:$0xff]  ;;  %v2823_v1 = vld [vmem:[#allocation2 + $0x152] sm:$0xff] }
 0x25d   : > { %7555 = vmatprep.subr.bf16.mxu0 %v8679_v10  ;;  %v2842_v29 = vpack.c.bf16 %v2822_v8, %v2821_v0 }
 0x260   : > { %7556 = vmatpush3.bf16.msra.mxu0 %v8679_v10  ;;  %v2824_v10 = vld [vmem:[#allocation2 + $0x15a] sm:$0xff] }
 0x261   : > { %7557 = vmatprep.subr.bf16.mxu0 %v8680_v30  ;;  %v2843_v11 = vpack.c.bf16 %v2824_v10, %v2823_v1 }
 0x263   : > { %7526 = vmatmul.mubr.bf16.gmra.mrb[12].mxu0 %v2532_v49  ;;  %v2829_v49 = vld [vmem:[#allocation2 + $0x19a] sm:$0xff] }
 0x264   : > { %7529 = vmatprep.mubr.bf16.mxu0 %v2533_v33  ;;  %7558 = vmatpush3.bf16.msra.mxu0 %v8680_v30  ;;  %v2844_v30 = vpack.c.bf16 %v2826_v32, %v2825_v15  ;;  %v2830_v33 = vld [vmem:[#allocation2 + $0x1a2] sm:$0xff] }
 0x265   : > { %7559 = vmatprep.subr.bf16.mxu0 %v8681_v43 }
 0x268   : > { %7560 = vmatpush3.bf16.msra.mxu0 %v8681_v43  ;;  %v2846_v43 = vpack.c.bf16 %v2830_v33, %v2829_v49 }
 0x26b   : > { %7530 = vmatmul.mubr.bf16.gmra.mrb[16].mxu0 %v2534_v59 }
 0x26c   : > { %7533 = vmatprep.mubr.bf16.mxu0 %v2535_v3 }
 0x273   : > { %7534 = vmatmul.mubr.bf16.gmra.mrb[20].mxu0 %v2536_v53 }
 0x274   : > { %7537 = vmatprep.mubr.bf16.mxu0 %v2537_v55 }
 0x27b   : > { %7538 = vmatmul.mubr.bf16.gmra.mrb[24].mxu0 %v2538_v5 }
 0x27c   : > { %7541 = vmatprep.mubr.bf16.mxu0 %v9460_v9  ;;  %v2808_v9 = vld [vmem:[#allocation2 + $0x9a] sm:$0xff] }
 0x27d   : > { %v2835_v48 = vpack.c.bf16 %v2808_v9, %v2807_v42 }
 0x283   : > { %7542 = vmatmul.mubr.bf16.gmra.mrb[28].mxu0 %v2540_v22 }
 0x284   : > { %7561 = vmatprep.mubr.bf16.mxu0 %v2831_v24 }
 0x28b   : > { %7562 = vmatmul.mubr.bf16.vlgmr.msra.gmra.mrb[0].mxu0 %v2832_v28 }
 0x28c   : > { %7565 = vmatprep.mubr.bf16.mxu0 %v2833_v35 }
 0x293   : > { %7566 = vmatmul.mubr.bf16.gmra.mrb[4].mxu0 %v2834_v46 }
 0x294   : > { %7569 = vmatprep.mubr.bf16.mxu0 %v2835_v48 }
 0x29b   : > { %7570 = vmatmul.mubr.bf16.gmra.mrb[8].mxu0 %v2836_v2 }
 0x29c   : > { %7573 = vmatprep.mubr.bf16.mxu0 %v2837_v17 }
 0x2a3   : > { %7574 = vmatmul.mubr.bf16.gmra.mrb[12].mxu0 %v2838_v27 }
 0x2a4   : > { %7577 = vmatprep.mubr.bf16.mxu0 %v2839_v31 }
 0x2ab   : > { %7578 = vmatmul.mubr.bf16.gmra.mrb[16].mxu0 %v2840_v52 }
 0x2ac   : > { %7581 = vmatprep.mubr.bf16.mxu0 %v2841_v4 }
 0x2b3   : > { %7582 = vmatmul.mubr.bf16.gmra.mrb[20].mxu0 %v2842_v29 }
 0x2b4   : > { %7585 = vmatprep.mubr.bf16.mxu0 %v2843_v11 }
 0x2bb   : > { %7586 = vmatmul.mubr.bf16.gmra.mrb[24].mxu0 %v2844_v30 }
 0x2bc   : > { %7589 = vmatprep.mubr.bf16.mxu0 %v9478_v54 }
 0x2c3   : > { %7590 = vmatmul.mubr.bf16.gmra.mrb[28].mxu0 %v2846_v43 }
 0x35e   : > { %v7563_v38 = vpop.f32.mrb[0].mxu0 }
 0x35f   : > { %v2946_v56 = vpop.f32.mrb[1].mxu0  ;;  %v9502_v54 = vadd.f32 %v7563_v38, %v9493_v51 }
 0x360   : > { %v7564_v50 = vpop.f32.mrb[2].mxu0  ;;  %v9496_v3 = vadd.f32 %v9493_v51, %v2946_v56 }
 0x361   : > { %v2949_v59 = vpop.f32.mrb[3].mxu0  ;;  %v9507_v45 = vadd.f32 %v7564_v50, %v9493_v51 }
 0x362   : > { %v9499_v39 = vadd.f32 %v9493_v51, %v2949_v59  ;;  %v8682_v59 = vld [vmem:[#allocation8 + $0x40] sm:$0xff]  }
 0x363   : > { %7593 = vmatprep.subr.bf16.mxu1 %v8682_v59 }
 0x364   : > { %v3144_v41 = vadd.f32 %v9499_v39, %v9496_v3  ;;  %7594 = vmatpush3.bf16.msra.mxu1 %v8682_v59 }
 0x366   : > { %v3145_v47 = vadd.f32 %v3144_v41, %v9502_v54  ;;  %v7567_v53 = vpop.f32.mrb[4].mxu0 }
 0x367   : > { %v2962_v55 = vpop.f32.mrb[5].mxu0  ;;  %v9519_v13 = vadd.f32 %v7567_v53, %v9493_v51 }
 0x368   : > { %v9511_v61 = vadd.f32 %v9493_v51, %v2962_v55  ;;  %v3146_v63 = vadd.f32 %v3145_v47, %v9507_v45  ;;  %v7568_v5 = vpop.f32.mrb[6].mxu0 }
 0x369   : > { %v2965_v7 = vpop.f32.mrb[7].mxu0  ;;  %v9523_v24 = vadd.f32 %v7568_v5, %v9493_v51 }
 0x36a   : > { %v3147_v6 = vadd.f32 %v3146_v63, %v9511_v61  ;;  %v9516_v12 = vadd.f32 %v9493_v51, %v2965_v7  ;;  %v8683_v7 = vld [vmem:[#allocation8 + $0x48] sm:$0xff]  }
 0x36b   : > { %7595 = vmatprep.subr.bf16.mxu1 %v8683_v7 }
 0x36c   : > { %v3148_v22 = vadd.f32 %v3147_v6, %v9516_v12  ;;  %7596 = vmatpush3.bf16.msra.mxu1 %v8683_v7 }
 0x36e   : > { %v3149_v34 = vadd.f32 %v3148_v22, %v9519_v13  ;;  %v7571_v16 = vpop.f32.mrb[8].mxu0 }
 0x36f   : > { %v2978_v19 = vpop.f32.mrb[9].mxu0  ;;  %v9535_v9 = vadd.f32 %v7571_v16, %v9493_v51 }
 0x370   : > { %v9527_v20 = vadd.f32 %v9493_v51, %v2978_v19  ;;  %v3150_v28 = vadd.f32 %v3149_v34, %v9523_v24  ;;  %v7572_v35 = vpop.f32.mrb[10].mxu0 }
 0x371   : > { %v2981_v36 = vpop.f32.mrb[11].mxu0  ;;  %v9539_v48 = vadd.f32 %v7572_v35, %v9493_v51  ;;  %v8684_v35 = vld [vmem:[#allocation8 + $0x50] sm:$0xff]  }
 0x372   : > { %v3151_v40 = vadd.f32 %v3150_v28, %v9527_v20  ;;  %v9532_v42 = vadd.f32 %v9493_v51, %v2981_v36  ;;  %7597 = vmatprep.subr.bf16.mxu1 %v8684_v35 }
 0x373   : > { %7598 = vmatpush3.bf16.msra.mxu1 %v8684_v35 }
 0x374   : > { %v3152_v46 = vadd.f32 %v3151_v40, %v9532_v42 }
 0x376   : > { %v3153_v57 = vadd.f32 %v3152_v46, %v9535_v9  ;;  %v7575_v58 = vpop.f32.mrb[12].mxu0 }
 0x377   : > { %v2994_v60 = vpop.f32.mrb[13].mxu0  ;;  %v9551_v25 = vadd.f32 %v7575_v58, %v9493_v51 }
 0x378   : > { %v9543_v62 = vadd.f32 %v9493_v51, %v2994_v60  ;;  %v3154_v2 = vadd.f32 %v3153_v57, %v9539_v48  ;;  %v7576_v17 = vpop.f32.mrb[14].mxu0 }
 0x379   : > { %v2997_v18 = vpop.f32.mrb[15].mxu0  ;;  %v9555_v31 = vadd.f32 %v7576_v17, %v9493_v51 }
 0x37a   : > { %v3155_v21 = vadd.f32 %v3154_v2, %v9543_v62  ;;  %v9548_v23 = vadd.f32 %v9493_v51, %v2997_v18  ;;  %v8685_v2 = vld [vmem:[#allocation8 + $0x58] sm:$0xff]  }
 0x37b   : > { %7599 = vmatprep.subr.bf16.mxu1 %v8685_v2 }
 0x37c   : > { %v3156_v27 = vadd.f32 %v3155_v21, %v9548_v23  ;;  %7600 = vmatpush3.bf16.msra.mxu1 %v8685_v2 }
 0x37e   : > { %v3157_v14 = vadd.f32 %v3156_v27, %v9551_v25  ;;  %v7579_v26 = vpop.f32.mrb[16].mxu0 }
 0x37f   : > { %v3010_v44 = vpop.f32.mrb[17].mxu0  ;;  %v9567_v10 = vadd.f32 %v7579_v26, %v9493_v51 }
 0x380   : > { %v9559_v37 = vadd.f32 %v9493_v51, %v3010_v44  ;;  %v3158_v52 = vadd.f32 %v3157_v14, %v9555_v31  ;;  %v7580_v4 = vpop.f32.mrb[18].mxu0  ;;  %v8686_v44 = vld [vmem:[#allocation8 + $0x60] sm:$0xff]  }
 0x381   : > { %v3013_v0 = vpop.f32.mrb[19].mxu0  ;;  %v9571_v11 = vadd.f32 %v7580_v4, %v9493_v51  ;;  %7601 = vmatprep.subr.bf16.mxu1 %v8686_v44 }
 0x382   : > { %v3159_v8 = vadd.f32 %v3158_v52, %v9559_v37  ;;  %v9564_v1 = vadd.f32 %v9493_v51, %v3013_v0  ;;  %7602 = vmatpush3.bf16.msra.mxu1 %v8686_v44 }
 0x384   : > { %v3160_v29 = vadd.f32 %v3159_v8, %v9564_v1 }
 0x386   : > { %v3161_v15 = vadd.f32 %v3160_v29, %v9567_v10  ;;  %v7583_v32 = vpop.f32.mrb[20].mxu0  ;;  %v8687_v29 = vld [vmem:[#allocation8 + $0x68] sm:$0xff]  }
 0x387   : > { %v3026_v30 = vpop.f32.mrb[21].mxu0  ;;  %v9583_v41 = vadd.f32 %v7583_v32, %v9493_v51  ;;  %7603 = vmatprep.subr.bf16.mxu1 %v8687_v29 }
 0x388   : > { %v9575_v49 = vadd.f32 %v9493_v51, %v3026_v30  ;;  %v3162_v33 = vadd.f32 %v3161_v15, %v9571_v11  ;;  %v7584_v43 = vpop.f32.mrb[22].mxu0  ;;  %7604 = vmatpush3.bf16.msra.mxu1 %v8687_v29  ;;  %v8688_v30 = vld [vmem:[#allocation8 + $0x70] sm:$0xff]  }
 0x389   : > { %v3029_v38 = vpop.f32.mrb[23].mxu0  ;;  %v9587_v53 = vadd.f32 %v7584_v43, %v9493_v51  ;;  %7605 = vmatprep.subr.bf16.mxu1 %v8688_v30 }
 0x38a   : > { %v3163_v56 = vadd.f32 %v3162_v33, %v9575_v49  ;;  %v9580_v50 = vadd.f32 %v9493_v51, %v3029_v38  ;;  %v8689_v38 = vld [vmem:[#allocation8 + $0x78] sm:$0xff]  }
 0x38c   : > { %v3164_v47 = vadd.f32 %v3163_v56, %v9580_v50  ;;  %7606 = vmatpush3.bf16.msra.mxu1 %v8688_v30 }
 0x38d   : > { %7607 = vmatprep.subr.bf16.mxu1 %v8689_v38 }
 0x38e   : > { %v3165_v55 = vadd.f32 %v3164_v47, %v9583_v41  ;;  %v7587_v63 = vpop.f32.mrb[24].mxu0 }
 0x38f   : > { %v3042_v5 = vpop.f32.mrb[25].mxu0  ;;  %v3138_v36 = vadd.f32 %v7587_v63, %v9493_v51 }
 0x390   : > { %v9591_v6 = vadd.f32 %v9493_v51, %v3042_v5  ;;  %v3166_v22 = vadd.f32 %v3165_v55, %v9587_v53  ;;  %v7588_v34 = vpop.f32.mrb[26].mxu0  ;;  %7608 = vmatpush3.bf16.msra.mxu1 %v8689_v38  ;;  %v9605_v55 = vld [vmem:[#allocation8] sm:$0xff]  }
 0x391   : > { %v3045_v16 = vpop.f32.mrb[27].mxu0  ;;  %v3139_v46 = vadd.f32 %v7588_v34, %v9493_v51  ;;  %7641 = vmatprep.subr.bf16.mxu1 %v9605_v55 }
 0x392   : > { %v3167_v19 = vadd.f32 %v3166_v22, %v9591_v6  ;;  %v9596_v28 = vadd.f32 %v9493_v51, %v3045_v16 }
 0x394   : > { %v3168_v40 = vadd.f32 %v3167_v19, %v9596_v28 }
 0x396   : > { %v3169_v57 = vadd.f32 %v3168_v40, %v3138_v36  ;;  %v7591_v58 = vpop.f32.mrb[28].mxu0 }
 0x397   : > { %v3058_v60 = vpop.f32.mrb[29].mxu0  ;;  %v3142_v52 = vadd.f32 %v7591_v58, %v9493_v51 }
 0x398   : > { %v3140_v17 = vadd.f32 %v9493_v51, %v3058_v60  ;;  %v3170_v18 = vadd.f32 %v3169_v57, %v3139_v46  ;;  %v7592_v21 = vpop.f32.mrb[30].mxu0 }
 0x399   : > { %v3061_v27 = vpop.f32.mrb[31].mxu0  ;;  %v3143_v0 = vadd.f32 %v7592_v21, %v9493_v51 }
 0x39a   : > { %v3171_v14 = vadd.f32 %v3170_v18, %v3140_v17  ;;  %v3141_v26 = vadd.f32 %v9493_v51, %v3061_v27 }
 0x39c   : > { %v3172_v4 = vadd.f32 %v3171_v14, %v3141_v26 }
 0x39e   : > { %v3173_v8 = vadd.f32 %v3172_v4, %v3142_v52 }
 0x3a0   : > { %v3174_v15 = vadd.f32 %v3173_v8, %v3143_v0 }
 0x3a2   : > { %v3175_v32 = vrot.slane %v3174_v15, 4 }
 0x3a4   : > { %v3176_v33 = vadd.f32 %v3175_v32, %v3174_v15 }
 0x3a6   : > { %v3177_v43 = vrot.slane %v3176_v33, 2 }
 0x3a8   : > { %v3178_v56 = vadd.f32 %v3177_v43, %v3176_v33 }
 0x3aa   : > { %v3179_v59 = vrot.slane %v3178_v56, 1 }
 0x3ac   : > { %v3180_v47 = vadd.f32 %v3179_v59, %v3178_v56 }
 0x3ae   : > { %v3182_v51 = vmul.f32 0.00390625, %v3180_v47 }
 0x3b0   : > { %v9609_v63 = vsub.f32 %v9527_v20, %v3182_v51  ;;  %v9612_v5 = vsub.f32 %v9532_v42, %v3182_v51  ;;  %v9615_v7 = vsub.f32 %v9535_v9, %v3182_v51  ;;  %v9618_v22 = vsub.f32 %v9539_v48, %v3182_v51 }
 0x3b1   : > { %v9621_v34 = vsub.f32 %v9543_v62, %v3182_v51  ;;  %v9624_v16 = vsub.f32 %v9548_v23, %v3182_v51  ;;  %v9627_v19 = vsub.f32 %v9551_v25, %v3182_v51  ;;  %v9630_v20 = vsub.f32 %v9555_v31, %v3182_v51 }
 0x3b2   : > { %v9633_v42 = vsub.f32 %v9559_v37, %v3182_v51  ;;  %v9636_v9 = vsub.f32 %v9564_v1, %v3182_v51  ;;  %v9639_v48 = vsub.f32 %v9567_v10, %v3182_v51  ;;  %v9642_v62 = vsub.f32 %v9571_v11, %v3182_v51 }
 0x3b3   : > { %v9645_v23 = vsub.f32 %v9575_v49, %v3182_v51  ;;  %v9648_v25 = vsub.f32 %v9580_v50, %v3182_v51  ;;  %v9651_v31 = vsub.f32 %v9583_v41, %v3182_v51  ;;  %v9654_v37 = vsub.f32 %v9587_v53, %v3182_v51 }
 0x3b4   : > { %v9657_v1 = vsub.f32 %v9591_v6, %v3182_v51  ;;  %v9660_v10 = vsub.f32 %v9596_v28, %v3182_v51  ;;  %v9662_v11 = vsub.f32 %v3138_v36, %v3182_v51  ;;  %v9664_v35 = vsub.f32 %v3139_v46, %v3182_v51 }
 0x3b5   : > { %v9666_v49 = vsub.f32 %v3140_v17, %v3182_v51  ;;  %v9668_v50 = vsub.f32 %v3141_v26, %v3182_v51  ;;  %v9670_v40 = vsub.f32 %v3142_v52, %v3182_v51  ;;  %v9672_v41 = vsub.f32 %v3143_v0, %v3182_v51 }
 0x3b6   : > { %v9675_v53 = vsub.f32 %v9496_v3, %v3182_v51  ;;  %v9678_v6 = vsub.f32 %v9499_v39, %v3182_v51  ;;  %v9681_v28 = vsub.f32 %v9502_v54, %v3182_v51  ;;  %v9688_v57 = vsub.f32 %v9507_v45, %v3182_v51 }
 0x3b7   : > { %v9691_v58 = vsub.f32 %v9511_v61, %v3182_v51  ;;  %v9696_v60 = vsub.f32 %v9516_v12, %v3182_v51  ;;  %v9701_v17 = vsub.f32 %v9519_v13, %v3182_v51  ;;  %v9706_v61 = vsub.f32 %v9523_v24, %v3182_v51 }
 0x3b8   : > { %v3215_v36 = vmul.f32 %v9675_v53, %v9675_v53  ;;  %v3216_v46 = vmul.f32 %v9678_v6, %v9678_v6  ;;  %v3217_v3 = vmul.f32 %v9681_v28, %v9681_v28  ;;  %v3218_v54 = vmul.f32 %v9688_v57, %v9688_v57 }
 0x3b9   : > { %v3219_v45 = vmul.f32 %v9691_v58, %v9691_v58  ;;  %v3220_v21 = vmul.f32 %v9696_v60, %v9696_v60  ;;  %v3221_v12 = vmul.f32 %v9701_v17, %v9701_v17  ;;  %v3222_v26 = vmul.f32 %v9706_v61, %v9706_v61 }
 0x3ba   : > { %v3247_v39 = vadd.f32 %v3216_v46, %v3215_v36  ;;  %v3223_v44 = vmul.f32 %v9609_v63, %v9609_v63  ;;  %v3224_v24 = vmul.f32 %v9612_v5, %v9612_v5  ;;  %v3225_v0 = vmul.f32 %v9615_v7, %v9615_v7 }
 0x3bb   : > { %v3226_v29 = vmul.f32 %v9618_v22, %v9618_v22  ;;  %v3227_v32 = vmul.f32 %v9621_v34, %v9621_v34  ;;  %v3228_v33 = vmul.f32 %v9624_v16, %v9624_v16  ;;  %v3229_v38 = vmul.f32 %v9627_v19, %v9627_v19 }
 0x3bc   : > { %v3248_v2 = vadd.f32 %v3247_v39, %v3217_v3  ;;  %v3230_v59 = vmul.f32 %v9630_v20, %v9630_v20  ;;  %v3231_v51 = vmul.f32 %v9633_v42, %v9633_v42  ;;  %v3232_v46 = vmul.f32 %v9636_v9, %v9636_v9 }
 0x3bd   : > { %v3233_v39 = vmul.f32 %v9639_v48, %v9639_v48 }
 0x3be   : > { %v3249_v18 = vadd.f32 %v3248_v2, %v3218_v54  ;;  %v3234_v2 = vmul.f32 %v9642_v62, %v9642_v62 }
 0x3c0   : > { %v3250_v27 = vadd.f32 %v3249_v18, %v3219_v45  ;;  %v3235_v18 = vmul.f32 %v9645_v23, %v9645_v23 }
 0x3c2   : > { %v3251_v14 = vadd.f32 %v3250_v27, %v3220_v21  ;;  %v3236_v27 = vmul.f32 %v9648_v25, %v9648_v25 }
 0x3c4   : > { %v3252_v13 = vadd.f32 %v3251_v14, %v3221_v12  ;;  %v3237_v14 = vmul.f32 %v9651_v31, %v9651_v31 }
 0x3c6   : > { %v3253_v52 = vadd.f32 %v3252_v13, %v3222_v26  ;;  %v3238_v13 = vmul.f32 %v9654_v37, %v9654_v37 }
 0x3c8   : > { %v3254_v4 = vadd.f32 %v3253_v52, %v3223_v44  ;;  %v3239_v52 = vmul.f32 %v9657_v1, %v9657_v1 }
 0x3ca   : > { %v3255_v8 = vadd.f32 %v3254_v4, %v3224_v24  ;;  %v3240_v4 = vmul.f32 %v9660_v10, %v9660_v10 }
 0x3cc   : > { %v3256_v15 = vadd.f32 %v3255_v8, %v3225_v0  ;;  %v3241_v8 = vmul.f32 %v9662_v11, %v9662_v11 }
 0x3ce   : > { %v3257_v30 = vadd.f32 %v3256_v15, %v3226_v29  ;;  %v3242_v15 = vmul.f32 %v9664_v35, %v9664_v35 }
 0x3d0   : > { %v3258_v43 = vadd.f32 %v3257_v30, %v3227_v32  ;;  %v3243_v30 = vmul.f32 %v9666_v49, %v9666_v49 }
 0x3d2   : > { %v3259_v56 = vadd.f32 %v3258_v43, %v3228_v33  ;;  %v3244_v43 = vmul.f32 %v9668_v50, %v9668_v50 }
 0x3d4   : > { %v3260_v47 = vadd.f32 %v3259_v56, %v3229_v38  ;;  %v3245_v56 = vmul.f32 %v9670_v40, %v9670_v40 }
 0x3d6   : > { %v3261_v36 = vadd.f32 %v3260_v47, %v3230_v59  ;;  %v3246_v47 = vmul.f32 %v9672_v41, %v9672_v41 }
 0x3d8   : > { %v3262_v3 = vadd.f32 %v3261_v36, %v3231_v51 }
 0x3da   : > { %v3263_v54 = vadd.f32 %v3262_v3, %v3232_v46 }
 0x3dc   : > { %v3264_v45 = vadd.f32 %v3263_v54, %v3233_v39 }
 0x3de   : > { %v3265_v21 = vadd.f32 %v3264_v45, %v3234_v2 }
 0x3e0   : > { %v3266_v12 = vadd.f32 %v3265_v21, %v3235_v18 }
 0x3e2   : > { %v3267_v26 = vadd.f32 %v3266_v12, %v3236_v27 }
 0x3e4   : > { %v3268_v44 = vadd.f32 %v3267_v26, %v3237_v14 }
 0x3e6   : > { %v3269_v24 = vadd.f32 %v3268_v44, %v3238_v13 }
 0x3e8   : > { %v3270_v0 = vadd.f32 %v3269_v24, %v3239_v52 }
 0x3ea   : > { %v3271_v29 = vadd.f32 %v3270_v0, %v3240_v4 }
 0x3ec   : > { %v3272_v32 = vadd.f32 %v3271_v29, %v3241_v8 }
 0x3ee   : > { %v3273_v33 = vadd.f32 %v3272_v32, %v3242_v15 }
 0x3f0   : > { %v3274_v38 = vadd.f32 %v3273_v33, %v3243_v30 }
 0x3f2   : > { %v3275_v59 = vadd.f32 %v3274_v38, %v3244_v43 }
 0x3f4   : > { %v3276_v51 = vadd.f32 %v3275_v59, %v3245_v56 }
 0x3f6   : > { %v3277_v36 = vadd.f32 %v3276_v51, %v3246_v47 }
 0x3f8   : > { %v3278_v46 = vrot.slane %v3277_v36, 4 }
 0x3fa   : > { %v3279_v3 = vadd.f32 %v3278_v46, %v3277_v36 }
 0x3fc   : > { %v3280_v39 = vrot.slane %v3279_v3, 2 }
 0x3fe   : > { %v3281_v54 = vadd.f32 %v3280_v39, %v3279_v3 }
 0x400   : > { %v3282_v2 = vrot.slane %v3281_v54, 1 }
 0x402   : > { %v3283_v45 = vadd.f32 %v3282_v2, %v3281_v54 }
 0x404   : > { %v3284_v18 = vmul.f32 0.00390625, %v3283_v45 }
 0x406   : > { %v3285_v21 = vadd.f32 1e-05, %v3284_v18 }
 0x408   : > { %8754 = vrsqrt.f32 %v3285_v21 }
 0x412   : > { %v8755_v27 = vpop.eup %8754 }
 0x413   : > { %v3316_v12 = vmul.f32 %v8755_v27, %v9668_v50  ;;  %v9764_v14 = vmul.f32 %v8755_v27, %v9675_v53  ;;  %v9767_v26 = vmul.f32 %v8755_v27, %v9678_v6  ;;  %v3289_v13 = vmul.f32 %v8755_v27, %v9681_v28 }
 0x414   : > { %v3290_v44 = vmul.f32 %v8755_v27, %v9688_v57  ;;  %v9772_v52 = vmul.f32 %v8755_v27, %v9691_v58  ;;  %v9775_v24 = vmul.f32 %v8755_v27, %v9696_v60  ;;  %v9778_v4 = vmul.f32 %v8755_v27, %v9701_v17 }
 0x415   : > { %v9780_v50 = vmax.f32 %v3316_v12, 0.0  ;;  %v9783_v53 = vmul.f32 %v8755_v27, %v9706_v61  ;;  %v9786_v6 = vmul.f32 %v8755_v27, %v9609_v63  ;;  %v9789_v28 = vmul.f32 %v8755_v27, %v9612_v5 }
 0x416   : > { %v9792_v57 = vmul.f32 %v8755_v27, %v9615_v7  ;;  %v9795_v58 = vmul.f32 %v8755_v27, %v9618_v22  ;;  %v9798_v60 = vmul.f32 %v8755_v27, %v9621_v34  ;;  %v9801_v17 = vmul.f32 %v8755_v27, %v9624_v16 }
 0x417   : > { %v9804_v61 = vmul.f32 %v8755_v27, %v9627_v19  ;;  %v9807_v63 = vmul.f32 %v8755_v27, %v9630_v20  ;;  %v9810_v5 = vmul.f32 %v8755_v27, %v9633_v42  ;;  %v9813_v7 = vmul.f32 %v8755_v27, %v9636_v9  ;;  %3380 = vst [vmem:[#allocation2 + $0x171] sm:$0xff] %v9780_v50 }
 0x418   : > { %3386 = vst [vmem:[#allocation2 + $0x1a1] sm:$0xff] %v9780_v50  ;;  %v9818_v22 = vmul.f32 %v8755_v27, %v9639_v48  ;;  %v9821_v34 = vmul.f32 %v8755_v27, %v9642_v62  ;;  %v9824_v16 = vmul.f32 %v8755_v27, %v9645_v23  ;;  %v9827_v19 = vmul.f32 %v8755_v27, %v9648_v25 }
 0x419   : > { %v9830_v20 = vmul.f32 %v8755_v27, %v9651_v31  ;;  %v9833_v42 = vmul.f32 %v8755_v27, %v9654_v37  ;;  %v9836_v9 = vmul.f32 %v8755_v27, %v9657_v1  ;;  %v9839_v48 = vmul.f32 %v8755_v27, %v9660_v10 }
 0x41a   : > { %v9842_v62 = vmul.f32 %v8755_v27, %v9662_v11  ;;  %v9845_v23 = vmul.f32 %v8755_v27, %v9664_v35  ;;  %v3315_v25 = vmul.f32 %v8755_v27, %v9666_v49  ;;  %v9849_v31 = vmul.f32 %v8755_v27, %v9670_v40 }
 0x41b   : > { %v9852_v37 = vmul.f32 %v8755_v27, %v9672_v41  ;;  %v3319_v1 = vmax.f32 %v9764_v14, 0.0  ;;  %v3320_v0 = vmax.f32 %v9767_v26, 0.0  ;;  %v3321_v10 = vmax.f32 %v3289_v13, 0.0 }
 0x41c   : > { %v3322_v8 = vmax.f32 %v3290_v44, 0.0  ;;  %v3323_v11 = vmax.f32 %v9772_v52, 0.0  ;;  %v3324_v29 = vmax.f32 %v9775_v24, 0.0  ;;  %v3325_v35 = vmax.f32 %v9778_v4, 0.0  ;;  %v8694_v52 = vld [vmem:[#allocation8 + $0x20] sm:$0xff]  }
 0x41d   : > { %v3326_v49 = vmax.f32 %v9783_v53, 0.0  ;;  %v3327_v40 = vmax.f32 %v9786_v6, 0.0  ;;  %v3328_v15 = vmax.f32 %v9789_v28, 0.0  ;;  %v3329_v41 = vmax.f32 %v9792_v57, 0.0  ;;  %3351 = vst [vmem:[#allocation2 + $0x19] sm:$0xff] %v3319_v1  ;;  %3352 = vst [vmem:[#allocation2 + $0x21] sm:$0xff] %v3320_v0 }
 0x41e   : > { %3353 = vst [vmem:[#allocation2 + $0x31] sm:$0xff] %v3321_v10  ;;  %3383 = vst [vmem:[#allocation2 + $0x1] sm:$0xff] %v3321_v10  ;;  %v3330_v32 = vmax.f32 %v9795_v58, 0.0  ;;  %v3331_v30 = vmax.f32 %v9798_v60, 0.0  ;;  %v3332_v33 = vmax.f32 %v9801_v17, 0.0  ;;  %v3333_v43 = vmax.f32 %v9804_v61, 0.0 }
 0x41f   : > { %3354 = vst [vmem:[#allocation2 + $0x39] sm:$0xff] %v3322_v8  ;;  %3355 = vst [vmem:[#allocation2 + $0x49] sm:$0xff] %v3323_v11  ;;  %v3334_v38 = vmax.f32 %v9807_v63, 0.0  ;;  %v3335_v56 = vmax.f32 %v9810_v5, 0.0  ;;  %v3336_v59 = vmax.f32 %v9813_v7, 0.0  ;;  %v3337_v47 = vmax.f32 %v9818_v22, 0.0 }
 0x420   : > { %3356 = vst [vmem:[#allocation2 + $0x51] sm:$0xff] %v3324_v29  ;;  %3357 = vst [vmem:[#allocation2 + $0x61] sm:$0xff] %v3325_v35  ;;  %v3438_v51 = vld [vmem:[#allocation2 + $0x177] sm:$0x1]  ;;  %v3338_v36 = vmax.f32 %v9821_v34, 0.0  ;;  %v3339_v46 = vmax.f32 %v9824_v16, 0.0  ;;  %v3555_v16 = vpack.c.bf16 %v3322_v8, %v3321_v10  ;;  %v3560_v4 = vpack.c.bf16 %v3328_v15, %v3327_v40 }
 0x421   : > { %3384 = vst [vmem:[#allocation2 + $0x9] sm:$0xff] %v3322_v8  ;;  %3358 = vst [vmem:[#allocation2 + $0x69] sm:$0xff] %v3326_v49  ;;  %v3340_v3 = vmax.f32 %v9827_v19, 0.0  ;;  %v3341_v39 = vmax.f32 %v9830_v20, 0.0  ;;  %v3342_v54 = vmax.f32 %v9833_v42, 0.0  ;;  %v3343_v2 = vmax.f32 %v9836_v9, 0.0 }
 0x422   : > { %3359 = vst [vmem:[#allocation2 + $0x79] sm:$0xff] %v3327_v40  ;;  %3360 = vst [vmem:[#allocation2 + $0x81] sm:$0xff] %v3328_v15  ;;  %v3344_v45 = vmax.f32 %v9839_v48, 0.0  ;;  %v3345_v18 = vmax.f32 %v9842_v62, 0.0  ;;  %v3440_v21 = vld [vmem:[#allocation2 + $0x1a7] sm:$0x1]  ;;  %v3556_v19 = vpack.c.bf16 %v3320_v0, %v3319_v1  ;;  %7609 = vmatprep.mubr.bf16.mxu1 %v3555_v16  ;;  %v3562_v58 = vpack.c.bf16 %v3332_v33, %v3331_v30 }
 0x423   : > { %3361 = vst [vmem:[#allocation2 + $0x91] sm:$0xff] %v3329_v41  ;;  %3362 = vst [vmem:[#allocation2 + $0x99] sm:$0xff] %v3330_v32  ;;  %v3346_v27 = vmax.f32 %v9845_v23, 0.0  ;;  %v9914_v12 = vmax.f32 %v3315_v25, 0.0  ;;  %v3349_v13 = vmax.f32 %v9849_v31, 0.0  ;;  %v3350_v44 = vmax.f32 %v9852_v37, 0.0 }
 0x424   : > { %3363 = vst [vmem:[#allocation2 + $0xa9] sm:$0xff] %v3331_v30  ;;  %3364 = vst [vmem:[#allocation2 + $0xb1] sm:$0xff] %v3332_v33  ;;  %v8691_v20 = vld [vmem:[#allocation8 + $0x8] sm:$0xff]   ;;  %v9926_v48 = vpack.c.bf16 %v3340_v3, %v3339_v46  ;;  %v9928_v62 = vpack.c.bf16 %v3342_v54, %v3341_v39  ;;  %7610 = vmatmul.mubr.bf16.vlgmr.msra.gmra.mrb[0].mxu1 %v3556_v19  ;;  %v9930_v26 = vpack.c.bf16 %v3344_v45, %v3343_v2  ;;  %v8692_v0 = vld [vmem:[#allocation8 + $0x10] sm:$0xff]  }
 0x425   : > { %3365 = vst [vmem:[#allocation2 + $0xc1] sm:$0xff] %v3333_v43  ;;  %3456 = vst [vmem:[#allocation2 + $0x179] sm:$0x1] %v3438_v51  ;;  %v3387_v42 = vld [vmem:[#allocation2 + $0x2] sm:$0x1]  ;;  %v9932_v23 = vpack.c.bf16 %v3346_v27, %v3345_v18  ;;  %v3570_v25 = vpack.c.bf16 %v9780_v50, %v9914_v12  ;;  %7613 = vmatprep.mubr.bf16.mxu1 %v3555_v16  ;;  %7642 = vmatpush3.bf16.msra.mxu1 %v9605_v55  ;;  %v8695_v53 = vld [vmem:[#allocation8 + $0x28] sm:$0xff]  }
 0x426   : > { %3366 = vst [vmem:[#allocation2 + $0xc9] sm:$0xff] %v3334_v38  ;;  %3367 = vst [vmem:[#allocation2 + $0xd9] sm:$0xff] %v3335_v56  ;;  %v3388_v9 = vld [vmem:[#allocation2 + $0x1a] sm:$0x1]  ;;  %v3389_v14 = vld [vmem:[#allocation2 + $0x32] sm:$0x1]  ;;  %7643 = vmatprep.subr.bf16.mxu1 %v8691_v20  ;;  %v3558_v55 = vpack.c.bf16 %v3324_v29, %v3323_v11  ;;  %v3563_v16 = vpack.c.bf16 %v3334_v38, %v3333_v43  ;;  %v3564_v61 = vpack.c.bf16 %v3336_v59, %v3335_v56 }
 0x427   : > { %3368 = vst [vmem:[#allocation2 + $0xe1] sm:$0xff] %v3336_v59  ;;  %3369 = vst [vmem:[#allocation2 + $0xf1] sm:$0xff] %v3337_v47  ;;  %v3390_v31 = vld [vmem:[#allocation2 + $0x4a] sm:$0x1]  ;;  %v3391_v37 = vld [vmem:[#allocation2 + $0x62] sm:$0x1]  ;;  %v3565_v63 = vpack.c.bf16 %v3338_v36, %v3337_v47 }
 0x428   : > { %3370 = vst [vmem:[#allocation2 + $0xf9] sm:$0xff] %v3338_v36  ;;  %3371 = vst [vmem:[#allocation2 + $0x109] sm:$0xff] %v3339_v46  ;;  %v3423_v11 = vld [vmem:[#allocation2 + $0xf] sm:$0x1]  ;;  %v3424_v29 = vld [vmem:[#allocation2 + $0x27] sm:$0x1] }
 0x429   : > { %3372 = vst [vmem:[#allocation2 + $0x111] sm:$0xff] %v3340_v3  ;;  %3373 = vst [vmem:[#allocation2 + $0x121] sm:$0xff] %v3341_v39  ;;  %v3392_v1 = vld [vmem:[#allocation2 + $0x7a] sm:$0x1]  ;;  %7644 = vmatpush3.bf16.msra.mxu1 %v8691_v20  ;;  %v3428_v6 = vld [vmem:[#allocation2 + $0x87] sm:$0x1] }
 0x42a   : > { %3458 = vst [vmem:[#allocation2 + $0x1a9] sm:$0x1] %v3440_v21  ;;  %3374 = vst [vmem:[#allocation2 + $0x129] sm:$0xff] %v3342_v54  ;;  %v3393_v10 = vld [vmem:[#allocation2 + $0x92] sm:$0x1]  ;;  %7645 = vmatprep.subr.bf16.mxu1 %v8692_v0  ;;  %v8693_v54 = vld [vmem:[#allocation8 + $0x18] sm:$0xff]  }
 0x42b   : > { %3375 = vst [vmem:[#allocation2 + $0x139] sm:$0xff] %v3343_v2  ;;  %3376 = vst [vmem:[#allocation2 + $0x141] sm:$0xff] %v3344_v45  ;;  %v3394_v8 = vld [vmem:[#allocation2 + $0xaa] sm:$0x1]  ;;  %v3559_v45 = vpack.c.bf16 %v3326_v49, %v3325_v35  ;;  %v3425_v35 = vld [vmem:[#allocation2 + $0x3f] sm:$0x1]  ;;  %v3561_v49 = vpack.c.bf16 %v3330_v32, %v3329_v41 }
 0x42c   : > { %3377 = vst [vmem:[#allocation2 + $0x151] sm:$0xff] %v3345_v18  ;;  %3378 = vst [vmem:[#allocation2 + $0x159] sm:$0xff] %v3346_v27  ;;  %v3395_v51 = vld [vmem:[#allocation2 + $0xc2] sm:$0x1]  ;;  %7614 = vmatmul.mubr.bf16.gmra.mrb[4].mxu1 %v3558_v55  ;;  %v3426_v27 = vld [vmem:[#allocation2 + $0x57] sm:$0x1] }
 0x42d   : > { %3379 = vst [vmem:[#allocation2 + $0x169] sm:$0xff] %v9914_v12  ;;  %3381 = vst [vmem:[#allocation2 + $0x181] sm:$0xff] %v3349_v13  ;;  %v3396_v46 = vld [vmem:[#allocation2 + $0xda] sm:$0x1]  ;;  %7617 = vmatprep.mubr.bf16.mxu1 %v3559_v45  ;;  %7646 = vmatpush3.bf16.msra.mxu1 %v8692_v0  ;;  %v3427_v13 = vld [vmem:[#allocation2 + $0x6f] sm:$0x1] }
 0x42e   : > { %3382 = vst [vmem:[#allocation2 + $0x189] sm:$0xff] %v3350_v44  ;;  %3385 = vst [vmem:[#allocation2 + $0x199] sm:$0xff] %v9914_v12  ;;  %v3397_v3 = vld [vmem:[#allocation2 + $0xf2] sm:$0x1]  ;;  %7647 = vmatprep.subr.bf16.mxu1 %v8693_v54  ;;  %v8696_v28 = vld [vmem:[#allocation8 + $0x30] sm:$0xff]  }
 0x42f   : > { %3405 = vst [vmem:[#allocation2] sm:$0x1] %v3387_v42  ;;  %3406 = vst [vmem:[#allocation2 + $0x18] sm:$0x1] %v3388_v9  ;;  %v3398_v39 = vld [vmem:[#allocation2 + $0x10a] sm:$0x1] }
 0x430   : > { %3407 = vst [vmem:[#allocation2 + $0x30] sm:$0x1] %v3389_v14  ;;  %3408 = vst [vmem:[#allocation2 + $0x48] sm:$0x1] %v3390_v31  ;;  %v3399_v2 = vld [vmem:[#allocation2 + $0x122] sm:$0x1] }
 0x431   : > { %3409 = vst [vmem:[#allocation2 + $0x60] sm:$0x1] %v3391_v37  ;;  %3410 = vst [vmem:[#allocation2 + $0x78] sm:$0x1] %v3392_v1  ;;  %7648 = vmatpush3.bf16.msra.mxu1 %v8693_v54  ;;  %v3429_v40 = vld [vmem:[#allocation2 + $0x9f] sm:$0x1] }
 0x432   : > { %3411 = vst [vmem:[#allocation2 + $0x90] sm:$0x1] %v3393_v10  ;;  %3412 = vst [vmem:[#allocation2 + $0xa8] sm:$0x1] %v3394_v8  ;;  %v3400_v18 = vld [vmem:[#allocation2 + $0x13a] sm:$0x1]  ;;  %7649 = vmatprep.subr.bf16.mxu1 %v8694_v52 }
 0x433   : > { %3413 = vst [vmem:[#allocation2 + $0xc0] sm:$0x1] %v3395_v51  ;;  %3414 = vst [vmem:[#allocation2 + $0xd8] sm:$0x1] %v3396_v46  ;;  %v3401_v21 = vld [vmem:[#allocation2 + $0x152] sm:$0x1] }
 0x434   : > { %3415 = vst [vmem:[#allocation2 + $0xf0] sm:$0x1] %v3397_v3  ;;  %3416 = vst [vmem:[#allocation2 + $0x108] sm:$0x1] %v3398_v39  ;;  %v3402_v24 = vld [vmem:[#allocation2 + $0x16a] sm:$0x1]  ;;  %7618 = vmatmul.mubr.bf16.gmra.mrb[8].mxu1 %v3560_v4 }
 0x435   : > { %3417 = vst [vmem:[#allocation2 + $0x120] sm:$0x1] %v3399_v2  ;;  %3418 = vst [vmem:[#allocation2 + $0x138] sm:$0x1] %v3400_v18  ;;  %7621 = vmatprep.mubr.bf16.mxu1 %v3561_v49  ;;  %7650 = vmatpush3.bf16.msra.mxu1 %v8694_v52  ;;  %v3430_v15 = vld [vmem:[#allocation2 + $0xb7] sm:$0x1] }
 0x436   : > { %3419 = vst [vmem:[#allocation2 + $0x150] sm:$0x1] %v3401_v21  ;;  %3420 = vst [vmem:[#allocation2 + $0x168] sm:$0x1] %v3402_v24  ;;  %7651 = vmatprep.subr.bf16.mxu1 %v8695_v53  ;;  %v3431_v44 = vld [vmem:[#allocation2 + $0xcf] sm:$0x1] }
 0x437   : > { %3441 = vst [vmem:[#allocation2 + $0x11] sm:$0x1] %v3423_v11  ;;  %3442 = vst [vmem:[#allocation2 + $0x29] sm:$0x1] %v3424_v29  ;;  %v3432_v57 = vld [vmem:[#allocation2 + $0xe7] sm:$0x1] }
 0x438   : > { %3443 = vst [vmem:[#allocation2 + $0x41] sm:$0x1] %v3425_v35  ;;  %3444 = vst [vmem:[#allocation2 + $0x59] sm:$0x1] %v3426_v27  ;;  %v8697_v41 = vld [vmem:[#allocation8 + $0x38] sm:$0xff]   ;;  %v8698_v60 = vld [vmem:[#allocation8 + $0x80] sm:$0xff]  }
 0x439   : > { %3445 = vst [vmem:[#allocation2 + $0x71] sm:$0x1] %v3427_v13  ;;  %3446 = vst [vmem:[#allocation2 + $0x89] sm:$0x1] %v3428_v6  ;;  %7652 = vmatpush3.bf16.msra.mxu1 %v8695_v53  ;;  %v3433_v32 = vld [vmem:[#allocation2 + $0xff] sm:$0x1] }
 0x43a   : > { %3447 = vst [vmem:[#allocation2 + $0xa1] sm:$0x1] %v3429_v40  ;;  %3448 = vst [vmem:[#allocation2 + $0xb9] sm:$0x1] %v3430_v15  ;;  %7653 = vmatprep.subr.bf16.mxu1 %v8696_v28  ;;  %v3434_v19 = vld [vmem:[#allocation2 + $0x117] sm:$0x1] }
 0x43b   : > { %3449 = vst [vmem:[#allocation2 + $0xd1] sm:$0x1] %v3431_v44  ;;  %3450 = vst [vmem:[#allocation2 + $0xe9] sm:$0x1] %v3432_v57  ;;  %v3435_v20 = vld [vmem:[#allocation2 + $0x12f] sm:$0x1] }
 0x43c   : > { %3451 = vst [vmem:[#allocation2 + $0x101] sm:$0x1] %v3433_v32  ;;  %7622 = vmatmul.mubr.bf16.gmra.mrb[12].mxu1 %v3562_v58  ;;  %3452 = vst [vmem:[#allocation2 + $0x119] sm:$0x1] %v3434_v19  ;;  %v3436_v17 = vld [vmem:[#allocation2 + $0x147] sm:$0x1] }
 0x43d   : > { %7625 = vmatprep.mubr.bf16.mxu1 %v3563_v16  ;;  %7654 = vmatpush3.bf16.msra.mxu1 %v8696_v28  ;;  %3453 = vst [vmem:[#allocation2 + $0x131] sm:$0x1] %v3435_v20  ;;  %v3437_v30 = vld [vmem:[#allocation2 + $0x15f] sm:$0x1]  ;;  %3454 = vst [vmem:[#allocation2 + $0x149] sm:$0x1] %v3436_v17 }
 0x43e   : > { %7655 = vmatprep.subr.bf16.mxu1 %v8697_v41  ;;  %3455 = vst [vmem:[#allocation2 + $0x161] sm:$0x1] %v3437_v30  ;;  %v3403_v33 = vld [vmem:[#allocation2 + $0x182] sm:$0x1]  ;;  %v3439_v43 = vld [vmem:[#allocation2 + $0x18f] sm:$0x1] }
 0x43f   : > { %3421 = vst [vmem:[#allocation2 + $0x180] sm:$0x1] %v3403_v33  ;;  %3457 = vst [vmem:[#allocation2 + $0x191] sm:$0x1] %v3439_v43  ;;  %v3459_v5 = vld [vmem:[#allocation2] sm:$0xff]  ;;  %v3460_v38 = vld [vmem:[#allocation2 + $0x8] sm:$0xff] }
 0x440   : > { %v3404_v7 = vld [vmem:[#allocation2 + $0x19a] sm:$0x1]  ;;  %v3491_v22 = vpack.c.bf16 %v3460_v38, %v3459_v5  ;;  %v3463_v56 = vld [vmem:[#allocation2 + $0x30] sm:$0xff]  ;;  %v3462_v59 = vld [vmem:[#allocation2 + $0x20] sm:$0xff] }
 0x441   : > { %7656 = vmatpush3.bf16.msra.mxu1 %v8697_v41  ;;  %3422 = vst [vmem:[#allocation2 + $0x198] sm:$0x1] %v3404_v7  ;;  %v3461_v34 = vld [vmem:[#allocation2 + $0x18] sm:$0xff]  ;;  %v3467_v50 = vld [vmem:[#allocation2 + $0x60] sm:$0xff]  ;;  %v3466_v12 = vld [vmem:[#allocation2 + $0x50] sm:$0xff] }
 0x442   : > { %7689 = vmatprep.subr.bf16.mxu1 %v8698_v60  ;;  %v9976_v47 = vpack.c.bf16 %v3462_v59, %v3461_v34  ;;  %v3464_v36 = vld [vmem:[#allocation2 + $0x38] sm:$0xff]  ;;  %v8702_v31 = vld [vmem:[#allocation8 + $0xa0] sm:$0xff]   ;;  %v3470_v0 = vld [vmem:[#allocation2 + $0x80] sm:$0xff] }
 0x443   : > { %v8699_v42 = vld [vmem:[#allocation8 + $0x88] sm:$0xff]   ;;  %v9978_v9 = vpack.c.bf16 %v3464_v36, %v3463_v56  ;;  %v3471_v1 = vld [vmem:[#allocation2 + $0x90] sm:$0xff]  ;;  %v8704_v3 = vld [vmem:[#allocation8 + $0xb0] sm:$0xff]  }
 0x444   : > { %7626 = vmatmul.mubr.bf16.gmra.mrb[16].mxu1 %v3564_v61  ;;  %v3469_v37 = vld [vmem:[#allocation2 + $0x78] sm:$0xff]  ;;  %v3473_v39 = vld [vmem:[#allocation2 + $0xa8] sm:$0xff]  ;;  %v3475_v55 = vld [vmem:[#allocation2 + $0xc0] sm:$0xff] }
 0x445   : > { %7629 = vmatprep.mubr.bf16.mxu1 %v3565_v63  ;;  %v9988_v10 = vpack.c.bf16 %v3470_v0, %v3469_v37  ;;  %v3472_v8 = vld [vmem:[#allocation2 + $0x98] sm:$0xff]  ;;  %v3474_v54 = vld [vmem:[#allocation2 + $0xb0] sm:$0xff]  ;;  %v3476_v45 = vld [vmem:[#allocation2 + $0xc8] sm:$0xff] }
 0x446   : > { %v8703_v51 = vld [vmem:[#allocation8 + $0xa8] sm:$0xff]   ;;  %v9990_v46 = vpack.c.bf16 %v3472_v8, %v3471_v1  ;;  %v9994_v2 = vpack.c.bf16 %v3474_v54, %v3473_v39  ;;  %v8705_v18 = vld [vmem:[#allocation8 + $0xb8] sm:$0xff]   ;;  %v9996_v21 = vpack.c.bf16 %v3476_v45, %v3475_v55  ;;  %v8706_v52 = vld [vmem:[#allocation8 + $0xc0] sm:$0xff]  }
 0x447   : > { %v3477_v24 = vld [vmem:[#allocation2 + $0xd8] sm:$0xff]  ;;  %v3479_v11 = vld [vmem:[#allocation2 + $0xf0] sm:$0xff]  ;;  %v3478_v29 = vld [vmem:[#allocation2 + $0xe0] sm:$0xff] }
 0x448   : > { %v10000_v4 = vpack.c.bf16 %v3478_v29, %v3477_v24  ;;  %v3480_v53 = vld [vmem:[#allocation2 + $0xf8] sm:$0xff]  ;;  %v3481_v49 = vld [vmem:[#allocation2 + $0x108] sm:$0xff]  ;;  %v3483_v27 = vld [vmem:[#allocation2 + $0x120] sm:$0xff] }
 0x449   : > { %v10002_v35 = vpack.c.bf16 %v3480_v53, %v3479_v11  ;;  %v3482_v13 = vld [vmem:[#allocation2 + $0x110] sm:$0xff]  ;;  %v3484_v28 = vld [vmem:[#allocation2 + $0x128] sm:$0xff]  ;;  %v3485_v15 = vld [vmem:[#allocation2 + $0x138] sm:$0xff] }
 0x44a   : > { %v10006_v6 = vpack.c.bf16 %v3482_v13, %v3481_v49  ;;  %v10008_v40 = vpack.c.bf16 %v3484_v28, %v3483_v27  ;;  %v3487_v44 = vld [vmem:[#allocation2 + $0x150] sm:$0xff]  ;;  %v3486_v57 = vld [vmem:[#allocation2 + $0x140] sm:$0xff]  ;;  %v3488_v41 = vld [vmem:[#allocation2 + $0x158] sm:$0xff] }
 0x44b   : > { %v10012_v58 = vpack.c.bf16 %v3486_v57, %v3485_v15  ;;  %v10014_v32 = vpack.c.bf16 %v3488_v41, %v3487_v44  ;;  %v3489_v16 = vld [vmem:[#allocation2 + $0x168] sm:$0xff]  ;;  %v3490_v20 = vld [vmem:[#allocation2 + $0x170] sm:$0xff]  ;;  %v4011_v61 = vld [vmem:[#allocation2 + $0x3a] sm:$0xff] }
 0x44c   : > { %7630 = vmatmul.mubr.bf16.gmra.mrb[20].mxu1 %v9926_v48  ;;  %v8700_v48 = vld [vmem:[#allocation8 + $0x90] sm:$0xff]   ;;  %v4007_v19 = vld [vmem:[#allocation2 + $0xa] sm:$0xff]  ;;  %v4010_v5 = vld [vmem:[#allocation2 + $0x32] sm:$0xff] }
 0x44d   : > { %7633 = vmatprep.mubr.bf16.mxu1 %v9928_v62  ;;  %v3465_v62 = vld [vmem:[#allocation2 + $0x48] sm:$0xff]  ;;  %v4008_v63 = vld [vmem:[#allocation2 + $0x1a] sm:$0xff]  ;;  %v10023_v38 = vpack.c.bf16 %v4011_v61, %v4010_v5  ;;  %v4013_v34 = vld [vmem:[#allocation2 + $0x52] sm:$0xff] }
 0x44e   : > { %v9982_v14 = vpack.c.bf16 %v3466_v12, %v3465_v62  ;;  %v4006_v17 = vld [vmem:[#allocation2 + $0x2] sm:$0xff]  ;;  %v8707_v7 = vld [vmem:[#allocation8 + $0xc8] sm:$0xff]   ;;  %v4015_v56 = vld [vmem:[#allocation2 + $0x6a] sm:$0xff] }
 0x44f   : > { %v4038_v30 = vpack.c.bf16 %v4007_v19, %v4006_v17  ;;  %v4009_v33 = vld [vmem:[#allocation2 + $0x22] sm:$0xff]  ;;  %v4012_v59 = vld [vmem:[#allocation2 + $0x4a] sm:$0xff]  ;;  %v4018_v37 = vld [vmem:[#allocation2 + $0x92] sm:$0xff] }
 0x450   : > { %v10021_v43 = vpack.c.bf16 %v4009_v33, %v4008_v63  ;;  %v10027_v36 = vpack.c.bf16 %v4013_v34, %v4012_v59  ;;  %v4017_v12 = vld [vmem:[#allocation2 + $0x82] sm:$0xff]  ;;  %v8711_v1 = vld [vmem:[#allocation8 + $0xe8] sm:$0xff]   ;;  %v4020_v39 = vld [vmem:[#allocation2 + $0xaa] sm:$0xff] }
 0x451   : > { %v8712_v8 = vld [vmem:[#allocation8 + $0xf0] sm:$0xff]   ;;  %v8713_v45 = vld [vmem:[#allocation8 + $0xf8] sm:$0xff]   ;;  %v4026_v49 = vld [vmem:[#allocation2 + $0xf2] sm:$0xff] }
 0x452   : > { %v4022_v54 = vld [vmem:[#allocation2 + $0xc2] sm:$0xff]  ;;  %v4027_v11 = vld [vmem:[#allocation2 + $0xfa] sm:$0xff]  ;;  %v4029_v13 = vld [vmem:[#allocation2 + $0x112] sm:$0xff] }
 0x453   : > { %v4025_v24 = vld [vmem:[#allocation2 + $0xe2] sm:$0xff]  ;;  %v4024_v29 = vld [vmem:[#allocation2 + $0xda] sm:$0xff]  ;;  %v10047_v27 = vpack.c.bf16 %v4027_v11, %v4026_v49  ;;  %v4031_v28 = vld [vmem:[#allocation2 + $0x12a] sm:$0xff] }
 0x454   : > { %7634 = vmatmul.mubr.bf16.gmra.mrb[24].mxu1 %v9930_v26  ;;  %v3468_v26 = vld [vmem:[#allocation2 + $0x68] sm:$0xff]  ;;  %v10045_v53 = vpack.c.bf16 %v4025_v24, %v4024_v29  ;;  %v4035_v19 = vld [vmem:[#allocation2 + $0x15a] sm:$0xff]  ;;  %v4037_v61 = vld [vmem:[#allocation2 + $0x172] sm:$0xff] }
 0x455   : > { %7637 = vmatprep.mubr.bf16.mxu1 %v9932_v23  ;;  %v8701_v23 = vld [vmem:[#allocation8 + $0x98] sm:$0xff]   ;;  %v8727_v24 = vld [vmem:[#allocation8 + $0x168] sm:$0xff]   ;;  %v8728_v29 = vld [vmem:[#allocation8 + $0x170] sm:$0xff]  }
 0x456   : > { %v4028_v15 = vld [vmem:[#allocation2 + $0x10a] sm:$0xff]  ;;  %v4030_v57 = vld [vmem:[#allocation2 + $0x122] sm:$0xff] }
 0x457   : > { %v10051_v44 = vpack.c.bf16 %v4029_v13, %v4028_v15  ;;  %v10053_v41 = vpack.c.bf16 %v4031_v28, %v4030_v57  ;;  %v4036_v63 = vld [vmem:[#allocation2 + $0x16a] sm:$0xff]  ;;  %v4632_v49 = vld [vmem:[#allocation2 + $0xc1] sm:$0xff]  ;;  %v4634_v28 = vld [vmem:[#allocation2 + $0xd9] sm:$0xff] }
 0x458   : > { %v10063_v5 = vpack.c.bf16 %v4037_v61, %v4036_v63  ;;  %v8717_v34 = vld [vmem:[#allocation8 + $0x118] sm:$0xff]   ;;  %v4637_v61 = vld [vmem:[#allocation2 + $0xf9] sm:$0xff] }
 0x459   : > { %v4633_v13 = vld [vmem:[#allocation2 + $0xc9] sm:$0xff]  ;;  %v4635_v15 = vld [vmem:[#allocation2 + $0xe1] sm:$0xff] }
 0x45a   : > { %v10102_v57 = vpack.c.bf16 %v4633_v13, %v4632_v49  ;;  %v4638_v63 = vld [vmem:[#allocation2 + $0x109] sm:$0xff] }
 0x45b   : > { %v8742_v13 = vld [vmem:[#allocation8 + $0x1e0] sm:$0xff]  }
 0x45c   : > { %7638 = vmatmul.mubr.bf16.gmra.mrb[28].mxu1 %v3570_v25  ;;  %v9984_v25 = vpack.c.bf16 %v3468_v26, %v3467_v50  ;;  %v8710_v50 = vld [vmem:[#allocation8 + $0xe0] sm:$0xff]   ;;  %v4019_v26 = vld [vmem:[#allocation2 + $0x9a] sm:$0xff] }
 0x45d   : > { %7657 = vmatprep.mubr.bf16.mxu1 %v3491_v22  ;;  %v8708_v22 = vld [vmem:[#allocation8 + $0xd0] sm:$0xff]   ;;  %v10035_v0 = vpack.c.bf16 %v4019_v26, %v4018_v37 }
 0x45e   : > { %v4626_v26 = vld [vmem:[#allocation2 + $0x79] sm:$0xff] }
 0x464   : > { %7658 = vmatmul.mubr.bf16.vlgmr.msra.gmra.mrb[0].mxu1 %v9976_v47 }
 0x465   : > { %7661 = vmatprep.mubr.bf16.mxu1 %v9978_v9  ;;  %7690 = vmatpush3.bf16.msra.mxu1 %v8698_v60  ;;  %v10018_v60 = vpack.c.bf16 %v3490_v20, %v3489_v16  ;;  %v4033_v16 = vld [vmem:[#allocation2 + $0x142] sm:$0xff]  ;;  %v4032_v20 = vld [vmem:[#allocation2 + $0x13a] sm:$0xff] }
 0x466   : > { %7691 = vmatprep.subr.bf16.mxu1 %v8699_v42  ;;  %v10057_v17 = vpack.c.bf16 %v4033_v16, %v4032_v20  ;;  %v8729_v16 = vld [vmem:[#allocation8 + $0x178] sm:$0xff]   ;;  %v8730_v20 = vld [vmem:[#allocation8 + $0x180] sm:$0xff]  }
 0x469   : > { %7692 = vmatpush3.bf16.msra.mxu1 %v8699_v42  ;;  %v4014_v42 = vld [vmem:[#allocation2 + $0x62] sm:$0xff] }
 0x46a   : > { %7693 = vmatprep.subr.bf16.mxu1 %v8700_v48  ;;  %v10029_v62 = vpack.c.bf16 %v4015_v56, %v4014_v42  ;;  %v8718_v56 = vld [vmem:[#allocation8 + $0x120] sm:$0xff]  }
 0x46b   : > { %v4622_v42 = vld [vmem:[#allocation2 + $0x49] sm:$0xff] }
 0x46c   : > { %7662 = vmatmul.mubr.bf16.gmra.mrb[4].mxu1 %v9982_v14 }
 0x46d   : > { %7665 = vmatprep.mubr.bf16.mxu1 %v9984_v25  ;;  %7694 = vmatpush3.bf16.msra.mxu1 %v8700_v48  ;;  %v8709_v48 = vld [vmem:[#allocation8 + $0xd8] sm:$0xff]  }
 0x46e   : > { %7695 = vmatprep.subr.bf16.mxu1 %v8701_v23 }
 0x471   : > { %7696 = vmatpush3.bf16.msra.mxu1 %v8701_v23  ;;  %v4016_v23 = vld [vmem:[#allocation2 + $0x7a] sm:$0xff] }
 0x472   : > { %7697 = vmatprep.subr.bf16.mxu1 %v8702_v31 }
 0x474   : > { %7666 = vmatmul.mubr.bf16.gmra.mrb[8].mxu1 %v9988_v10 }
 0x475   : > { %7669 = vmatprep.mubr.bf16.mxu1 %v9990_v46  ;;  %7698 = vmatpush3.bf16.msra.mxu1 %v8702_v31  ;;  %v10033_v31 = vpack.c.bf16 %v4017_v12, %v4016_v23  ;;  %v4625_v12 = vld [vmem:[#allocation2 + $0x69] sm:$0xff]  ;;  %v4627_v23 = vld [vmem:[#allocation2 + $0x81] sm:$0xff] }
 0x476   : > { %7699 = vmatprep.subr.bf16.mxu1 %v8703_v51 }
 0x479   : > { %7700 = vmatpush3.bf16.msra.mxu1 %v8703_v51  ;;  %v4021_v51 = vld [vmem:[#allocation2 + $0xb2] sm:$0xff] }
 0x47a   : > { %7701 = vmatprep.subr.bf16.mxu1 %v8704_v3  ;;  %v10039_v55 = vpack.c.bf16 %v4021_v51, %v4020_v39  ;;  %v8726_v51 = vld [vmem:[#allocation8 + $0x160] sm:$0xff]   ;;  %v4629_v39 = vld [vmem:[#allocation2 + $0x99] sm:$0xff] }
 0x47c   : > { %7670 = vmatmul.mubr.bf16.gmra.mrb[12].mxu1 %v9994_v2 }
 0x47d   : > { %7673 = vmatprep.mubr.bf16.mxu1 %v9996_v21  ;;  %7702 = vmatpush3.bf16.msra.mxu1 %v8704_v3  ;;  %v4023_v3 = vld [vmem:[#allocation2 + $0xca] sm:$0xff] }
 0x47e   : > { %7703 = vmatprep.subr.bf16.mxu1 %v8705_v18 }
 0x481   : > { %7704 = vmatpush3.bf16.msra.mxu1 %v8705_v18  ;;  %v10041_v18 = vpack.c.bf16 %v4023_v3, %v4022_v54  ;;  %v4628_v3 = vld [vmem:[#allocation2 + $0x91] sm:$0xff]  ;;  %v4630_v54 = vld [vmem:[#allocation2 + $0xa9] sm:$0xff] }
 0x482   : > { %7737 = vmatprep.subr.bf16.mxu1 %v8706_v52 }
 0x484   : > { %7674 = vmatmul.mubr.bf16.gmra.mrb[16].mxu1 %v10000_v4 }
 0x485   : > { %7677 = vmatprep.mubr.bf16.mxu1 %v10002_v35 }
 0x48c   : > { %7678 = vmatmul.mubr.bf16.gmra.mrb[20].mxu1 %v10006_v6 }
 0x48d   : > { %7681 = vmatprep.mubr.bf16.mxu1 %v10008_v40 }
 0x494   : > { %7682 = vmatmul.mubr.bf16.gmra.mrb[24].mxu1 %v10012_v58 }
 0x495   : > { %7685 = vmatprep.mubr.bf16.mxu1 %v10014_v32 }
 0x49c   : > { %7686 = vmatmul.mubr.bf16.gmra.mrb[28].mxu1 %v10018_v60 }
 0x49d   : > { %7705 = vmatprep.mubr.bf16.mxu1 %v4038_v30  ;;  %v4034_v30 = vld [vmem:[#allocation2 + $0x152] sm:$0xff] }
 0x49e   : > { %v10059_v33 = vpack.c.bf16 %v4035_v19, %v4034_v30  ;;  %v10104_v19 = vpack.c.bf16 %v4635_v15, %v4634_v28  ;;  %v4636_v30 = vld [vmem:[#allocation2 + $0xf1] sm:$0xff]  ;;  %v5240_v28 = vld [vmem:[#allocation2 + $0xa8] sm:$0xff]  ;;  %v5242_v15 = vld [vmem:[#allocation2 + $0xc0] sm:$0xff] }
 0x4a4   : > { %7706 = vmatmul.mubr.bf16.vlgmr.msra.gmra.mrb[0].mxu1 %v10021_v43 }
 0x4a5   : > { %7709 = vmatprep.mubr.bf16.mxu1 %v10023_v38  ;;  %7738 = vmatpush3.bf16.msra.mxu1 %v8706_v52  ;;  %v8714_v52 = vld [vmem:[#allocation8 + $0x100] sm:$0xff]  }
 0x4a6   : > { %7739 = vmatprep.subr.bf16.mxu1 %v8707_v7 }
 0x4a9   : > { %7740 = vmatpush3.bf16.msra.mxu1 %v8707_v7  ;;  %v8715_v7 = vld [vmem:[#allocation8 + $0x108] sm:$0xff]  }
 0x4aa   : > { %7741 = vmatprep.subr.bf16.mxu1 %v8708_v22 }
 0x4ac   : > { %7710 = vmatmul.mubr.bf16.gmra.mrb[4].mxu1 %v10027_v36 }
 0x4ad   : > { %7713 = vmatprep.mubr.bf16.mxu1 %v10029_v62  ;;  %7742 = vmatpush3.bf16.msra.mxu1 %v8708_v22  ;;  %v8716_v22 = vld [vmem:[#allocation8 + $0x110] sm:$0xff]  }
 0x4ae   : > { %7743 = vmatprep.subr.bf16.mxu1 %v8709_v48 }
 0x4b1   : > { %7744 = vmatpush3.bf16.msra.mxu1 %v8709_v48 }
 0x4b2   : > { %7745 = vmatprep.subr.bf16.mxu1 %v8710_v50 }
 0x4b4   : > { %7714 = vmatmul.mubr.bf16.gmra.mrb[8].mxu1 %v10033_v31 }
 0x4b5   : > { %7717 = vmatprep.mubr.bf16.mxu1 %v10035_v0  ;;  %7746 = vmatpush3.bf16.msra.mxu1 %v8710_v50  ;;  %v4624_v50 = vld [vmem:[#allocation2 + $0x61] sm:$0xff] }
 0x4b6   : > { %7747 = vmatprep.subr.bf16.mxu1 %v8711_v1  ;;  %v10090_v37 = vpack.c.bf16 %v4625_v12, %v4624_v50  ;;  %v8732_v50 = vld [vmem:[#allocation8 + $0x190] sm:$0xff]   ;;  %v8733_v12 = vld [vmem:[#allocation8 + $0x198] sm:$0xff]  }
 0x4b9   : > { %7748 = vmatpush3.bf16.msra.mxu1 %v8711_v1  ;;  %v8725_v1 = vld [vmem:[#allocation8 + $0x158] sm:$0xff]  }
 0x4ba   : > { %7749 = vmatprep.subr.bf16.mxu1 %v8712_v8 }
 0x4bc   : > { %7718 = vmatmul.mubr.bf16.gmra.mrb[12].mxu1 %v10039_v55 }
 0x4bd   : > { %7721 = vmatprep.mubr.bf16.mxu1 %v10041_v18  ;;  %7750 = vmatpush3.bf16.msra.mxu1 %v8712_v8  ;;  %v10092_v8 = vpack.c.bf16 %v4627_v23, %v4626_v26  ;;  %v8734_v26 = vld [vmem:[#allocation8 + $0x1a0] sm:$0xff]  }
 0x4be   : > { %7751 = vmatprep.subr.bf16.mxu1 %v8713_v45 }
 0x4c1   : > { %7752 = vmatpush3.bf16.msra.mxu1 %v8713_v45  ;;  %v4631_v45 = vld [vmem:[#allocation2 + $0xb1] sm:$0xff] }
 0x4c2   : > { %7785 = vmatprep.subr.bf16.mxu1 %v8714_v52  ;;  %v10098_v11 = vpack.c.bf16 %v4631_v45, %v4630_v54  ;;  %v5237_v54 = vld [vmem:[#allocation2 + $0x80] sm:$0xff] }
 0x4c4   : > { %7722 = vmatmul.mubr.bf16.gmra.mrb[16].mxu1 %v10045_v53 }
 0x4c5   : > { %7725 = vmatprep.mubr.bf16.mxu1 %v10047_v27 }
 0x4cc   : > { %7726 = vmatmul.mubr.bf16.gmra.mrb[20].mxu1 %v10051_v44 }
 0x4cd   : > { %7729 = vmatprep.mubr.bf16.mxu1 %v10053_v41 }
 0x4d4   : > { %7730 = vmatmul.mubr.bf16.gmra.mrb[24].mxu1 %v10057_v17 }
 0x4d5   : > { %7733 = vmatprep.mubr.bf16.mxu1 %v10059_v33 }
 0x4dc   : > { %7734 = vmatmul.mubr.bf16.gmra.mrb[28].mxu1 %v10063_v5 }
 0x4dd   : > { %7753 = vmatprep.mubr.bf16.mxu1 %v9976_v47  ;;  %v8719_v47 = vld [vmem:[#allocation8 + $0x128] sm:$0xff]  }
 0x4e4   : > { %7754 = vmatmul.mubr.bf16.vlgmr.msra.gmra.mrb[0].mxu1 %v9978_v9  ;;  %v8720_v9 = vld [vmem:[#allocation8 + $0x130] sm:$0xff]  }
 0x4e5   : > { %7757 = vmatprep.mubr.bf16.mxu1 %v9982_v14  ;;  %7786 = vmatpush3.bf16.msra.mxu1 %v8714_v52  ;;  %v8721_v14 = vld [vmem:[#allocation8 + $0x138] sm:$0xff]   ;;  %v10096_v52 = vpack.c.bf16 %v4629_v39, %v4628_v3  ;;  %v5238_v39 = vld [vmem:[#allocation2 + $0x90] sm:$0xff] }
 0x4e6   : > { %7787 = vmatprep.subr.bf16.mxu1 %v8715_v7 }
 0x4e9   : > { %7788 = vmatpush3.bf16.msra.mxu1 %v8715_v7  ;;  %v4639_v7 = vld [vmem:[#allocation2 + $0x111] sm:$0xff] }
 0x4ea   : > { %7789 = vmatprep.subr.bf16.mxu1 %v8716_v22 }
 0x4ec   : > { %7758 = vmatmul.mubr.bf16.gmra.mrb[4].mxu1 %v9984_v25  ;;  %v8722_v25 = vld [vmem:[#allocation8 + $0x140] sm:$0xff]  }
 0x4ed   : > { %7761 = vmatprep.mubr.bf16.mxu1 %v9988_v10  ;;  %7790 = vmatpush3.bf16.msra.mxu1 %v8716_v22  ;;  %v4342_v10 = vld [vmem:[#allocation2 + $0x180] sm:$0xff]  ;;  %v10108_v22 = vpack.c.bf16 %v4637_v61, %v4636_v30  ;;  %v5243_v30 = vld [vmem:[#allocation2 + $0xc8] sm:$0xff]  ;;  %v8743_v61 = vld [vmem:[#allocation8 + $0x1e8] sm:$0xff]  }
 0x4ee   : > { %7791 = vmatprep.subr.bf16.mxu1 %v8717_v34 }
 0x4f1   : > { %7792 = vmatpush3.bf16.msra.mxu1 %v8717_v34  ;;  %v10110_v34 = vpack.c.bf16 %v4639_v7, %v4638_v63  ;;  %v5268_v63 = vpack.c.bf16 %v5243_v30, %v5242_v15  ;;  %v8744_v7 = vld [vmem:[#allocation8 + $0x1f0] sm:$0xff]  }
 0x4f2   : > { %7793 = vmatprep.subr.bf16.mxu1 %v8718_v56  ;;  %v5856_v30 = vld [vmem:[#allocation2 + $0xda] sm:$0xff] }
 0x4f4   : > { %7762 = vmatmul.mubr.bf16.gmra.mrb[8].mxu1 %v9990_v46  ;;  %v4618_v46 = vld [vmem:[#allocation2 + $0x19] sm:$0xff] }
 0x4f5   : > { %7765 = vmatprep.mubr.bf16.mxu1 %v9994_v2  ;;  %7794 = vmatpush3.bf16.msra.mxu1 %v8718_v56  ;;  %v4619_v2 = vld [vmem:[#allocation2 + $0x21] sm:$0xff] }
 0x4f6   : > { %7795 = vmatprep.subr.bf16.mxu1 %v8719_v47  ;;  %v4650_v59 = vpack.c.bf16 %v4619_v2, %v4618_v46  ;;  %v4640_v56 = vld [vmem:[#allocation2 + $0x121] sm:$0xff]  ;;  %v4644_v46 = vld [vmem:[#allocation2 + $0x151] sm:$0xff]  ;;  %v4645_v2 = vld [vmem:[#allocation2 + $0x159] sm:$0xff] }
 0x4f9   : > { %7796 = vmatpush3.bf16.msra.mxu1 %v8719_v47  ;;  %v4641_v47 = vld [vmem:[#allocation2 + $0x129] sm:$0xff] }
 0x4fa   : > { %7797 = vmatprep.subr.bf16.mxu1 %v8720_v9 }
 0x4fc   : > { %7766 = vmatmul.mubr.bf16.gmra.mrb[12].mxu1 %v9996_v21  ;;  %v4343_v21 = vld [vmem:[#allocation2 + $0x188] sm:$0xff] }
 0x4fd   : > { %7769 = vmatprep.mubr.bf16.mxu1 %v10000_v4  ;;  %7798 = vmatpush3.bf16.msra.mxu1 %v8720_v9  ;;  %v10081_v4 = vpack.c.bf16 %v4343_v21, %v4342_v10  ;;  %v4642_v9 = vld [vmem:[#allocation2 + $0x139] sm:$0xff]  ;;  %v4646_v21 = vld [vmem:[#allocation2 + $0x169] sm:$0xff] }
 0x4fe   : > { %7799 = vmatprep.subr.bf16.mxu1 %v8721_v14 }
 0x501   : > { %7800 = vmatpush3.bf16.msra.mxu1 %v8721_v14  ;;  %v4643_v14 = vld [vmem:[#allocation2 + $0x141] sm:$0xff] }
 0x502   : > { %7833 = vmatprep.subr.bf16.mxu1 %v8722_v25  ;;  %v10116_v10 = vpack.c.bf16 %v4643_v14, %v4642_v9  ;;  %v5245_v9 = vld [vmem:[#allocation2 + $0xe0] sm:$0xff] }
 0x504   : > { %7770 = vmatmul.mubr.bf16.gmra.mrb[16].mxu1 %v10002_v35  ;;  %v4620_v35 = vld [vmem:[#allocation2 + $0x31] sm:$0xff] }
 0x505   : > { %7773 = vmatprep.mubr.bf16.mxu1 %v10006_v6  ;;  %v4621_v6 = vld [vmem:[#allocation2 + $0x39] sm:$0xff] }
 0x506   : > { %v10084_v48 = vpack.c.bf16 %v4621_v6, %v4620_v35  ;;  %v10120_v35 = vpack.c.bf16 %v4645_v2, %v4644_v46  ;;  %v5247_v46 = vld [vmem:[#allocation2 + $0xf8] sm:$0xff]  ;;  %v8745_v2 = vld [vmem:[#allocation8 + $0x1f8] sm:$0xff]  }
 0x50c   : > { %7774 = vmatmul.mubr.bf16.gmra.mrb[20].mxu1 %v10008_v40  ;;  %v4623_v40 = vld [vmem:[#allocation2 + $0x51] sm:$0xff] }
 0x50d   : > { %7777 = vmatprep.mubr.bf16.mxu1 %v10012_v58  ;;  %v8723_v58 = vld [vmem:[#allocation8 + $0x148] sm:$0xff]  }
 0x514   : > { %7778 = vmatmul.mubr.bf16.gmra.mrb[24].mxu1 %v10014_v32  ;;  %v10086_v32 = vpack.c.bf16 %v4623_v40, %v4622_v42  ;;  %v4648_v42 = vld [vmem:[#allocation2 + $0x181] sm:$0xff]  ;;  %v4649_v40 = vld [vmem:[#allocation2 + $0x189] sm:$0xff] }
 0x515   : > { %7781 = vmatprep.mubr.bf16.mxu1 %v10018_v60  ;;  %v8724_v60 = vld [vmem:[#allocation8 + $0x150] sm:$0xff]  }
 0x51c   : > { %7782 = vmatmul.mubr.bf16.gmra.mrb[28].mxu1 %v10081_v4 }
 0x51d   : > { %7801 = vmatprep.mubr.bf16.mxu1 %v4650_v59  ;;  %v4647_v59 = vld [vmem:[#allocation2 + $0x171] sm:$0xff] }
 0x51e   : > { %v10122_v6 = vpack.c.bf16 %v4647_v59, %v4646_v21  ;;  %v8746_v59 = vld [vmem:[#allocation8 + $0x200] sm:$0xff]  }
 0x524   : > { %7802 = vmatmul.mubr.bf16.vlgmr.msra.gmra.mrb[0].mxu1 %v10084_v48 }
 0x525   : > { %7805 = vmatprep.mubr.bf16.mxu1 %v10086_v32  ;;  %7834 = vmatpush3.bf16.msra.mxu1 %v8722_v25  ;;  %v10114_v25 = vpack.c.bf16 %v4641_v47, %v4640_v56  ;;  %v5244_v56 = vld [vmem:[#allocation2 + $0xd8] sm:$0xff]  ;;  %v5246_v47 = vld [vmem:[#allocation2 + $0xf0] sm:$0xff] }
 0x526   : > { %7835 = vmatprep.subr.bf16.mxu1 %v8723_v58  ;;  %v5269_v14 = vpack.c.bf16 %v5245_v9, %v5244_v56  ;;  %v5270_v21 = vpack.c.bf16 %v5247_v46, %v5246_v47  ;;  %v5861_v56 = vld [vmem:[#allocation2 + $0x112] sm:$0xff]  ;;  %v5863_v47 = vld [vmem:[#allocation2 + $0x12a] sm:$0xff]  ;;  %v5862_v46 = vld [vmem:[#allocation2 + $0x122] sm:$0xff] }
 0x527   : > { %v5860_v9 = vld [vmem:[#allocation2 + $0x10a] sm:$0xff] }
 0x529   : > { %7836 = vmatpush3.bf16.msra.mxu1 %v8723_v58  ;;  %v10126_v58 = vpack.c.bf16 %v4649_v40, %v4648_v42  ;;  %v5248_v42 = vld [vmem:[#allocation2 + $0x108] sm:$0xff]  ;;  %v5250_v40 = vld [vmem:[#allocation2 + $0x120] sm:$0xff] }
 0x52a   : > { %7837 = vmatprep.subr.bf16.mxu1 %v8724_v60 }
 0x52c   : > { %7806 = vmatmul.mubr.bf16.gmra.mrb[4].mxu1 %v10090_v37 }
 0x52d   : > { %7809 = vmatprep.mubr.bf16.mxu1 %v10092_v8  ;;  %7838 = vmatpush3.bf16.msra.mxu1 %v8724_v60  ;;  %v8731_v60 = vld [vmem:[#allocation8 + $0x188] sm:$0xff]  }
 0x52e   : > { %7839 = vmatprep.subr.bf16.mxu1 %v8725_v1 }
 0x531   : > { %7840 = vmatpush3.bf16.msra.mxu1 %v8725_v1  ;;  %v5233_v1 = vld [vmem:[#allocation2 + $0x50] sm:$0xff] }
 0x532   : > { %7841 = vmatprep.subr.bf16.mxu1 %v8726_v51 }
 0x534   : > { %7810 = vmatmul.mubr.bf16.gmra.mrb[8].mxu1 %v10096_v52 }
 0x535   : > { %7813 = vmatprep.mubr.bf16.mxu1 %v10098_v11  ;;  %7842 = vmatpush3.bf16.msra.mxu1 %v8726_v51  ;;  %v5235_v51 = vld [vmem:[#allocation2 + $0x68] sm:$0xff] }
 0x536   : > { %7843 = vmatprep.subr.bf16.mxu1 %v8727_v24 }
 0x539   : > { %7844 = vmatpush3.bf16.msra.mxu1 %v8727_v24  ;;  %v5239_v24 = vld [vmem:[#allocation2 + $0x98] sm:$0xff] }
 0x53a   : > { %7845 = vmatprep.subr.bf16.mxu1 %v8728_v29  ;;  %v5266_v49 = vpack.c.bf16 %v5239_v24, %v5238_v39  ;;  %v5848_v39 = vld [vmem:[#allocation2 + $0x7a] sm:$0xff]  ;;  %v5853_v24 = vld [vmem:[#allocation2 + $0xb2] sm:$0xff] }
 0x53c   : > { %7814 = vmatmul.mubr.bf16.gmra.mrb[12].mxu1 %v10102_v57 }
 0x53d   : > { %7817 = vmatprep.mubr.bf16.mxu1 %v10104_v19  ;;  %7846 = vmatpush3.bf16.msra.mxu1 %v8728_v29  ;;  %v8741_v29 = vld [vmem:[#allocation8 + $0x1d8] sm:$0xff]  }
 0x53e   : > { %7847 = vmatprep.subr.bf16.mxu1 %v8729_v16 }
 0x541   : > { %7848 = vmatpush3.bf16.msra.mxu1 %v8729_v16  ;;  %v5241_v16 = vld [vmem:[#allocation2 + $0xb0] sm:$0xff] }
 0x542   : > { %7881 = vmatprep.subr.bf16.mxu1 %v8730_v20 }
 0x544   : > { %7818 = vmatmul.mubr.bf16.gmra.mrb[16].mxu1 %v10108_v22 }
 0x545   : > { %7821 = vmatprep.mubr.bf16.mxu1 %v10110_v34 }
 0x54c   : > { %7822 = vmatmul.mubr.bf16.gmra.mrb[20].mxu1 %v10114_v25 }
 0x54d   : > { %7825 = vmatprep.mubr.bf16.mxu1 %v10116_v10 }
 0x554   : > { %7826 = vmatmul.mubr.bf16.gmra.mrb[24].mxu1 %v10120_v35 }
 0x555   : > { %7829 = vmatprep.mubr.bf16.mxu1 %v10122_v6 }
 0x55c   : > { %7830 = vmatmul.mubr.bf16.gmra.mrb[28].mxu1 %v10126_v58 }
 0x55d   : > { %7849 = vmatprep.mubr.bf16.mxu1 %v10021_v43  ;;  %v8735_v43 = vld [vmem:[#allocation8 + $0x1a8] sm:$0xff]  }
 0x564   : > { %7850 = vmatmul.mubr.bf16.vlgmr.msra.gmra.mrb[0].mxu1 %v10023_v38  ;;  %v8736_v38 = vld [vmem:[#allocation8 + $0x1b0] sm:$0xff]  }
 0x565   : > { %7853 = vmatprep.mubr.bf16.mxu1 %v10027_v36  ;;  %7882 = vmatpush3.bf16.msra.mxu1 %v8730_v20  ;;  %v8737_v36 = vld [vmem:[#allocation8 + $0x1b8] sm:$0xff]   ;;  %v5267_v20 = vpack.c.bf16 %v5241_v16, %v5240_v28 }
 0x566   : > { %7883 = vmatprep.subr.bf16.mxu1 %v8731_v60  ;;  %v5854_v28 = vld [vmem:[#allocation2 + $0xc2] sm:$0xff] }
 0x567   : > { %v5857_v16 = vld [vmem:[#allocation2 + $0xe2] sm:$0xff] }
 0x569   : > { %7884 = vmatpush3.bf16.msra.mxu1 %v8731_v60  ;;  %v5249_v60 = vld [vmem:[#allocation2 + $0x110] sm:$0xff] }
 0x56a   : > { %7885 = vmatprep.subr.bf16.mxu1 %v8732_v50 }
 0x56c   : > { %7854 = vmatmul.mubr.bf16.gmra.mrb[4].mxu1 %v10029_v62  ;;  %v8738_v62 = vld [vmem:[#allocation8 + $0x1c0] sm:$0xff]  }
 0x56d   : > { %7857 = vmatprep.mubr.bf16.mxu1 %v10033_v31  ;;  %7886 = vmatpush3.bf16.msra.mxu1 %v8732_v50  ;;  %v4955_v31 = vld [vmem:[#allocation2 + $0x18a] sm:$0xff]  ;;  %v5271_v50 = vpack.c.bf16 %v5249_v60, %v5248_v42  ;;  %v5864_v42 = vld [vmem:[#allocation2 + $0x13a] sm:$0xff]  ;;  %v5866_v60 = vld [vmem:[#allocation2 + $0x152] sm:$0xff] }
 0x56e   : > { %7887 = vmatprep.subr.bf16.mxu1 %v8733_v12 }
 0x571   : > { %7888 = vmatpush3.bf16.msra.mxu1 %v8733_v12  ;;  %v5251_v12 = vld [vmem:[#allocation2 + $0x128] sm:$0xff] }
 0x572   : > { %7889 = vmatprep.subr.bf16.mxu1 %v8734_v26 }
 0x574   : > { %7858 = vmatmul.mubr.bf16.gmra.mrb[8].mxu1 %v10035_v0  ;;  %v5230_v0 = vld [vmem:[#allocation2 + $0x30] sm:$0xff] }
 0x575   : > { %7861 = vmatprep.mubr.bf16.mxu1 %v10039_v55  ;;  %7890 = vmatpush3.bf16.msra.mxu1 %v8734_v26  ;;  %v4954_v55 = vld [vmem:[#allocation2 + $0x182] sm:$0xff]  ;;  %v5272_v26 = vpack.c.bf16 %v5251_v12, %v5250_v40  ;;  %v5869_v12 = vld [vmem:[#allocation2 + $0x172] sm:$0xff] }
 0x576   : > { %7891 = vmatprep.subr.bf16.mxu1 %v8735_v43 }
 0x579   : > { %7892 = vmatpush3.bf16.msra.mxu1 %v8735_v43  ;;  %v5252_v43 = vld [vmem:[#allocation2 + $0x138] sm:$0xff] }
 0x57a   : > { %7893 = vmatprep.subr.bf16.mxu1 %v8736_v38 }
 0x57c   : > { %7862 = vmatmul.mubr.bf16.gmra.mrb[12].mxu1 %v10041_v18  ;;  %v10144_v18 = vpack.c.bf16 %v4955_v31, %v4954_v55  ;;  %v5255_v31 = vld [vmem:[#allocation2 + $0x158] sm:$0xff]  ;;  %v5256_v55 = vld [vmem:[#allocation2 + $0x168] sm:$0xff] }
 0x57d   : > { %7865 = vmatprep.mubr.bf16.mxu1 %v10045_v53  ;;  %7894 = vmatpush3.bf16.msra.mxu1 %v8736_v38  ;;  %v5231_v53 = vld [vmem:[#allocation2 + $0x38] sm:$0xff]  ;;  %v5254_v38 = vld [vmem:[#allocation2 + $0x150] sm:$0xff] }
 0x57e   : > { %7895 = vmatprep.subr.bf16.mxu1 %v8737_v36  ;;  %v5262_v23 = vpack.c.bf16 %v5231_v53, %v5230_v0  ;;  %v5274_v0 = vpack.c.bf16 %v5255_v31, %v5254_v38  ;;  %v5257_v53 = vld [vmem:[#allocation2 + $0x170] sm:$0xff]  ;;  %v5873_v38 = vld [vmem:[#allocation2 + $0x1a2] sm:$0xff] }
 0x581   : > { %7896 = vmatpush3.bf16.msra.mxu1 %v8737_v36  ;;  %v5253_v36 = vld [vmem:[#allocation2 + $0x140] sm:$0xff] }
 0x582   : > { %7929 = vmatprep.subr.bf16.mxu1 %v8738_v62 }
 0x584   : > { %7866 = vmatmul.mubr.bf16.gmra.mrb[16].mxu1 %v10047_v27  ;;  %v5232_v27 = vld [vmem:[#allocation2 + $0x48] sm:$0xff] }
 0x585   : > { %7869 = vmatprep.mubr.bf16.mxu1 %v10051_v44  ;;  %v5234_v44 = vld [vmem:[#allocation2 + $0x60] sm:$0xff] }
 0x586   : > { %v5264_v3 = vpack.c.bf16 %v5235_v51, %v5234_v44  ;;  %v5261_v44 = vld [vmem:[#allocation2 + $0x1a0] sm:$0xff] }
 0x587   : > { %v8748_v51 = vld [vmem:[#allocation8 + $0x210] sm:$0xff]  }
 0x58c   : > { %7870 = vmatmul.mubr.bf16.gmra.mrb[20].mxu1 %v10053_v41  ;;  %v5263_v41 = vpack.c.bf16 %v5233_v1, %v5232_v27  ;;  %v5260_v27 = vld [vmem:[#allocation2 + $0x198] sm:$0xff] }
 0x58d   : > { %7873 = vmatprep.mubr.bf16.mxu1 %v10057_v17  ;;  %v8739_v17 = vld [vmem:[#allocation8 + $0x1c8] sm:$0xff]   ;;  %v5277_v1 = vpack.c.bf16 %v5261_v44, %v5260_v27 }
 0x594   : > { %7874 = vmatmul.mubr.bf16.gmra.mrb[24].mxu1 %v10059_v33  ;;  %v8740_v33 = vld [vmem:[#allocation8 + $0x1d0] sm:$0xff]  }
 0x595   : > { %7877 = vmatprep.mubr.bf16.mxu1 %v10063_v5  ;;  %v5236_v5 = vld [vmem:[#allocation2 + $0x78] sm:$0xff] }
 0x596   : > { %v5265_v45 = vpack.c.bf16 %v5237_v54, %v5236_v5  ;;  %v5846_v5 = vld [vmem:[#allocation2 + $0x62] sm:$0xff]  ;;  %v5850_v54 = vld [vmem:[#allocation2 + $0x92] sm:$0xff] }
 0x59c   : > { %7878 = vmatmul.mubr.bf16.gmra.mrb[28].mxu1 %v10144_v18 }
 0x59d   : > { %7897 = vmatprep.mubr.bf16.mxu1 %v5262_v23  ;;  %v5275_v23 = vpack.c.bf16 %v5257_v53, %v5256_v55 }
 0x5a4   : > { %7898 = vmatmul.mubr.bf16.vlgmr.msra.gmra.mrb[0].mxu1 %v5263_v41  ;;  %v8747_v41 = vld [vmem:[#allocation8 + $0x208] sm:$0xff]  }
 0x5a5   : > { %7901 = vmatprep.mubr.bf16.mxu1 %v5264_v3  ;;  %7930 = vmatpush3.bf16.msra.mxu1 %v8738_v62  ;;  %v5273_v62 = vpack.c.bf16 %v5253_v36, %v5252_v43  ;;  %v5845_v3 = vld [vmem:[#allocation2 + $0x52] sm:$0xff]  ;;  %v5872_v36 = vld [vmem:[#allocation2 + $0x19a] sm:$0xff] }
 0x5a6   : > { %7931 = vmatprep.subr.bf16.mxu1 %v8739_v17 }
 0x5a9   : > { %7932 = vmatpush3.bf16.msra.mxu1 %v8739_v17  ;;  %v8749_v17 = vld [vmem:[#allocation8 + $0x218] sm:$0xff]  }
 0x5aa   : > { %7933 = vmatprep.subr.bf16.mxu1 %v8740_v33 }
 0x5ac   : > { %7902 = vmatmul.mubr.bf16.gmra.mrb[4].mxu1 %v5265_v45 }
 0x5ad   : > { %7905 = vmatprep.mubr.bf16.mxu1 %v5266_v49  ;;  %7934 = vmatpush3.bf16.msra.mxu1 %v8740_v33  ;;  %v5844_v33 = vld [vmem:[#allocation2 + $0x4a] sm:$0xff] }
 0x5ae   : > { %7935 = vmatprep.subr.bf16.mxu1 %v8741_v29  ;;  %v5852_v49 = vld [vmem:[#allocation2 + $0xaa] sm:$0xff] }
 0x5b1   : > { %7936 = vmatpush3.bf16.msra.mxu1 %v8741_v29  ;;  %v5855_v29 = vld [vmem:[#allocation2 + $0xca] sm:$0xff] }
 0x5b2   : > { %7937 = vmatprep.subr.bf16.mxu1 %v8742_v13  ;;  %v5880_v15 = vpack.c.bf16 %v5855_v29, %v5854_v28 }
 0x5b4   : > { %7906 = vmatmul.mubr.bf16.gmra.mrb[8].mxu1 %v5267_v20  ;;  %v5859_v20 = vld [vmem:[#allocation2 + $0xfa] sm:$0xff] }
 0x5b5   : > { %7909 = vmatprep.mubr.bf16.mxu1 %v5268_v63  ;;  %7938 = vmatpush3.bf16.msra.mxu1 %v8742_v13  ;;  %v5879_v13 = vpack.c.bf16 %v5853_v24, %v5852_v49  ;;  %v5858_v63 = vld [vmem:[#allocation2 + $0xf2] sm:$0xff] }
 0x5b6   : > { %7939 = vmatprep.subr.bf16.mxu1 %v8743_v61 }
 0x5b9   : > { %7940 = vmatpush3.bf16.msra.mxu1 %v8743_v61  ;;  %v5881_v61 = vpack.c.bf16 %v5857_v16, %v5856_v30 }
 0x5ba   : > { %7941 = vmatprep.subr.bf16.mxu1 %v8744_v7 }
 0x5bc   : > { %7910 = vmatmul.mubr.bf16.gmra.mrb[12].mxu1 %v5269_v14  ;;  %v5883_v14 = vpack.c.bf16 %v5861_v56, %v5860_v9 }
 0x5bd   : > { %7913 = vmatprep.mubr.bf16.mxu1 %v5270_v21  ;;  %7942 = vmatpush3.bf16.msra.mxu1 %v8744_v7  ;;  %v5882_v7 = vpack.c.bf16 %v5859_v20, %v5858_v63  ;;  %v5865_v21 = vld [vmem:[#allocation2 + $0x142] sm:$0xff] }
 0x5be   : > { %7943 = vmatprep.subr.bf16.mxu1 %v8745_v2  ;;  %v5885_v40 = vpack.c.bf16 %v5865_v21, %v5864_v42 }
 0x5c1   : > { %7944 = vmatpush3.bf16.msra.mxu1 %v8745_v2  ;;  %v5884_v2 = vpack.c.bf16 %v5863_v47, %v5862_v46 }
 0x5c2   : > { %7977 = vmatprep.subr.bf16.mxu1 %v8746_v59 }
 0x5c4   : > { %7914 = vmatmul.mubr.bf16.gmra.mrb[16].mxu1 %v5271_v50 }
 0x5c5   : > { %7917 = vmatprep.mubr.bf16.mxu1 %v5272_v26  ;;  %v5868_v26 = vld [vmem:[#allocation2 + $0x16a] sm:$0xff] }
 0x5c6   : > { %v5887_v43 = vpack.c.bf16 %v5869_v12, %v5868_v26 }
 0x5cc   : > { %7918 = vmatmul.mubr.bf16.gmra.mrb[20].mxu1 %v5273_v62  ;;  %v5889_v62 = vpack.c.bf16 %v5873_v38, %v5872_v36 }
 0x5cd   : > { %7921 = vmatprep.mubr.bf16.mxu1 %v5274_v0  ;;  %v10167_v0 = vld [vmem:[%s10594_s4] ss:$0 sm:$0xff] }
 0x5d4   : > { %7922 = vmatmul.mubr.bf16.gmra.mrb[24].mxu1 %v5275_v23 }
 0x5d5   : > { %7925 = vmatprep.mubr.bf16.mxu1 %v10081_v4  ;;  %v8750_v4 = vld [vmem:[#allocation8 + $0x220] sm:$0xff]  }
 0x5dc   : > { %7926 = vmatmul.mubr.bf16.gmra.mrb[28].mxu1 %v5277_v1 }
 0x5dd   : > { %7945 = vmatprep.mubr.bf16.mxu1 %v10084_v48  ;;  %v8751_v48 = vld [vmem:[#allocation8 + $0x228] sm:$0xff]  }
 0x5e4   : > { %7946 = vmatmul.mubr.bf16.vlgmr.msra.gmra.mrb[0].mxu1 %v10086_v32  ;;  %v8752_v32 = vld [vmem:[#allocation8 + $0x230] sm:$0xff]  }
 0x5e5   : > { %7949 = vmatprep.mubr.bf16.mxu1 %v10090_v37  ;;  %7978 = vmatpush3.bf16.msra.mxu1 %v8746_v59  ;;  %v8753_v37 = vld [vmem:[#allocation8 + $0x238] sm:$0xff]   ;;  %v5867_v59 = vld [vmem:[#allocation2 + $0x15a] sm:$0xff] }
 0x5e6   : > { %7979 = vmatprep.subr.bf16.mxu1 %v8747_v41  ;;  %v5886_v50 = vpack.c.bf16 %v5867_v59, %v5866_v60 }
 0x5e9   : > { %7980 = vmatpush3.bf16.msra.mxu1 %v8747_v41 }
 0x5ea   : > { %7981 = vmatprep.subr.bf16.mxu1 %v8748_v51 }
 0x5ec   : > { %7950 = vmatmul.mubr.bf16.gmra.mrb[4].mxu1 %v10092_v8  ;;  %v5566_v8 = vld [vmem:[#allocation2 + $0x199] sm:$0xff] }
 0x5ed   : > { %7953 = vmatprep.mubr.bf16.mxu1 %v10096_v52  ;;  %7982 = vmatpush3.bf16.msra.mxu1 %v8748_v51  ;;  %v5567_v52 = vld [vmem:[#allocation2 + $0x1a1] sm:$0xff] }
 0x5ee   : > { %7983 = vmatprep.subr.bf16.mxu1 %v8749_v17 }
 0x5f1   : > { %7984 = vmatpush3.bf16.msra.mxu1 %v8749_v17 }
 0x5f2   : > { %7985 = vmatprep.subr.bf16.mxu1 %v8750_v4 }
 0x5f4   : > { %7954 = vmatmul.mubr.bf16.gmra.mrb[8].mxu1 %v10098_v11  ;;  %v5843_v11 = vld [vmem:[#allocation2 + $0x3a] sm:$0xff] }
 0x5f5   : > { %7957 = vmatprep.mubr.bf16.mxu1 %v10102_v57  ;;  %7986 = vmatpush3.bf16.msra.mxu1 %v8750_v4  ;;  %v5583_v57 = vpack.c.bf16 %v5567_v52, %v5566_v8 }
 0x5f6   : > { %7987 = vmatprep.subr.bf16.mxu1 %v8751_v48 }
 0x5f9   : > { %7988 = vmatpush3.bf16.msra.mxu1 %v8751_v48 }
 0x5fa   : > { %7989 = vmatprep.subr.bf16.mxu1 %v8752_v32 }
 0x5fc   : > { %7958 = vmatmul.mubr.bf16.gmra.mrb[12].mxu1 %v10104_v19  ;;  %v5842_v19 = vld [vmem:[#allocation2 + $0x32] sm:$0xff] }
 0x5fd   : > { %7961 = vmatprep.mubr.bf16.mxu1 %v10108_v22  ;;  %7990 = vmatpush3.bf16.msra.mxu1 %v8752_v32  ;;  %v5874_v22 = vpack.c.bf16 %v5843_v11, %v5842_v19 }
 0x5fe   : > { %7991 = vmatprep.subr.bf16.mxu1 %v8753_v37 }
 0x601   : > { %7992 = vmatpush3.bf16.msra.mxu1 %v8753_v37 }
 0x604   : > { %7962 = vmatmul.mubr.bf16.gmra.mrb[16].mxu1 %v10110_v34  ;;  %v5847_v34 = vld [vmem:[#allocation2 + $0x6a] sm:$0xff] }
 0x605   : > { %7965 = vmatprep.mubr.bf16.mxu1 %v10114_v25  ;;  %v5875_v25 = vpack.c.bf16 %v5845_v3, %v5844_v33 }
 0x60c   : > { %7966 = vmatmul.mubr.bf16.gmra.mrb[20].mxu1 %v10116_v10  ;;  %v5876_v10 = vpack.c.bf16 %v5847_v34, %v5846_v5 }
 0x60d   : > { %7969 = vmatprep.mubr.bf16.mxu1 %v10120_v35  ;;  %v5849_v35 = vld [vmem:[#allocation2 + $0x82] sm:$0xff] }
 0x614   : > { %7970 = vmatmul.mubr.bf16.gmra.mrb[24].mxu1 %v10122_v6  ;;  %v5851_v6 = vld [vmem:[#allocation2 + $0x9a] sm:$0xff] }
 0x615   : > { %7973 = vmatprep.mubr.bf16.mxu1 %v10126_v58  ;;  %v5877_v58 = vpack.c.bf16 %v5849_v35, %v5848_v39  ;;  %v5878_v45 = vpack.c.bf16 %v5851_v6, %v5850_v54 }
 0x61c   : > { %7974 = vmatmul.mubr.bf16.gmra.mrb[28].mxu1 %v5583_v57 }
 0x61d   : > { %7993 = vmatprep.mubr.bf16.mxu1 %v5874_v22 }
 0x624   : > { %7994 = vmatmul.mubr.bf16.vlgmr.msra.gmra.mrb[0].mxu1 %v5875_v25 }
 0x625   : > { %7997 = vmatprep.mubr.bf16.mxu1 %v5876_v10 }
 0x62c   : > { %7998 = vmatmul.mubr.bf16.gmra.mrb[4].mxu1 %v5877_v58 }
 0x62d   : > { %8001 = vmatprep.mubr.bf16.mxu1 %v5878_v45 }
 0x634   : > { %8002 = vmatmul.mubr.bf16.gmra.mrb[8].mxu1 %v5879_v13 }
 0x635   : > { %8005 = vmatprep.mubr.bf16.mxu1 %v5880_v15 }
 0x63c   : > { %8006 = vmatmul.mubr.bf16.gmra.mrb[12].mxu1 %v5881_v61 }
 0x63d   : > { %8009 = vmatprep.mubr.bf16.mxu1 %v5882_v7 }
 0x644   : > { %8010 = vmatmul.mubr.bf16.gmra.mrb[16].mxu1 %v5883_v14 }
 0x645   : > { %8013 = vmatprep.mubr.bf16.mxu1 %v5884_v2 }
 0x64c   : > { %8014 = vmatmul.mubr.bf16.gmra.mrb[20].mxu1 %v5885_v40 }
 0x64d   : > { %8017 = vmatprep.mubr.bf16.mxu1 %v5886_v50 }
 0x654   : > { %8018 = vmatmul.mubr.bf16.gmra.mrb[24].mxu1 %v5887_v43 }
 0x655   : > { %8021 = vmatprep.mubr.bf16.mxu1 %v10144_v18 }
 0x65c   : > { %8022 = vmatmul.mubr.bf16.gmra.mrb[28].mxu1 %v5889_v62 }
 0x6f7   : > { %v7995_v31 = vpop.f32.mrb[0].mxu1 }
 0x6f8   : > { %v5989_v55 = vpop.f32.mrb[1].mxu1  ;;  %v10176_v18 = vadd.f32 %v7995_v31, %v10167_v0 }
 0x6f9   : > { %v7996_v53 = vpop.f32.mrb[2].mxu1  ;;  %v10170_v27 = vadd.f32 %v10167_v0, %v5989_v55 }
 0x6fa   : > { %v5992_v23 = vpop.f32.mrb[3].mxu1  ;;  %v10181_v41 = vadd.f32 %v7996_v53, %v10167_v0 }
 0x6fb   : > { %v10173_v44 = vadd.f32 %v10167_v0, %v5992_v23 }
 0x6fd   : > { %v6187_v1 = vadd.f32 %v10173_v44, %v10170_v27 }
 0x6ff   : > { %v6188_v51 = vadd.f32 %v6187_v1, %v10176_v18  ;;  %v7999_v17 = vpop.f32.mrb[4].mxu1 }
 0x700   : > { %v6005_v4 = vpop.f32.mrb[5].mxu1  ;;  %v10193_v57 = vadd.f32 %v7999_v17, %v10167_v0 }
 0x701   : > { %v10185_v48 = vadd.f32 %v10167_v0, %v6005_v4  ;;  %v6189_v32 = vadd.f32 %v6188_v51, %v10181_v41  ;;  %v8000_v37 = vpop.f32.mrb[6].mxu1 }
 0x702   : > { %v6008_v8 = vpop.f32.mrb[7].mxu1  ;;  %v10197_v22 = vadd.f32 %v8000_v37, %v10167_v0 }
 0x703   : > { %v6190_v52 = vadd.f32 %v6189_v32, %v10185_v48  ;;  %v10190_v11 = vadd.f32 %v10167_v0, %v6008_v8 }
 0x705   : > { %v6191_v19 = vadd.f32 %v6190_v52, %v10190_v11 }
 0x707   : > { %v6192_v3 = vadd.f32 %v6191_v19, %v10193_v57  ;;  %v8003_v34 = vpop.f32.mrb[8].mxu1 }
 0x708   : > { %v6021_v33 = vpop.f32.mrb[9].mxu1  ;;  %v10209_v58 = vadd.f32 %v8003_v34, %v10167_v0 }
 0x709   : > { %v10201_v25 = vadd.f32 %v10167_v0, %v6021_v33  ;;  %v6193_v5 = vadd.f32 %v6192_v3, %v10197_v22  ;;  %v8004_v10 = vpop.f32.mrb[10].mxu1 }
 0x70a   : > { %v6024_v35 = vpop.f32.mrb[11].mxu1  ;;  %v10213_v45 = vadd.f32 %v8004_v10, %v10167_v0 }
 0x70b   : > { %v6194_v6 = vadd.f32 %v6193_v5, %v10201_v25  ;;  %v10206_v39 = vadd.f32 %v10167_v0, %v6024_v35 }
 0x70d   : > { %v6195_v54 = vadd.f32 %v6194_v6, %v10206_v39 }
 0x70f   : > { %v6196_v24 = vadd.f32 %v6195_v54, %v10209_v58  ;;  %v8007_v29 = vpop.f32.mrb[12].mxu1 }
 0x710   : > { %v6037_v49 = vpop.f32.mrb[13].mxu1  ;;  %v10225_v61 = vadd.f32 %v8007_v29, %v10167_v0 }
 0x711   : > { %v10217_v13 = vadd.f32 %v10167_v0, %v6037_v49  ;;  %v6197_v28 = vadd.f32 %v6196_v24, %v10213_v45  ;;  %v8008_v15 = vpop.f32.mrb[14].mxu1 }
 0x712   : > { %v6040_v16 = vpop.f32.mrb[15].mxu1  ;;  %v10229_v7 = vadd.f32 %v8008_v15, %v10167_v0 }
 0x713   : > { %v6198_v20 = vadd.f32 %v6197_v28, %v10217_v13  ;;  %v10222_v30 = vadd.f32 %v10167_v0, %v6040_v16 }
 0x715   : > { %v6199_v63 = vadd.f32 %v6198_v20, %v10222_v30 }
 0x717   : > { %v6200_v56 = vadd.f32 %v6199_v63, %v10225_v61  ;;  %v8011_v47 = vpop.f32.mrb[16].mxu1 }
 0x718   : > { %v6053_v9 = vpop.f32.mrb[17].mxu1  ;;  %v6173_v40 = vadd.f32 %v8011_v47, %v10167_v0 }
 0x719   : > { %v6171_v14 = vadd.f32 %v10167_v0, %v6053_v9  ;;  %v6201_v46 = vadd.f32 %v6200_v56, %v10229_v7  ;;  %v8012_v2 = vpop.f32.mrb[18].mxu1 }
 0x71a   : > { %v6056_v21 = vpop.f32.mrb[19].mxu1  ;;  %v6174_v50 = vadd.f32 %v8012_v2, %v10167_v0 }
 0x71b   : > { %v6202_v59 = vadd.f32 %v6201_v46, %v6171_v14  ;;  %v6172_v42 = vadd.f32 %v10167_v0, %v6056_v21 }
 0x71d   : > { %v6203_v60 = vadd.f32 %v6202_v59, %v6172_v42 }
 0x71f   : > { %v6204_v12 = vadd.f32 %v6203_v60, %v6173_v40  ;;  %v8015_v26 = vpop.f32.mrb[20].mxu1 }
 0x720   : > { %v6069_v43 = vpop.f32.mrb[21].mxu1  ;;  %v6177_v23 = vadd.f32 %v8015_v26, %v10167_v0 }
 0x721   : > { %v6175_v38 = vadd.f32 %v10167_v0, %v6069_v43  ;;  %v6205_v36 = vadd.f32 %v6204_v12, %v6174_v50  ;;  %v8016_v62 = vpop.f32.mrb[22].mxu1 }
 0x722   : > { %v6072_v31 = vpop.f32.mrb[23].mxu1  ;;  %v6178_v51 = vadd.f32 %v8016_v62, %v10167_v0 }
 0x723   : > { %v6206_v55 = vadd.f32 %v6205_v36, %v6175_v38  ;;  %v6176_v53 = vadd.f32 %v10167_v0, %v6072_v31 }
 0x725   : > { %v6207_v1 = vadd.f32 %v6206_v55, %v6176_v53 }
 0x727   : > { %v6208_v17 = vadd.f32 %v6207_v1, %v6177_v23  ;;  %v8019_v4 = vpop.f32.mrb[24].mxu1 }
 0x728   : > { %v6085_v32 = vpop.f32.mrb[25].mxu1  ;;  %v6181_v33 = vadd.f32 %v8019_v4, %v10167_v0 }
 0x729   : > { %v6179_v37 = vadd.f32 %v10167_v0, %v6085_v32  ;;  %v6209_v8 = vadd.f32 %v6208_v17, %v6178_v51  ;;  %v8020_v52 = vpop.f32.mrb[26].mxu1 }
 0x72a   : > { %v6088_v19 = vpop.f32.mrb[27].mxu1  ;;  %v6182_v10 = vadd.f32 %v8020_v52, %v10167_v0 }
 0x72b   : > { %v6210_v3 = vadd.f32 %v6209_v8, %v6179_v37  ;;  %v6180_v34 = vadd.f32 %v10167_v0, %v6088_v19 }
 0x72d   : > { %v6211_v5 = vadd.f32 %v6210_v3, %v6180_v34 }
 0x72f   : > { %v6212_v35 = vadd.f32 %v6211_v5, %v6181_v33  ;;  %v8023_v6 = vpop.f32.mrb[28].mxu1 }
 0x730   : > { %v6101_v54 = vpop.f32.mrb[29].mxu1  ;;  %v6185_v20 = vadd.f32 %v8023_v6, %v10167_v0 }
 0x731   : > { %v6183_v24 = vadd.f32 %v10167_v0, %v6101_v54  ;;  %v6213_v29 = vadd.f32 %v6212_v35, %v6182_v10  ;;  %v8024_v49 = vpop.f32.mrb[30].mxu1 }
 0x732   : > { %v6104_v28 = vpop.f32.mrb[31].mxu1  ;;  %v6186_v56 = vadd.f32 %v8024_v49, %v10167_v0 }
 0x733   : > { %v6214_v15 = vadd.f32 %v6213_v29, %v6183_v24  ;;  %v6184_v16 = vadd.f32 %v10167_v0, %v6104_v28 }
 0x735   : > { %v6215_v63 = vadd.f32 %v6214_v15, %v6184_v16 }
 0x737   : > { %v6216_v47 = vadd.f32 %v6215_v63, %v6185_v20 }
 0x739   : > { %v6217_v9 = vadd.f32 %v6216_v47, %v6186_v56 }
 0x73b   : > { %v6218_v46 = vrot.slane %v6217_v9, 4 }
 0x73d   : > { %v6219_v2 = vadd.f32 %v6218_v46, %v6217_v9 }
 0x73f   : > { %v6220_v21 = vrot.slane %v6219_v2, 2 }
 0x741   : > { %v6221_v59 = vadd.f32 %v6220_v21, %v6219_v2 }
 0x743   : > { %v6222_v60 = vrot.slane %v6221_v59, 1 }
 0x745   : > { %v6223_v12 = vadd.f32 %v6222_v60, %v6221_v59 }
 0x747   : > { %v6224_v26 = vmul.f32 0.00390625, %v6223_v12 }
 0x749   : > { %v10250_v43 = vsub.f32 %v10201_v25, %v6224_v26  ;;  %v10253_v36 = vsub.f32 %v10206_v39, %v6224_v26  ;;  %v10256_v62 = vsub.f32 %v10209_v58, %v6224_v26  ;;  %v10259_v0 = vsub.f32 %v10213_v45, %v6224_v26 }
 0x74a   : > { %v10262_v31 = vsub.f32 %v10217_v13, %v6224_v26  ;;  %v10265_v55 = vsub.f32 %v10222_v30, %v6224_v26  ;;  %v10268_v1 = vsub.f32 %v10225_v61, %v6224_v26  ;;  %v10271_v25 = vsub.f32 %v10229_v7, %v6224_v26 }
 0x74b   : > { %v10273_v39 = vsub.f32 %v6171_v14, %v6224_v26  ;;  %v10275_v17 = vsub.f32 %v6172_v42, %v6224_v26  ;;  %v10277_v58 = vsub.f32 %v6173_v40, %v6224_v26  ;;  %v10279_v45 = vsub.f32 %v6174_v50, %v6224_v26 }
 0x74c   : > { %v10281_v4 = vsub.f32 %v6175_v38, %v6224_v26  ;;  %v10283_v13 = vsub.f32 %v6176_v53, %v6224_v26  ;;  %v10285_v30 = vsub.f32 %v6177_v23, %v6224_v26  ;;  %v10287_v32 = vsub.f32 %v6178_v51, %v6224_v26 }
 0x74d   : > { %v10289_v61 = vsub.f32 %v6179_v37, %v6224_v26  ;;  %v10291_v7 = vsub.f32 %v6180_v34, %v6224_v26  ;;  %v10293_v14 = vsub.f32 %v6181_v33, %v6224_v26  ;;  %v10295_v42 = vsub.f32 %v6182_v10, %v6224_v26 }
 0x74e   : > { %v10297_v40 = vsub.f32 %v6183_v24, %v6224_v26  ;;  %v10299_v50 = vsub.f32 %v6184_v16, %v6224_v26  ;;  %v10301_v38 = vsub.f32 %v6185_v20, %v6224_v26  ;;  %v10303_v53 = vsub.f32 %v6186_v56, %v6224_v26 }
 0x74f   : > { %v10306_v23 = vsub.f32 %v10170_v27, %v6224_v26  ;;  %v10309_v51 = vsub.f32 %v10173_v44, %v6224_v26  ;;  %v10312_v37 = vsub.f32 %v10176_v18, %v6224_v26  ;;  %v10319_v19 = vsub.f32 %v10181_v41, %v6224_v26 }
 0x750   : > { %v10322_v3 = vsub.f32 %v10185_v48, %v6224_v26  ;;  %v10327_v34 = vsub.f32 %v10190_v11, %v6224_v26  ;;  %v10332_v5 = vsub.f32 %v10193_v57, %v6224_v26  ;;  %v10337_v48 = vsub.f32 %v10197_v22, %v6224_v26 }
 0x751   : > { %v6257_v8 = vmul.f32 %v10306_v23, %v10306_v23  ;;  %v6258_v52 = vmul.f32 %v10309_v51, %v10309_v51  ;;  %v6259_v27 = vmul.f32 %v10312_v37, %v10312_v37  ;;  %v6260_v18 = vmul.f32 %v10319_v19, %v10319_v19 }
 0x752   : > { %v6261_v41 = vmul.f32 %v10322_v3, %v10322_v3  ;;  %v6262_v35 = vmul.f32 %v10327_v34, %v10327_v34  ;;  %v6263_v11 = vmul.f32 %v10332_v5, %v10332_v5  ;;  %v6264_v24 = vmul.f32 %v10337_v48, %v10337_v48 }
 0x753   : > { %v6289_v44 = vadd.f32 %v6258_v52, %v6257_v8  ;;  %v6265_v29 = vmul.f32 %v10250_v43, %v10250_v43  ;;  %v6266_v22 = vmul.f32 %v10253_v36, %v10253_v36  ;;  %v6267_v15 = vmul.f32 %v10256_v62, %v10256_v62 }
 0x754   : > { %v6268_v20 = vmul.f32 %v10259_v0, %v10259_v0  ;;  %v6269_v56 = vmul.f32 %v10262_v31, %v10262_v31  ;;  %v6270_v9 = vmul.f32 %v10265_v55, %v10265_v55  ;;  %v6271_v2 = vmul.f32 %v10268_v1, %v10268_v1 }
 0x755   : > { %v6290_v33 = vadd.f32 %v6289_v44, %v6259_v27  ;;  %v6272_v59 = vmul.f32 %v10271_v25, %v10271_v25  ;;  %v6273_v12 = vmul.f32 %v10273_v39, %v10273_v39  ;;  %v6274_v8 = vmul.f32 %v10275_v17, %v10275_v17 }
 0x756   : > { %v6275_v27 = vmul.f32 %v10277_v58, %v10277_v58 }
 0x757   : > { %v6291_v10 = vadd.f32 %v6290_v33, %v6260_v18  ;;  %v6276_v18 = vmul.f32 %v10279_v45, %v10279_v45 }
 0x759   : > { %v6292_v6 = vadd.f32 %v6291_v10, %v6261_v41  ;;  %v6277_v41 = vmul.f32 %v10281_v4, %v10281_v4 }
 0x75b   : > { %v6293_v54 = vadd.f32 %v6292_v6, %v6262_v35  ;;  %v6278_v35 = vmul.f32 %v10283_v13, %v10283_v13 }
 0x75d   : > { %v6294_v57 = vadd.f32 %v6293_v54, %v6263_v11  ;;  %v6279_v11 = vmul.f32 %v10285_v30, %v10285_v30 }
 0x75f   : > { %v6295_v49 = vadd.f32 %v6294_v57, %v6264_v24  ;;  %v6280_v24 = vmul.f32 %v10287_v32, %v10287_v32 }
 0x761   : > { %v6296_v28 = vadd.f32 %v6295_v49, %v6265_v29  ;;  %v6281_v29 = vmul.f32 %v10289_v61, %v10289_v61 }
 0x763   : > { %v6297_v16 = vadd.f32 %v6296_v28, %v6266_v22  ;;  %v6282_v22 = vmul.f32 %v10291_v7, %v10291_v7 }
 0x765   : > { %v6298_v63 = vadd.f32 %v6297_v16, %v6267_v15  ;;  %v6283_v15 = vmul.f32 %v10293_v14, %v10293_v14 }
 0x767   : > { %v6299_v47 = vadd.f32 %v6298_v63, %v6268_v20  ;;  %v6284_v20 = vmul.f32 %v10295_v42, %v10295_v42 }
 0x769   : > { %v6300_v46 = vadd.f32 %v6299_v47, %v6269_v56  ;;  %v6285_v56 = vmul.f32 %v10297_v40, %v10297_v40 }
 0x76b   : > { %v6301_v21 = vadd.f32 %v6300_v46, %v6270_v9  ;;  %v6286_v9 = vmul.f32 %v10299_v50, %v10299_v50 }
 0x76d   : > { %v6302_v60 = vadd.f32 %v6301_v21, %v6271_v2  ;;  %v6287_v2 = vmul.f32 %v10301_v38, %v10301_v38 }
 0x76f   : > { %v6303_v26 = vadd.f32 %v6302_v60, %v6272_v59  ;;  %v6288_v59 = vmul.f32 %v10303_v53, %v10303_v53 }
 0x771   : > { %v6304_v52 = vadd.f32 %v6303_v26, %v6273_v12 }
 0x773   : > { %v6305_v44 = vadd.f32 %v6304_v52, %v6274_v8 }
 0x775   : > { %v6306_v33 = vadd.f32 %v6305_v44, %v6275_v27 }
 0x777   : > { %v6307_v10 = vadd.f32 %v6306_v33, %v6276_v18 }
 0x779   : > { %v6308_v6 = vadd.f32 %v6307_v10, %v6277_v41 }
 0x77b   : > { %v6309_v54 = vadd.f32 %v6308_v6, %v6278_v35  ;;  %v6390_v35 = vld [vmem:[%s9134_s6 + $0xe8] sm:$0xff] }
 0x77d   : > { %v6310_v57 = vadd.f32 %v6309_v54, %v6279_v11 }
 0x77f   : > { %v6311_v49 = vadd.f32 %v6310_v57, %v6280_v24 }
 0x781   : > { %v6312_v28 = vadd.f32 %v6311_v49, %v6281_v29 }
 0x783   : > { %v6313_v16 = vadd.f32 %v6312_v28, %v6282_v22 }
 0x785   : > { %v6314_v63 = vadd.f32 %v6313_v16, %v6283_v15  ;;  %v6361_v15 = vld [vmem:[%s9134_s6] sm:$0xff]  ;;  %v6364_v16 = vld [vmem:[%s9134_s6 + $0x18] sm:$0xff] }
 0x787   : > { %v6315_v47 = vadd.f32 %v6314_v63, %v6284_v20  ;;  %v6367_v20 = vld [vmem:[%s9134_s6 + $0x30] sm:$0xff]  ;;  %v6366_v63 = vld [vmem:[%s9134_s6 + $0x28] sm:$0xff] }
 0x789   : > { %v6316_v46 = vadd.f32 %v6315_v47, %v6285_v56  ;;  %v6371_v56 = vld [vmem:[%s9134_s6 + $0x50] sm:$0xff]  ;;  %v6369_v47 = vld [vmem:[%s9134_s6 + $0x40] sm:$0xff] }
 0x78b   : > { %v6317_v21 = vadd.f32 %v6316_v46, %v6286_v9  ;;  %v6370_v46 = vld [vmem:[%s9134_s6 + $0x48] sm:$0xff] }
 0x78d   : > { %v6318_v60 = vadd.f32 %v6317_v21, %v6287_v2  ;;  %v6375_v2 = vld [vmem:[%s9134_s6 + $0x70] sm:$0xff] }
 0x78f   : > { %v6319_v12 = vadd.f32 %v6318_v60, %v6288_v59  ;;  %v6374_v60 = vld [vmem:[%s9134_s6 + $0x68] sm:$0xff] }
 0x791   : > { %v6320_v26 = vrot.slane %v6319_v12, 4 }
 0x793   : > { %v6321_v8 = vadd.f32 %v6320_v26, %v6319_v12  ;;  %v6377_v26 = vld [vmem:[%s9134_s6 + $0x80] sm:$0xff] }
 0x795   : > { %v6322_v52 = vrot.slane %v6321_v8, 2 }
 0x797   : > { %v6323_v27 = vadd.f32 %v6322_v52, %v6321_v8  ;;  %v6380_v8 = vld [vmem:[%s9134_s6 + $0x98] sm:$0xff] }
 0x799   : > { %v6324_v44 = vrot.slane %v6323_v27, 1 }
 0x79b   : > { %v6325_v18 = vadd.f32 %v6324_v44, %v6323_v27  ;;  %v6378_v44 = vld [vmem:[%s9134_s6 + $0x88] sm:$0xff] }
 0x79d   : > { %v6326_v33 = vmul.f32 0.00390625, %v6325_v18  ;;  %v6381_v18 = vld [vmem:[%s9134_s6 + $0xa0] sm:$0xff] }
 0x79f   : > { %v6327_v41 = vadd.f32 1e-05, %v6326_v33 }
 0x7a1   : > { %8756 = vrsqrt.f32 %v6327_v41 }
 0x7ab   : > { %v8757_v10 = vpop.eup %8756 }
 0x7ac   : > { %v6358_v6 = vmul.f32 %v8757_v10, %v10299_v50  ;;  %v6329_v11 = vmul.f32 %v8757_v10, %v10306_v23  ;;  %v6330_v54 = vmul.f32 %v8757_v10, %v10309_v51  ;;  %v6331_v24 = vmul.f32 %v8757_v10, %v10312_v37  ;;  %v6363_v37 = vld [vmem:[%s9134_s6 + $0x10] sm:$0xff] }
 0x7ad   : > { %v6332_v57 = vmul.f32 %v8757_v10, %v10319_v19  ;;  %v6333_v29 = vmul.f32 %v8757_v10, %v10322_v3  ;;  %v6334_v49 = vmul.f32 %v8757_v10, %v10327_v34  ;;  %v6335_v22 = vmul.f32 %v8757_v10, %v10332_v5 }
 0x7ae   : > { %v6422_v50 = vadd.f32 %v6390_v35, %v6358_v6  ;;  %v6336_v23 = vmul.f32 %v8757_v10, %v10337_v48  ;;  %v6337_v51 = vmul.f32 %v8757_v10, %v10250_v43  ;;  %v6338_v28 = vmul.f32 %v8757_v10, %v10253_v36  ;;  %v6362_v48 = vld [vmem:[%s9134_s6 + $0x8] sm:$0xff]  ;;  %v6365_v43 = vld [vmem:[%s9134_s6 + $0x20] sm:$0xff]  ;;  %v6384_v6 = vld [vmem:[%s9134_s6 + $0xb8] sm:$0xff] }
 0x7af   : > { %v6339_v19 = vmul.f32 %v8757_v10, %v10256_v62  ;;  %v6340_v3 = vmul.f32 %v8757_v10, %v10259_v0  ;;  %v6341_v34 = vmul.f32 %v8757_v10, %v10262_v31  ;;  %v6342_v5 = vmul.f32 %v8757_v10, %v10265_v55  ;;  %v6368_v55 = vld [vmem:[%s9134_s6 + $0x38] sm:$0xff] }
 0x7b0   : > { %6454 = vst [vmem:[%s10417_s11 + $0xe8] sm:$0xff] %v6422_v50  ;;  %v6343_v36 = vmul.f32 %v8757_v10, %v10268_v1  ;;  %v10422_v62 = vmul.f32 %v8757_v10, %v10271_v25  ;;  %v10425_v0 = vmul.f32 %v8757_v10, %v10273_v39  ;;  %v10428_v31 = vmul.f32 %v8757_v10, %v10275_v17  ;;  %v6372_v17 = vld [vmem:[%s9134_s6 + $0x58] sm:$0xff]  ;;  %v6382_v50 = vld [vmem:[%s9134_s6 + $0xa8] sm:$0xff] }
 0x7b1   : > { %v6347_v9 = vmul.f32 %v8757_v10, %v10277_v58  ;;  %v10436_v1 = vmul.f32 %v8757_v10, %v10279_v45  ;;  %v10439_v25 = vmul.f32 %v8757_v10, %v10281_v4  ;;  %v10442_v39 = vmul.f32 %v8757_v10, %v10283_v13  ;;  %v6373_v4 = vld [vmem:[%s9134_s6 + $0x60] sm:$0xff]  ;;  %v6376_v13 = vld [vmem:[%s9134_s6 + $0x78] sm:$0xff] }
 0x7b2   : > { %v6351_v21 = vmul.f32 %v8757_v10, %v10285_v30  ;;  %v10449_v59 = vmul.f32 %v8757_v10, %v10287_v32  ;;  %v10452_v58 = vmul.f32 %v8757_v10, %v10289_v61  ;;  %v10455_v45 = vmul.f32 %v8757_v10, %v10291_v7  ;;  %v6379_v7 = vld [vmem:[%s9134_s6 + $0x90] sm:$0xff] }
 0x7b3   : > { %v10461_v12 = vmul.f32 %v8757_v10, %v10293_v14  ;;  %v10464_v30 = vmul.f32 %v8757_v10, %v10295_v42  ;;  %v10467_v32 = vmul.f32 %v8757_v10, %v10297_v40  ;;  %v10470_v61 = vmul.f32 %v8757_v10, %v10301_v38  ;;  %v6383_v40 = vld [vmem:[%s9134_s6 + $0xb0] sm:$0xff] }
 0x7b4   : > { %v10476_v52 = vmul.f32 %v8757_v10, %v10303_v53  ;;  %v6393_v14 = vadd.f32 %v6361_v15, %v6329_v11  ;;  %v6394_v27 = vadd.f32 %v6362_v48, %v6330_v54  ;;  %v6395_v42 = vadd.f32 %v6363_v37, %v6331_v24  ;;  %v6387_v53 = vld [vmem:[%s9134_s6 + $0xd0] sm:$0xff]  ;;  %v6389_v15 = vld [vmem:[%s9134_s6 + $0xe0] sm:$0xff] }
 0x7b5   : > { %v6396_v38 = vadd.f32 %v6364_v16, %v6332_v57  ;;  %v6397_v33 = vadd.f32 %v6365_v43, %v6333_v29  ;;  %v6398_v41 = vadd.f32 %v6366_v63, %v6334_v49  ;;  %v6399_v35 = vadd.f32 %v6367_v20, %v6335_v22  ;;  %v6385_v57 = vld [vmem:[%s9134_s6 + $0xc0] sm:$0xff]  ;;  %v6388_v29 = vld [vmem:[%s9134_s6 + $0xd8] sm:$0xff]  ;;  %v6386_v49 = vld [vmem:[%s9134_s6 + $0xc8] sm:$0xff] }
 0x7b6   : > { %v6400_v10 = vadd.f32 %v6368_v55, %v6336_v23  ;;  %v6401_v11 = vadd.f32 %v6369_v47, %v6337_v51  ;;  %v6402_v54 = vadd.f32 %v6370_v46, %v6338_v28  ;;  %v6403_v24 = vadd.f32 %v6371_v56, %v6339_v19  ;;  %6425 = vst [vmem:[%s10417_s11] sm:$0xff] %v6393_v14  ;;  %v6391_v28 = vld [vmem:[%s9134_s6 + $0xf0] sm:$0xff]  ;;  %v6392_v19 = vld [vmem:[%s9134_s6 + $0xf8] sm:$0xff] }
 0x7b7   : > { %6426 = vst [vmem:[%s10417_s11 + $0x8] sm:$0xff] %v6394_v27  ;;  %6427 = vst [vmem:[%s10417_s11 + $0x10] sm:$0xff] %v6395_v42  ;;  %v6404_v22 = vadd.f32 %v6372_v17, %v6340_v3  ;;  %v6405_v37 = vadd.f32 %v6373_v4, %v6341_v34  ;;  %v6406_v23 = vadd.f32 %v6374_v60, %v6342_v5 }
 0x7b8   : > { %v6407_v51 = vadd.f32 %v6375_v2, %v6343_v36  ;;  %6428 = vst [vmem:[%s10417_s11 + $0x18] sm:$0xff] %v6396_v38  ;;  %6429 = vst [vmem:[%s10417_s11 + $0x20] sm:$0xff] %v6397_v33  ;;  %v6408_v3 = vadd.f32 %v6376_v13, %v10422_v62  ;;  %v6409_v34 = vadd.f32 %v6377_v26, %v10425_v0 }
 0x7b9   : > { %6430 = vst [vmem:[%s10417_s11 + $0x28] sm:$0xff] %v6398_v41  ;;  %6431 = vst [vmem:[%s10417_s11 + $0x30] sm:$0xff] %v6399_v35  ;;  %v6410_v5 = vadd.f32 %v6378_v44, %v10428_v31  ;;  %v6411_v16 = vadd.f32 %v6379_v7, %v6347_v9  ;;  %v6412_v48 = vadd.f32 %v6380_v8, %v10436_v1 }
 0x7ba   : > { %6432 = vst [vmem:[%s10417_s11 + $0x38] sm:$0xff] %v6400_v10  ;;  %6433 = vst [vmem:[%s10417_s11 + $0x40] sm:$0xff] %v6401_v11  ;;  %v6413_v20 = vadd.f32 %v6381_v18, %v10439_v25  ;;  %v6414_v43 = vadd.f32 %v6382_v50, %v10442_v39  ;;  %v6415_v36 = vadd.f32 %v6383_v40, %v6351_v21 }
 0x7bb   : > { %6434 = vst [vmem:[%s10417_s11 + $0x48] sm:$0xff] %v6402_v54  ;;  %6435 = vst [vmem:[%s10417_s11 + $0x50] sm:$0xff] %v6403_v24  ;;  %v6416_v62 = vadd.f32 %v6384_v6, %v10449_v59  ;;  %v6417_v0 = vadd.f32 %v6385_v57, %v10452_v58  ;;  %v6418_v31 = vadd.f32 %v6386_v49, %v10455_v45 }
 0x7bc   : > { %6436 = vst [vmem:[%s10417_s11 + $0x58] sm:$0xff] %v6404_v22  ;;  %6437 = vst [vmem:[%s10417_s11 + $0x60] sm:$0xff] %v6405_v37  ;;  %v6419_v55 = vadd.f32 %v6387_v53, %v10461_v12  ;;  %v6420_v63 = vadd.f32 %v6388_v29, %v10464_v30  ;;  %v6421_v56 = vadd.f32 %v6389_v15, %v10467_v32 }
 0x7bd   : > { %6438 = vst [vmem:[%s10417_s11 + $0x68] sm:$0xff] %v6406_v23  ;;  %6439 = vst [vmem:[%s10417_s11 + $0x70] sm:$0xff] %v6407_v51  ;;  %v6423_v47 = vadd.f32 %v6391_v28, %v10470_v61  ;;  %v6424_v9 = vadd.f32 %v6392_v19, %v10476_v52 }
 0x7be   : > { %6440 = vst [vmem:[%s10417_s11 + $0x78] sm:$0xff] %v6408_v3  ;;  %6441 = vst [vmem:[%s10417_s11 + $0x80] sm:$0xff] %v6409_v34 }
 0x7bf   : > { %6442 = vst [vmem:[%s10417_s11 + $0x88] sm:$0xff] %v6410_v5  ;;  %6443 = vst [vmem:[%s10417_s11 + $0x90] sm:$0xff] %v6411_v16 }
 0x7c0   : > { %6444 = vst [vmem:[%s10417_s11 + $0x98] sm:$0xff] %v6412_v48  ;;  %6445 = vst [vmem:[%s10417_s11 + $0xa0] sm:$0xff] %v6413_v20 }
 0x7c1   : > { %6446 = vst [vmem:[%s10417_s11 + $0xa8] sm:$0xff] %v6414_v43  ;;  %6447 = vst [vmem:[%s10417_s11 + $0xb0] sm:$0xff] %v6415_v36 }
 0x7c2   : > { %6448 = vst [vmem:[%s10417_s11 + $0xb8] sm:$0xff] %v6416_v62  ;;  %6449 = vst [vmem:[%s10417_s11 + $0xc0] sm:$0xff] %v6417_v0 }
 0x7c3   : > { %6450 = vst [vmem:[%s10417_s11 + $0xc8] sm:$0xff] %v6418_v31  ;;  %6451 = vst [vmem:[%s10417_s11 + $0xd0] sm:$0xff] %v6419_v55 }
 0x7c4   : > { %6452 = vst [vmem:[%s10417_s11 + $0xd8] sm:$0xff] %v6420_v63  ;;  %6453 = vst [vmem:[%s10417_s11 + $0xe0] sm:$0xff] %v6421_v56 }
 0x7c5   : > { %6455 = vst [vmem:[%s10417_s11 + $0xf0] sm:$0xff] %v6423_v47  ;;  %6456 = vst [vmem:[%s10417_s11 + $0xf8] sm:$0xff] %v6424_v9 }
 0x7c6   : > { %8857 = shalt.err (!%p8854_p2)
}
 0x7c7   : > { %s8858_s6 = scalar_lea.hbm %s10526_s9, 4096  ;;  %s8862_s8 = scalar_lea.hbm %s10595_s5, 8192 }
 0x7c8   : > { %p8859_p13 = scmp.ne.s32.totalorder %s10526_s9, %s8858_s6  ;;  %p8863_p4 = scmp.lt.u32.totalorder %s10526_s9, %s10595_s5 }
 0x7c9   : > { %p8864_p5 = scmp.lt.u32.totalorder %s8862_s8, %s8858_s6  ;;  %p8866_p11 = scmp.lt.u32.totalorder %s8858_s6, %s10526_s9 }
 0x7ca   : > { %p8860_p6 = pnand %p8859_p13, %p10609_p0 }
 0x7cb   : > { %p8865_p8 = por %p8864_p5, %p8863_p4 }
 0x7cc   : > { %p8861_p10 = pneg %p8860_p6 }
 0x7cd   : > { %p8867_p1 = por %p8866_p11, %p8865_p8 }
 0x7cf   : > { %p8868_p3 = pnand %p8867_p1, %p8861_p10 }
 0x7d1   : > { %8871 = shalt.err (!%p8868_p3)
}
 0x7d2   : > { %s8924_s28 = smov 128   ;;  %s8925_s15 = smov 8  }
 0x7d3   : > { %8547 = dma.vmem_to_hbm [thread:$0]  (%p10609_p0), %s10530_s30, 4096, %s10526_s9, %s6458_s22, %s8924_s28, %s8924_s28, %s8925_s15  }
 0x7d4 PF: > { %s6486_s16 = sand.u32 1, %s8902_s18   ;;  %p10610_p7 = scmp.ne.s32.totalorder %s10600_s25, 0 }
 0x7d5   : > { %p10611_p9 = scmp.ge.s32.totalorder %s8914_s21, 2  ;;  %s6487_s12 = scalar_lea.sflag [#allocation5], %s6486_s16 }
 0x7d7   : > { %p8561_p12 = pnand %p10611_p9, %p10610_p7 }
 0x7d9   : > { %8897 = dma.done.wait (!%p8561_p12), %s6487_s12, 4096  }
 0x7da   : > { %8899 = vsyncadd (!%p8561_p12), %s6487_s12, 4294963200  ;;  %p19_p2 = scmp.ge.s32.totalorder %s9066_s14, 4   ;;  %s10612_s18 = smov %s8906_s19 }
 0x7db   : > { %s10613_s19 = smov %s8910_s20  ;;  %s10614_s20 = smov %s9082_s27 }
 0x7dc   : > { %s10615_s21 = smov %s9066_s14  ;;  %21 = sbr.rel (!%p19_p2) target bundleno = 6 (0x6), region = 112 }
 0x7e3   :  { %6492 = vsyncpa [#allocation4], 1 }
 0x7e4   :  { %6494 = vsyncpa [#allocation4 + $0x1], 1 }
 0x7e5   :  { %6495 = vsyncpa [#allocation7], 1 }
 0x7e6   :  { %6496 = vsyncpa [#allocation5], 1 }
 0x7e7   :  { %6498 = vsyncpa [#allocation5 + $0x1], 1 }

</bundles_post_ra>
